<compile_context>
chip_gen: v7x
topology: tpu7x:2x2x1
jax: 0.10.0
libtpu: 0.0.40
codegen_flags: <defaults>
</compile_context>

<pallas_src>
import jax
import jax.numpy as jnp
from jax.experimental import pallas as pl
from jax.experimental.pallas import tpu as pltpu

EPS = 1e-5  # nn.InstanceNorm3d default eps (affine=False, no running stats)


# --------------------------------- kernel --------------------------------- #

def _make_kernel(D, H, W, Cin, Cout, identity_res):
    HP = H + 2                      # rows per d-slab (H + 2 halo rows)
    M = D * HP                      # folded matmul M (includes 2 garbage rows per d-slab)
    L = W * Cout                    # lane-fused output width
    count = float(D * H * W)        # valid elements per channel for InstanceNorm

    def kernel(*refs):
        if identity_res:
            x_ref, wb1_ref, wb2_ref, sel_ref, out_ref, h1p_ref = refs
            wres_ref = bres_ref = None
        else:
            x_ref, wb1_ref, wb2_ref, wres_ref, bres_ref, sel_ref, out_ref, h1p_ref = refs

        # Rows m with (m mod HP) >= H are garbage (they straddle d-slab boundaries): mask
        # them out of the norm statistics and zero them in h1.
        row = jax.lax.broadcasted_iota(jnp.int32, (M, 1), 0)
        valid = (row % HP) < H

        def banded_conv(src_ref, wb_ref):
            acc = jnp.zeros((M, L), jnp.float32)
            for kd in range(3):
                for kh in range(3):
                    off = kd * HP + kh
                    acc = acc + jnp.dot(src_ref[off:off + M, :], wb_ref[kd, kh],
                                        preferred_element_type=jnp.float32)
            return acc

        def inst_norm_coeffs(acc):
            z = jnp.where(valid, acc, 0.0)
            s = jnp.sum(z, axis=0, keepdims=True)                        # (1, L)
            q = jnp.sum(z * z, axis=0, keepdims=True)                    # (1, L)
            ch = jnp.dot(jnp.concatenate([s, q], axis=0), sel_ref[...],
                         preferred_element_type=jnp.float32)             # (2, Cout)
            mean = ch[0:1] / count
            var = jnp.maximum(ch[1:2] / count - mean * mean, 0.0)        # clamp f32 cancellation
            inv = jax.lax.rsqrt(var + EPS)
            return jnp.tile(inv, (1, W)), jnp.tile(-mean * inv, (1, W))  # (1, L) each

        # Zero only the h1-slab pad border; the interior (+ the halo rows covered by the
        # contiguous store below) is fully rewritten each step.
        h1p_ref[0:HP + 1, :] = jnp.zeros((HP + 1, L), h1p_ref.dtype)
        h1p_ref[(D + 1) * HP + 1:(D + 3) * HP, :] = jnp.zeros((2 * HP - 1, L), h1p_ref.dtype)

        # ------------- conv1 (bias dropped: cancelled by InstanceNorm) + IN + ReLU ---------
        acc1 = banded_conv(x_ref, wb1_ref)
        a1, b1 = inst_norm_coeffs(acc1)
        h1 = jnp.where(valid, jnp.maximum(acc1 * a1 + b1, 0.0), 0.0)
        # One contiguous store: valid rows land on the slab interior, garbage rows land
        # exactly on the hp==0 / hp==H+1 halo rows, overwriting them with zeros.
        h1p_ref[HP + 1:HP + 1 + M, :] = h1.astype(h1p_ref.dtype)

        # ----------------------------------- conv2 + IN ------------------------------------
        acc2 = banded_conv(h1p_ref, wb2_ref)
        a2, b2 = inst_norm_coeffs(acc2)

        # ------------------ residual (identity or 1x1x1 projection) + ReLU -----------------
        res_rows = x_ref[HP + 1:HP + 1 + M, :]
        if identity_res:
            res = res_rows.astype(jnp.float32)
        else:
            res = jnp.dot(res_rows, wres_ref[...],
                          preferred_element_type=jnp.float32) + bres_ref[...]
        out_ref[...] = jnp.maximum(acc2 * a2 + b2 + res, 0.0)

    return kernel


# --------------------------- host-side weight prep --------------------------- #

def _banded_conv_weight(w, W):
    """w: (3,3,3,Cin,Cout) -> (3,3,W*Cin,W*Cout); out-of-range kw taps dropped (zero pad in W)."""
    cin, cout = int(w.shape[3]), int(w.shape[4])
    wb = jnp.zeros((3, 3, W * cin, W * cout), w.dtype)
    for kw in range(3):
        for wo in range(W):
            wi = wo + kw - 1
            if 0 <= wi < W:
                wb = wb.at[:, :, wi * cin:(wi + 1) * cin,
                           wo * cout:(wo + 1) * cout].set(w[:, :, kw])
    return wb


def _blockdiag(m, W):
    """m: (Cin, Cout) -> block-diagonal (W*Cin, W*Cout) for the lane-fused layout."""
    cin, cout = int(m.shape[0]), int(m.shape[1])
    out = jnp.zeros((W * cin, W * cout), m.dtype)
    for wo in range(W):
        out = out.at[wo * cin:(wo + 1) * cin, wo * cout:(wo + 1) * cout].set(m)
    return out


def init_params(key, cin, cout):
    """Deterministic synthetic parameters (shapes match the nn.Module)."""
    ks = jax.random.split(key, 6)
    params = dict(
        w1=jax.random.normal(ks[0], (3, 3, 3, cin, cout), jnp.float32) / jnp.sqrt(27.0 * cin),
        b1=0.1 * jax.random.normal(ks[1], (cout,), jnp.float32),
        w2=jax.random.normal(ks[2], (3, 3, 3, cout, cout), jnp.float32) / jnp.sqrt(27.0 * cout),
        b2=0.1 * jax.random.normal(ks[3], (cout,), jnp.float32),
    )
    if cin != cout:
        params["wres"] = jax.random.normal(ks[4], (cin, cout), jnp.float32) / jnp.sqrt(1.0 * cin)
        params["bres"] = 0.1 * jax.random.normal(ks[5], (1, cout), jnp.float32)
    return params


# ----------------------------------- forward ----------------------------------- #

def res_block_forward(x_ncdhw, params, in_channels, out_channels):
    """Matches ResBlock.forward (stride=1). Input/output: NCDHW float32."""
    n, c, d, h, w = x_ncdhw.shape
    assert c == in_channels
    cin, cout = in_channels, out_channels
    identity = (cin == cout)
    HP = h + 2
    M = d * HP
    L = w * cout
    K1 = w * cin
    SLAB = (d + 3) * HP   # extra trailing d-slab so the kd=2,kh=2 folded read stays in bounds

    # Zero-FLOP layout prep: fuse (W, C) into the lane dim, pad D (1,2) and H (1,1) only,
    # flatten (D,H) into the matmul M dimension, and feed bf16 straight to the MXU.
    x_r = jnp.transpose(x_ncdhw, (0, 2, 3, 4, 1)).reshape(n, d, h, K1)
    x_pad = jnp.pad(x_r, ((0, 0), (1, 2), (1, 1), (0, 0)))
    x_slab = x_pad.reshape(n, SLAB, K1).astype(jnp.bfloat16)

    wb1 = _banded_conv_weight(params["w1"], w).astype(jnp.bfloat16)   # (3,3,K1,L)
    wb2 = _banded_conv_weight(params["w2"], w).astype(jnp.bfloat16)   # (3,3,L,L)
    sel = jnp.tile(jnp.eye(cout, dtype=jnp.float32), (w, 1))          # (L, Cout)

    args = [x_slab, wb1, wb2]
    in_specs = [
        pl.BlockSpec((None, SLAB, K1), lambda i: (i, 0, 0)),          # padded x slab (bf16)
        pl.BlockSpec((3, 3, K1, L), lambda i: (0, 0, 0, 0)),          # banded w1
        pl.BlockSpec((3, 3, L, L), lambda i: (0, 0, 0, 0)),           # banded w2
    ]
    if not identity:
        wres = _blockdiag(params["wres"], w).astype(jnp.bfloat16)     # (K1, L)
        bres = jnp.tile(params["bres"].astype(jnp.float32), (1, w))   # (1, L)
        args += [wres, bres]
        in_specs += [pl.BlockSpec((K1, L), lambda i: (0, 0)),
                     pl.BlockSpec((1, L), lambda i: (0, 0))]
    args.append(sel)
    in_specs.append(pl.BlockSpec((L, cout), lambda i: (0, 0)))

    kernel = _make_kernel(d, h, w, cin, cout, identity)
    out_slab = pl.pallas_call(
        kernel,
        out_shape=jax.ShapeDtypeStruct((n, M, L), jnp.float32),
        grid_spec=pltpu.PrefetchScalarGridSpec(
            num_scalar_prefetch=0,
            grid=(n,),
            in_specs=in_specs,
            out_specs=pl.BlockSpec((None, M, L), lambda i: (i, 0, 0)),
            scratch_shapes=[pltpu.VMEM((SLAB, L), jnp.bfloat16)],      # padded h1 slab
        ),
        compiler_params=pltpu.CompilerParams(dimension_semantics=("parallel",)),
    )(*args)

    # Drop the 2 garbage rows per d-slab and restore NCDHW.
    out = out_slab.reshape(n, d, HP, w, cout)[:, :, :h]
    return jnp.transpose(out, (0, 4, 1, 2, 3))


# ------------------------------ pure-JAX reference ------------------------------ #

def _inst_norm_ndhwc(x):
    mean = jnp.mean(x, axis=(1, 2, 3), keepdims=True)
    var = jnp.mean((x - mean) ** 2, axis=(1, 2, 3), keepdims=True)
    return (x - mean) * jax.lax.rsqrt(var + EPS)


def ref_forward(x_ncdhw, params, cin, cout):
    """Matches ResBlock.forward; conv/residual operands rounded to bf16 like the kernel's MXU
    inputs (accumulation and all norm math in f32 in both). Conv biases kept here to show
    they are cancelled by InstanceNorm."""
    cd = jnp.bfloat16
    dn = ("NDHWC", "DHWIO", "NDHWC")
    x = jnp.transpose(x_ncdhw, (0, 2, 3, 4, 1))
    h = jax.lax.conv_general_dilated(
        x.astype(cd), params["w1"].astype(cd), (1, 1, 1), [(1, 1)] * 3,
        dimension_numbers=jax.lax.conv_dimension_numbers(x.shape, params["w1"].shape, dn),
        preferred_element_type=jnp.float32) + params["b1"]
    h = jnp.maximum(_inst_norm_ndhwc(h), 0.0)
    h2 = jax.lax.conv_general_dilated(
        h.astype(cd), params["w2"].astype(cd), (1, 1, 1), [(1, 1)] * 3,
        dimension_numbers=jax.lax.conv_dimension_numbers(h.shape, params["w2"].shape, dn),
        preferred_element_type=jnp.float32) + params["b2"]
    h2 = _inst_norm_ndhwc(h2)
    if cin != cout:
        res = jnp.einsum("ndhwi,io->ndhwo", x.astype(cd), params["wres"].astype(cd),
                         preferred_element_type=jnp.float32) + params["bres"][0]
    else:
        res = x.astype(cd).astype(jnp.float32)
    out = jnp.maximum(h2 + res, 0.0)
    return jnp.transpose(out, (0, 4, 1, 2, 3))


# ----------------------------------- main ----------------------------------- #

if __name__ == "__main__":
    key = jax.random.PRNGKey(0)

    N, D, H, W = 2, 8, 8, 8
    for cin, cout in ((8, 16), (16, 16)):   # projection residual and identity residual
        kx, kp, key = jax.random.split(key, 3)
        x = jax.random.normal(kx, (N, cin, D, H, W), jnp.float32)   # NCDHW like PyTorch
        params = init_params(kp, cin, cout)

        out = jax.block_until_ready(res_block_forward(x, params, cin, cout))
        assert out.shape == (N, cout, D, H, W), out.shape

        ref = jax.block_until_ready(ref_forward(x, params, cin, cout))
        max_err = float(jnp.max(jnp.abs(out - ref)))
        assert jnp.allclose(out, ref, atol=2e-3, rtol=2e-3), (
            f"cin={cin} cout={cout} max abs err = {max_err}")

    print("KERNEL_OK")
</pallas_src>

<mosaic_0001>
module attributes {stable_mosaic.version = 11 : i64} {
  func.func @kernel(%arg0: i32, %arg1: memref<1x110x64xbf16, #tpu.memory_space<vmem>>, %arg2: memref<3x3x64x128xbf16, #tpu.memory_space<vmem>>, %arg3: memref<3x3x128x128xbf16, #tpu.memory_space<vmem>>, %arg4: memref<64x128xbf16, #tpu.memory_space<vmem>>, %arg5: memref<1x128xf32, #tpu.memory_space<vmem>>, %arg6: memref<128x16xf32, #tpu.memory_space<vmem>>, %arg7: memref<1x80x128xf32, #tpu.memory_space<vmem>>, %arg8: memref<110x128xbf16, #tpu.memory_space<vmem>>) attributes {dimension_semantics = [#tpu.dimension_semantics<parallel>], iteration_bounds = array<i64: 2>, scalar_prefetch = 0 : i64, scratch_operands = 1 : i64, tpu.core_type = #tpu.core_type<tc>, window_params = [{transform_indices = @transform_0, window_bounds = array<i64: 1, 110, 64>}, {pipeline_mode = #tpu.pipeline_mode<synchronous>, transform_indices = @transform_1, window_bounds = array<i64: 3, 3, 64, 128>}, {pipeline_mode = #tpu.pipeline_mode<synchronous>, transform_indices = @transform_2, window_bounds = array<i64: 3, 3, 128, 128>}, {pipeline_mode = #tpu.pipeline_mode<synchronous>, transform_indices = @transform_3, window_bounds = array<i64: 64, 128>}, {pipeline_mode = #tpu.pipeline_mode<synchronous>, transform_indices = @transform_4, window_bounds = array<i64: 1, 128>}, {pipeline_mode = #tpu.pipeline_mode<synchronous>, transform_indices = @transform_5, window_bounds = array<i64: 128, 16>}, {transform_indices = @transform_6, window_bounds = array<i64: 1, 80, 128>}]} {
    %0 = tpu.iota {dimensions = array<i32: 0>} : vector<80x1xi32>
    %c10_i32 = arith.constant 10 : i32
    %c0_i32 = arith.constant 0 : i32
    %1 = arith.cmpi eq, %c10_i32, %c0_i32 : i32
    %c1_i32 = arith.constant 1 : i32
    %2 = arith.select %1, %c1_i32, %c10_i32 : i32
    %3 = vector.broadcast %2 : i32 to vector<80x1xi32>
    %4 = arith.remsi %0, %3 : vector<80x1xi32>
    %c0_i32_0 = arith.constant 0 : i32
    %5 = vector.broadcast %c0_i32_0 : i32 to vector<80x1xi32>
    %6 = arith.cmpi ne, %4, %5 : vector<80x1xi32>
    %c0_i32_1 = arith.constant 0 : i32
    %7 = vector.broadcast %c0_i32_1 : i32 to vector<80x1xi32>
    %8 = arith.cmpi slt, %4, %7 : vector<80x1xi32>
    %c0_i32_2 = arith.constant 0 : i32
    %9 = arith.cmpi slt, %2, %c0_i32_2 : i32
    %10 = vector.broadcast %9 : i1 to vector<80x1xi1>
    %11 = vector.broadcast %10 : vector<80x1xi1> to vector<80x1xi1>
    %12 = arith.xori %8, %11 : vector<80x1xi1>
    %13 = arith.andi %12, %6 : vector<80x1xi1>
    %14 = vector.broadcast %2 : i32 to vector<80x1xi32>
    %15 = arith.addi %4, %14 : vector<80x1xi32>
    %16 = arith.select %13, %15, %4 : vector<80x1xi1>, vector<80x1xi32>
    %c8_i32 = arith.constant 8 : i32
    %17 = vector.broadcast %c8_i32 : i32 to vector<80x1xi32>
    %18 = arith.cmpi slt, %16, %17 : vector<80x1xi32>
    %cst = arith.constant 0.000000e+00 : bf16
    %19 = vector.broadcast %cst : bf16 to vector<11x128xbf16>
    %c0 = arith.constant 0 : index
    %c0_3 = arith.constant 0 : index
    %20 = vector.load %arg8[%c0, %c0_3] : memref<110x128xbf16, #tpu.memory_space<vmem>>, vector<11x128xbf16>
    tpu.vector_store %arg8[%c0, %c0_3], %19 {strides = array<i32>} : memref<110x128xbf16, #tpu.memory_space<vmem>>, vector<11x128xbf16>,
    %cst_4 = arith.constant 0.000000e+00 : bf16
    %21 = vector.broadcast %cst_4 : bf16 to vector<19x128xbf16>
    %c91 = arith.constant 91 : index
    %c0_5 = arith.constant 0 : index
    %22 = vector.load %arg8[%c91, %c0_5] : memref<110x128xbf16, #tpu.memory_space<vmem>>, vector<19x128xbf16>
    tpu.vector_store %arg8[%c91, %c0_5], %21 {strides = array<i32>} : memref<110x128xbf16, #tpu.memory_space<vmem>>, vector<19x128xbf16>,
    %cst_6 = arith.constant 0.000000e+00 : f32
    %23 = vector.broadcast %cst_6 : f32 to vector<80x128xf32>
    %c0_7 = arith.constant 0 : index
    %c0_8 = arith.constant 0 : index
    %c0_9 = arith.constant 0 : index
    %24 = vector.load %arg1[%c0_7, %c0_8, %c0_9] : memref<1x110x64xbf16, #tpu.memory_space<vmem>>, vector<1x80x64xbf16>
    %25 = vector.shape_cast %24 : vector<1x80x64xbf16> to vector<80x64xbf16>
    %c0_10 = arith.constant 0 : index
    %c0_11 = arith.constant 0 : index
    %c0_12 = arith.constant 0 : index
    %c0_13 = arith.constant 0 : index
    %26 = vector.load %arg2[%c0_10, %c0_11, %c0_12, %c0_13] : memref<3x3x64x128xbf16, #tpu.memory_space<vmem>>, vector<1x1x64x128xbf16>
    %27 = vector.shape_cast %26 : vector<1x1x64x128xbf16> to vector<64x128xbf16>
    %cst_14 = arith.constant dense<0.000000e+00> : vector<80x128xf32>
    %28 = tpu.matmul %25, %27, %cst_14 {dimension_numbers = #tpu.dot_dimension_numbers<[1], [0], [0], [1], [0, 0, 1, 1], [], []>} : vector<80x64xbf16>, vector<64x128xbf16>, vector<80x128xf32> -> vector<80x128xf32>
    %29 = arith.addf %23, %28 : vector<80x128xf32>
    %c0_15 = arith.constant 0 : index
    %c1 = arith.constant 1 : index
    %c0_16 = arith.constant 0 : index
    %30 = vector.load %arg1[%c0_15, %c1, %c0_16] : memref<1x110x64xbf16, #tpu.memory_space<vmem>>, vector<1x80x64xbf16>
    %31 = vector.shape_cast %30 : vector<1x80x64xbf16> to vector<80x64xbf16>
    %c0_17 = arith.constant 0 : index
    %c1_18 = arith.constant 1 : index
    %c0_19 = arith.constant 0 : index
    %c0_20 = arith.constant 0 : index
    %32 = vector.load %arg2[%c0_17, %c1_18, %c0_19, %c0_20] : memref<3x3x64x128xbf16, #tpu.memory_space<vmem>>, vector<1x1x64x128xbf16>
    %33 = vector.shape_cast %32 : vector<1x1x64x128xbf16> to vector<64x128xbf16>
    %cst_21 = arith.constant dense<0.000000e+00> : vector<80x128xf32>
    %34 = tpu.matmul %31, %33, %cst_21 {dimension_numbers = #tpu.dot_dimension_numbers<[1], [0], [0], [1], [0, 0, 1, 1], [], []>} : vector<80x64xbf16>, vector<64x128xbf16>, vector<80x128xf32> -> vector<80x128xf32>
    %35 = arith.addf %29, %34 : vector<80x128xf32>
    %c0_22 = arith.constant 0 : index
    %c2 = arith.constant 2 : index
    %c0_23 = arith.constant 0 : index
    %36 = vector.load %arg1[%c0_22, %c2, %c0_23] : memref<1x110x64xbf16, #tpu.memory_space<vmem>>, vector<1x80x64xbf16>
    %37 = vector.shape_cast %36 : vector<1x80x64xbf16> to vector<80x64xbf16>
    %c0_24 = arith.constant 0 : index
    %c2_25 = arith.constant 2 : index
    %c0_26 = arith.constant 0 : index
    %c0_27 = arith.constant 0 : index
    %38 = vector.load %arg2[%c0_24, %c2_25, %c0_26, %c0_27] : memref<3x3x64x128xbf16, #tpu.memory_space<vmem>>, vector<1x1x64x128xbf16>
    %39 = vector.shape_cast %38 : vector<1x1x64x128xbf16> to vector<64x128xbf16>
    %cst_28 = arith.constant dense<0.000000e+00> : vector<80x128xf32>
    %40 = tpu.matmul %37, %39, %cst_28 {dimension_numbers = #tpu.dot_dimension_numbers<[1], [0], [0], [1], [0, 0, 1, 1], [], []>} : vector<80x64xbf16>, vector<64x128xbf16>, vector<80x128xf32> -> vector<80x128xf32>
    %41 = arith.addf %35, %40 : vector<80x128xf32>
    %c0_29 = arith.constant 0 : index
    %c10 = arith.constant 10 : index
    %c0_30 = arith.constant 0 : index
    %42 = vector.load %arg1[%c0_29, %c10, %c0_30] : memref<1x110x64xbf16, #tpu.memory_space<vmem>>, vector<1x80x64xbf16>
    %43 = vector.shape_cast %42 : vector<1x80x64xbf16> to vector<80x64xbf16>
    %c1_31 = arith.constant 1 : index
    %c0_32 = arith.constant 0 : index
    %c0_33 = arith.constant 0 : index
    %c0_34 = arith.constant 0 : index
    %44 = vector.load %arg2[%c1_31, %c0_32, %c0_33, %c0_34] : memref<3x3x64x128xbf16, #tpu.memory_space<vmem>>, vector<1x1x64x128xbf16>
    %45 = vector.shape_cast %44 : vector<1x1x64x128xbf16> to vector<64x128xbf16>
    %cst_35 = arith.constant dense<0.000000e+00> : vector<80x128xf32>
    %46 = tpu.matmul %43, %45, %cst_35 {dimension_numbers = #tpu.dot_dimension_numbers<[1], [0], [0], [1], [0, 0, 1, 1], [], []>} : vector<80x64xbf16>, vector<64x128xbf16>, vector<80x128xf32> -> vector<80x128xf32>
    %47 = arith.addf %41, %46 : vector<80x128xf32>
    %c0_36 = arith.constant 0 : index
    %c11 = arith.constant 11 : index
    %c0_37 = arith.constant 0 : index
    %48 = vector.load %arg1[%c0_36, %c11, %c0_37] : memref<1x110x64xbf16, #tpu.memory_space<vmem>>, vector<1x80x64xbf16>
    %49 = vector.shape_cast %48 : vector<1x80x64xbf16> to vector<80x64xbf16>
    %c1_38 = arith.constant 1 : index
    %c1_39 = arith.constant 1 : index
    %c0_40 = arith.constant 0 : index
    %c0_41 = arith.constant 0 : index
    %50 = vector.load %arg2[%c1_38, %c1_39, %c0_40, %c0_41] : memref<3x3x64x128xbf16, #tpu.memory_space<vmem>>, vector<1x1x64x128xbf16>
    %51 = vector.shape_cast %50 : vector<1x1x64x128xbf16> to vector<64x128xbf16>
    %cst_42 = arith.constant dense<0.000000e+00> : vector<80x128xf32>
    %52 = tpu.matmul %49, %51, %cst_42 {dimension_numbers = #tpu.dot_dimension_numbers<[1], [0], [0], [1], [0, 0, 1, 1], [], []>} : vector<80x64xbf16>, vector<64x128xbf16>, vector<80x128xf32> -> vector<80x128xf32>
    %53 = arith.addf %47, %52 : vector<80x128xf32>
    %c0_43 = arith.constant 0 : index
    %c12 = arith.constant 12 : index
    %c0_44 = arith.constant 0 : index
    %54 = vector.load %arg1[%c0_43, %c12, %c0_44] : memref<1x110x64xbf16, #tpu.memory_space<vmem>>, vector<1x80x64xbf16>
    %55 = vector.shape_cast %54 : vector<1x80x64xbf16> to vector<80x64xbf16>
    %c1_45 = arith.constant 1 : index
    %c2_46 = arith.constant 2 : index
    %c0_47 = arith.constant 0 : index
    %c0_48 = arith.constant 0 : index
    %56 = vector.load %arg2[%c1_45, %c2_46, %c0_47, %c0_48] : memref<3x3x64x128xbf16, #tpu.memory_space<vmem>>, vector<1x1x64x128xbf16>
    %57 = vector.shape_cast %56 : vector<1x1x64x128xbf16> to vector<64x128xbf16>
    %cst_49 = arith.constant dense<0.000000e+00> : vector<80x128xf32>
    %58 = tpu.matmul %55, %57, %cst_49 {dimension_numbers = #tpu.dot_dimension_numbers<[1], [0], [0], [1], [0, 0, 1, 1], [], []>} : vector<80x64xbf16>, vector<64x128xbf16>, vector<80x128xf32> -> vector<80x128xf32>
    %59 = arith.addf %53, %58 : vector<80x128xf32>
    %c0_50 = arith.constant 0 : index
    %c20 = arith.constant 20 : index
    %c0_51 = arith.constant 0 : index
    %60 = vector.load %arg1[%c0_50, %c20, %c0_51] : memref<1x110x64xbf16, #tpu.memory_space<vmem>>, vector<1x80x64xbf16>
    %61 = vector.shape_cast %60 : vector<1x80x64xbf16> to vector<80x64xbf16>
    %c2_52 = arith.constant 2 : index
    %c0_53 = arith.constant 0 : index
    %c0_54 = arith.constant 0 : index
    %c0_55 = arith.constant 0 : index
    %62 = vector.load %arg2[%c2_52, %c0_53, %c0_54, %c0_55] : memref<3x3x64x128xbf16, #tpu.memory_space<vmem>>, vector<1x1x64x128xbf16>
    %63 = vector.shape_cast %62 : vector<1x1x64x128xbf16> to vector<64x128xbf16>
    %cst_56 = arith.constant dense<0.000000e+00> : vector<80x128xf32>
    %64 = tpu.matmul %61, %63, %cst_56 {dimension_numbers = #tpu.dot_dimension_numbers<[1], [0], [0], [1], [0, 0, 1, 1], [], []>} : vector<80x64xbf16>, vector<64x128xbf16>, vector<80x128xf32> -> vector<80x128xf32>
    %65 = arith.addf %59, %64 : vector<80x128xf32>
    %c0_57 = arith.constant 0 : index
    %c21 = arith.constant 21 : index
    %c0_58 = arith.constant 0 : index
    %66 = vector.load %arg1[%c0_57, %c21, %c0_58] : memref<1x110x64xbf16, #tpu.memory_space<vmem>>, vector<1x80x64xbf16>
    %67 = vector.shape_cast %66 : vector<1x80x64xbf16> to vector<80x64xbf16>
    %c2_59 = arith.constant 2 : index
    %c1_60 = arith.constant 1 : index
    %c0_61 = arith.constant 0 : index
    %c0_62 = arith.constant 0 : index
    %68 = vector.load %arg2[%c2_59, %c1_60, %c0_61, %c0_62] : memref<3x3x64x128xbf16, #tpu.memory_space<vmem>>, vector<1x1x64x128xbf16>
    %69 = vector.shape_cast %68 : vector<1x1x64x128xbf16> to vector<64x128xbf16>
    %cst_63 = arith.constant dense<0.000000e+00> : vector<80x128xf32>
    %70 = tpu.matmul %67, %69, %cst_63 {dimension_numbers = #tpu.dot_dimension_numbers<[1], [0], [0], [1], [0, 0, 1, 1], [], []>} : vector<80x64xbf16>, vector<64x128xbf16>, vector<80x128xf32> -> vector<80x128xf32>
    %71 = arith.addf %65, %70 : vector<80x128xf32>
    %c0_64 = arith.constant 0 : index
    %c22 = arith.constant 22 : index
    %c0_65 = arith.constant 0 : index
    %72 = vector.load %arg1[%c0_64, %c22, %c0_65] : memref<1x110x64xbf16, #tpu.memory_space<vmem>>, vector<1x80x64xbf16>
    %73 = vector.shape_cast %72 : vector<1x80x64xbf16> to vector<80x64xbf16>
    %c2_66 = arith.constant 2 : index
    %c2_67 = arith.constant 2 : index
    %c0_68 = arith.constant 0 : index
    %c0_69 = arith.constant 0 : index
    %74 = vector.load %arg2[%c2_66, %c2_67, %c0_68, %c0_69] : memref<3x3x64x128xbf16, #tpu.memory_space<vmem>>, vector<1x1x64x128xbf16>
    %75 = vector.shape_cast %74 : vector<1x1x64x128xbf16> to vector<64x128xbf16>
    %cst_70 = arith.constant dense<0.000000e+00> : vector<80x128xf32>
    %76 = tpu.matmul %73, %75, %cst_70 {dimension_numbers = #tpu.dot_dimension_numbers<[1], [0], [0], [1], [0, 0, 1, 1], [], []>} : vector<80x64xbf16>, vector<64x128xbf16>, vector<80x128xf32> -> vector<80x128xf32>
    %77 = arith.addf %71, %76 : vector<80x128xf32>
    %cst_71 = arith.constant 0.000000e+00 : f32
    %78 = vector.shape_cast %18 : vector<80x1xi1> to vector<80x1xi1>
    %79 = vector.broadcast %78 : vector<80x1xi1> to vector<80x128xi1>
    %80 = vector.broadcast %cst_71 : f32 to vector<80x128xf32>
    %81 = arith.select %79, %77, %80 : vector<80x128xi1>, vector<80x128xf32>
    %cst_72 = arith.constant dense<0.000000e+00> : vector<128xf32>
    %82 = vector.multi_reduction <add>, %81, %cst_72 [0] : vector<80x128xf32> to vector<128xf32>
    %83 = vector.shape_cast %82 : vector<128xf32> to vector<1x128xf32>
    %84 = arith.mulf %81, %81 : vector<80x128xf32>
    %cst_73 = arith.constant dense<0.000000e+00> : vector<128xf32>
    %85 = vector.multi_reduction <add>, %84, %cst_73 [0] : vector<80x128xf32> to vector<128xf32>
    %86 = vector.shape_cast %85 : vector<128xf32> to vector<1x128xf32>
    %87 = tpu.concatenate %83, %86 in 0 : vector<1x128xf32>, vector<1x128xf32> -> vector<2x128xf32>
    %c0_74 = arith.constant 0 : index
    %c0_75 = arith.constant 0 : index
    %88 = vector.load %arg6[%c0_74, %c0_75] : memref<128x16xf32, #tpu.memory_space<vmem>>, vector<128x16xf32>
    %cst_76 = arith.constant dense<0.000000e+00> : vector<2x16xf32>
    %89 = tpu.matmul %87, %88, %cst_76 {dimension_numbers = #tpu.dot_dimension_numbers<[1], [0], [0], [1], [0, 0, 1, 1], [], []>} : vector<2x128xf32>, vector<128x16xf32>, vector<2x16xf32> -> vector<2x16xf32>
    %90 = vector.extract_strided_slice %89 {offsets = [0, 0], sizes = [1, 16], strides = [1, 1]} : vector<2x16xf32> to vector<1x16xf32>
    %cst_77 = arith.constant 5.120000e+02 : f32
    %91 = vector.broadcast %cst_77 : f32 to vector<1x16xf32>
    %92 = arith.divf %90, %91 : vector<1x16xf32>
    %93 = vector.extract_strided_slice %89 {offsets = [1, 0], sizes = [1, 16], strides = [1, 1]} : vector<2x16xf32> to vector<1x16xf32>
    %cst_78 = arith.constant 5.120000e+02 : f32
    %94 = vector.broadcast %cst_78 : f32 to vector<1x16xf32>
    %95 = arith.divf %93, %94 : vector<1x16xf32>
    %96 = arith.mulf %92, %92 : vector<1x16xf32>
    %97 = arith.subf %95, %96 : vector<1x16xf32>
    %cst_79 = arith.constant 0.000000e+00 : f32
    %98 = vector.broadcast %cst_79 : f32 to vector<1x16xf32>
    %99 = arith.maximumf %97, %98 : vector<1x16xf32>
    %cst_80 = arith.constant 9.99999974E-6 : f32
    %100 = vector.broadcast %cst_80 : f32 to vector<1x16xf32>
    %101 = arith.addf %99, %100 : vector<1x16xf32>
    %102 = math.rsqrt %101 : vector<1x16xf32>
    %103 = tpu.concatenate %102, %102, %102, %102, %102, %102, %102, %102 in 1 : vector<1x16xf32>, vector<1x16xf32>, vector<1x16xf32>, vector<1x16xf32>, vector<1x16xf32>, vector<1x16xf32>, vector<1x16xf32>, vector<1x16xf32> -> vector<1x128xf32>
    %cst_81 = arith.constant 0.000000e+00 : f32
    %104 = vector.broadcast %cst_81 : f32 to vector<1x16xf32>
    %105 = arith.subf %104, %92 : vector<1x16xf32>
    %106 = arith.mulf %105, %102 : vector<1x16xf32>
    %107 = tpu.concatenate %106, %106, %106, %106, %106, %106, %106, %106 in 1 : vector<1x16xf32>, vector<1x16xf32>, vector<1x16xf32>, vector<1x16xf32>, vector<1x16xf32>, vector<1x16xf32>, vector<1x16xf32>, vector<1x16xf32> -> vector<1x128xf32>
    %108 = vector.broadcast %103 : vector<1x128xf32> to vector<80x128xf32>
    %109 = arith.mulf %77, %108 : vector<80x128xf32>
    %110 = vector.broadcast %107 : vector<1x128xf32> to vector<80x128xf32>
    %111 = arith.addf %109, %110 : vector<80x128xf32>
    %cst_82 = arith.constant 0.000000e+00 : f32
    %112 = vector.broadcast %cst_82 : f32 to vector<80x128xf32>
    %113 = arith.maximumf %111, %112 : vector<80x128xf32>
    %cst_83 = arith.constant 0.000000e+00 : f32
    %114 = vector.shape_cast %18 : vector<80x1xi1> to vector<80x1xi1>
    %115 = vector.broadcast %114 : vector<80x1xi1> to vector<80x128xi1>
    %116 = vector.broadcast %cst_83 : f32 to vector<80x128xf32>
    %117 = arith.select %115, %113, %116 : vector<80x128xi1>, vector<80x128xf32>
    %118 = arith.truncf %117 : vector<80x128xf32> to vector<80x128xbf16>
    %c11_84 = arith.constant 11 : index
    %c0_85 = arith.constant 0 : index
    %119 = vector.load %arg8[%c11_84, %c0_85] : memref<110x128xbf16, #tpu.memory_space<vmem>>, vector<80x128xbf16>
    tpu.vector_store %arg8[%c11_84, %c0_85], %118 {strides = array<i32>} : memref<110x128xbf16, #tpu.memory_space<vmem>>, vector<80x128xbf16>,
    %cst_86 = arith.constant 0.000000e+00 : f32
    %120 = vector.broadcast %cst_86 : f32 to vector<80x128xf32>
    %c0_87 = arith.constant 0 : index
    %c0_88 = arith.constant 0 : index
    %121 = vector.load %arg8[%c0_87, %c0_88] : memref<110x128xbf16, #tpu.memory_space<vmem>>, vector<80x128xbf16>
    %c0_89 = arith.constant 0 : index
    %c0_90 = arith.constant 0 : index
    %c0_91 = arith.constant 0 : index
    %c0_92 = arith.constant 0 : index
    %122 = vector.load %arg3[%c0_89, %c0_90, %c0_91, %c0_92] : memref<3x3x128x128xbf16, #tpu.memory_space<vmem>>, vector<1x1x128x128xbf16>
    %123 = vector.shape_cast %122 : vector<1x1x128x128xbf16> to vector<128x128xbf16>
    %cst_93 = arith.constant dense<0.000000e+00> : vector<80x128xf32>
    %124 = tpu.matmul %121, %123, %cst_93 {dimension_numbers = #tpu.dot_dimension_numbers<[1], [0], [0], [1], [0, 0, 1, 1], [], []>} : vector<80x128xbf16>, vector<128x128xbf16>, vector<80x128xf32> -> vector<80x128xf32>
    %125 = arith.addf %120, %124 : vector<80x128xf32>
    %c1_94 = arith.constant 1 : index
    %c0_95 = arith.constant 0 : index
    %126 = vector.load %arg8[%c1_94, %c0_95] : memref<110x128xbf16, #tpu.memory_space<vmem>>, vector<80x128xbf16>
    %c0_96 = arith.constant 0 : index
    %c1_97 = arith.constant 1 : index
    %c0_98 = arith.constant 0 : index
    %c0_99 = arith.constant 0 : index
    %127 = vector.load %arg3[%c0_96, %c1_97, %c0_98, %c0_99] : memref<3x3x128x128xbf16, #tpu.memory_space<vmem>>, vector<1x1x128x128xbf16>
    %128 = vector.shape_cast %127 : vector<1x1x128x128xbf16> to vector<128x128xbf16>
    %cst_100 = arith.constant dense<0.000000e+00> : vector<80x128xf32>
    %129 = tpu.matmul %126, %128, %cst_100 {dimension_numbers = #tpu.dot_dimension_numbers<[1], [0], [0], [1], [0, 0, 1, 1], [], []>} : vector<80x128xbf16>, vector<128x128xbf16>, vector<80x128xf32> -> vector<80x128xf32>
    %130 = arith.addf %125, %129 : vector<80x128xf32>
    %c2_101 = arith.constant 2 : index
    %c0_102 = arith.constant 0 : index
    %131 = vector.load %arg8[%c2_101, %c0_102] : memref<110x128xbf16, #tpu.memory_space<vmem>>, vector<80x128xbf16>
    %c0_103 = arith.constant 0 : index
    %c2_104 = arith.constant 2 : index
    %c0_105 = arith.constant 0 : index
    %c0_106 = arith.constant 0 : index
    %132 = vector.load %arg3[%c0_103, %c2_104, %c0_105, %c0_106] : memref<3x3x128x128xbf16, #tpu.memory_space<vmem>>, vector<1x1x128x128xbf16>
    %133 = vector.shape_cast %132 : vector<1x1x128x128xbf16> to vector<128x128xbf16>
    %cst_107 = arith.constant dense<0.000000e+00> : vector<80x128xf32>
    %134 = tpu.matmul %131, %133, %cst_107 {dimension_numbers = #tpu.dot_dimension_numbers<[1], [0], [0], [1], [0, 0, 1, 1], [], []>} : vector<80x128xbf16>, vector<128x128xbf16>, vector<80x128xf32> -> vector<80x128xf32>
    %135 = arith.addf %130, %134 : vector<80x128xf32>
    %c10_108 = arith.constant 10 : index
    %c0_109 = arith.constant 0 : index
    %136 = vector.load %arg8[%c10_108, %c0_109] : memref<110x128xbf16, #tpu.memory_space<vmem>>, vector<80x128xbf16>
    %c1_110 = arith.constant 1 : index
    %c0_111 = arith.constant 0 : index
    %c0_112 = arith.constant 0 : index
    %c0_113 = arith.constant 0 : index
    %137 = vector.load %arg3[%c1_110, %c0_111, %c0_112, %c0_113] : memref<3x3x128x128xbf16, #tpu.memory_space<vmem>>, vector<1x1x128x128xbf16>
    %138 = vector.shape_cast %137 : vector<1x1x128x128xbf16> to vector<128x128xbf16>
    %cst_114 = arith.constant dense<0.000000e+00> : vector<80x128xf32>
    %139 = tpu.matmul %136, %138, %cst_114 {dimension_numbers = #tpu.dot_dimension_numbers<[1], [0], [0], [1], [0, 0, 1, 1], [], []>} : vector<80x128xbf16>, vector<128x128xbf16>, vector<80x128xf32> -> vector<80x128xf32>
    %140 = arith.addf %135, %139 : vector<80x128xf32>
    %c11_115 = arith.constant 11 : index
    %c0_116 = arith.constant 0 : index
    %141 = vector.load %arg8[%c11_115, %c0_116] : memref<110x128xbf16, #tpu.memory_space<vmem>>, vector<80x128xbf16>
    %c1_117 = arith.constant 1 : index
    %c1_118 = arith.constant 1 : index
    %c0_119 = arith.constant 0 : index
    %c0_120 = arith.constant 0 : index
    %142 = vector.load %arg3[%c1_117, %c1_118, %c0_119, %c0_120] : memref<3x3x128x128xbf16, #tpu.memory_space<vmem>>, vector<1x1x128x128xbf16>
    %143 = vector.shape_cast %142 : vector<1x1x128x128xbf16> to vector<128x128xbf16>
    %cst_121 = arith.constant dense<0.000000e+00> : vector<80x128xf32>
    %144 = tpu.matmul %141, %143, %cst_121 {dimension_numbers = #tpu.dot_dimension_numbers<[1], [0], [0], [1], [0, 0, 1, 1], [], []>} : vector<80x128xbf16>, vector<128x128xbf16>, vector<80x128xf32> -> vector<80x128xf32>
    %145 = arith.addf %140, %144 : vector<80x128xf32>
    %c12_122 = arith.constant 12 : index
    %c0_123 = arith.constant 0 : index
    %146 = vector.load %arg8[%c12_122, %c0_123] : memref<110x128xbf16, #tpu.memory_space<vmem>>, vector<80x128xbf16>
    %c1_124 = arith.constant 1 : index
    %c2_125 = arith.constant 2 : index
    %c0_126 = arith.constant 0 : index
    %c0_127 = arith.constant 0 : index
    %147 = vector.load %arg3[%c1_124, %c2_125, %c0_126, %c0_127] : memref<3x3x128x128xbf16, #tpu.memory_space<vmem>>, vector<1x1x128x128xbf16>
    %148 = vector.shape_cast %147 : vector<1x1x128x128xbf16> to vector<128x128xbf16>
    %cst_128 = arith.constant dense<0.000000e+00> : vector<80x128xf32>
    %149 = tpu.matmul %146, %148, %cst_128 {dimension_numbers = #tpu.dot_dimension_numbers<[1], [0], [0], [1], [0, 0, 1, 1], [], []>} : vector<80x128xbf16>, vector<128x128xbf16>, vector<80x128xf32> -> vector<80x128xf32>
    %150 = arith.addf %145, %149 : vector<80x128xf32>
    %c20_129 = arith.constant 20 : index
    %c0_130 = arith.constant 0 : index
    %151 = vector.load %arg8[%c20_129, %c0_130] : memref<110x128xbf16, #tpu.memory_space<vmem>>, vector<80x128xbf16>
    %c2_131 = arith.constant 2 : index
    %c0_132 = arith.constant 0 : index
    %c0_133 = arith.constant 0 : index
    %c0_134 = arith.constant 0 : index
    %152 = vector.load %arg3[%c2_131, %c0_132, %c0_133, %c0_134] : memref<3x3x128x128xbf16, #tpu.memory_space<vmem>>, vector<1x1x128x128xbf16>
    %153 = vector.shape_cast %152 : vector<1x1x128x128xbf16> to vector<128x128xbf16>
    %cst_135 = arith.constant dense<0.000000e+00> : vector<80x128xf32>
    %154 = tpu.matmul %151, %153, %cst_135 {dimension_numbers = #tpu.dot_dimension_numbers<[1], [0], [0], [1], [0, 0, 1, 1], [], []>} : vector<80x128xbf16>, vector<128x128xbf16>, vector<80x128xf32> -> vector<80x128xf32>
    %155 = arith.addf %150, %154 : vector<80x128xf32>
    %c21_136 = arith.constant 21 : index
    %c0_137 = arith.constant 0 : index
    %156 = vector.load %arg8[%c21_136, %c0_137] : memref<110x128xbf16, #tpu.memory_space<vmem>>, vector<80x128xbf16>
    %c2_138 = arith.constant 2 : index
    %c1_139 = arith.constant 1 : index
    %c0_140 = arith.constant 0 : index
    %c0_141 = arith.constant 0 : index
    %157 = vector.load %arg3[%c2_138, %c1_139, %c0_140, %c0_141] : memref<3x3x128x128xbf16, #tpu.memory_space<vmem>>, vector<1x1x128x128xbf16>
    %158 = vector.shape_cast %157 : vector<1x1x128x128xbf16> to vector<128x128xbf16>
    %cst_142 = arith.constant dense<0.000000e+00> : vector<80x128xf32>
    %159 = tpu.matmul %156, %158, %cst_142 {dimension_numbers = #tpu.dot_dimension_numbers<[1], [0], [0], [1], [0, 0, 1, 1], [], []>} : vector<80x128xbf16>, vector<128x128xbf16>, vector<80x128xf32> -> vector<80x128xf32>
    %160 = arith.addf %155, %159 : vector<80x128xf32>
    %c22_143 = arith.constant 22 : index
    %c0_144 = arith.constant 0 : index
    %161 = vector.load %arg8[%c22_143, %c0_144] : memref<110x128xbf16, #tpu.memory_space<vmem>>, vector<80x128xbf16>
    %c2_145 = arith.constant 2 : index
    %c2_146 = arith.constant 2 : index
    %c0_147 = arith.constant 0 : index
    %c0_148 = arith.constant 0 : index
    %162 = vector.load %arg3[%c2_145, %c2_146, %c0_147, %c0_148] : memref<3x3x128x128xbf16, #tpu.memory_space<vmem>>, vector<1x1x128x128xbf16>
    %163 = vector.shape_cast %162 : vector<1x1x128x128xbf16> to vector<128x128xbf16>
    %cst_149 = arith.constant dense<0.000000e+00> : vector<80x128xf32>
    %164 = tpu.matmul %161, %163, %cst_149 {dimension_numbers = #tpu.dot_dimension_numbers<[1], [0], [0], [1], [0, 0, 1, 1], [], []>} : vector<80x128xbf16>, vector<128x128xbf16>, vector<80x128xf32> -> vector<80x128xf32>
    %165 = arith.addf %160, %164 : vector<80x128xf32>
    %cst_150 = arith.constant 0.000000e+00 : f32
    %166 = vector.shape_cast %18 : vector<80x1xi1> to vector<80x1xi1>
    %167 = vector.broadcast %166 : vector<80x1xi1> to vector<80x128xi1>
    %168 = vector.broadcast %cst_150 : f32 to vector<80x128xf32>
    %169 = arith.select %167, %165, %168 : vector<80x128xi1>, vector<80x128xf32>
    %cst_151 = arith.constant dense<0.000000e+00> : vector<128xf32>
    %170 = vector.multi_reduction <add>, %169, %cst_151 [0] : vector<80x128xf32> to vector<128xf32>
    %171 = vector.shape_cast %170 : vector<128xf32> to vector<1x128xf32>
    %172 = arith.mulf %169, %169 : vector<80x128xf32>
    %cst_152 = arith.constant dense<0.000000e+00> : vector<128xf32>
    %173 = vector.multi_reduction <add>, %172, %cst_152 [0] : vector<80x128xf32> to vector<128xf32>
    %174 = vector.shape_cast %173 : vector<128xf32> to vector<1x128xf32>
    %175 = tpu.concatenate %171, %174 in 0 : vector<1x128xf32>, vector<1x128xf32> -> vector<2x128xf32>
    %c0_153 = arith.constant 0 : index
    %c0_154 = arith.constant 0 : index
    %176 = vector.load %arg6[%c0_153, %c0_154] : memref<128x16xf32, #tpu.memory_space<vmem>>, vector<128x16xf32>
    %cst_155 = arith.constant dense<0.000000e+00> : vector<2x16xf32>
    %177 = tpu.matmul %175, %176, %cst_155 {dimension_numbers = #tpu.dot_dimension_numbers<[1], [0], [0], [1], [0, 0, 1, 1], [], []>} : vector<2x128xf32>, vector<128x16xf32>, vector<2x16xf32> -> vector<2x16xf32>
    %178 = vector.extract_strided_slice %177 {offsets = [0, 0], sizes = [1, 16], strides = [1, 1]} : vector<2x16xf32> to vector<1x16xf32>
    %cst_156 = arith.constant 5.120000e+02 : f32
    %179 = vector.broadcast %cst_156 : f32 to vector<1x16xf32>
    %180 = arith.divf %178, %179 : vector<1x16xf32>
    %181 = vector.extract_strided_slice %177 {offsets = [1, 0], sizes = [1, 16], strides = [1, 1]} : vector<2x16xf32> to vector<1x16xf32>
    %cst_157 = arith.constant 5.120000e+02 : f32
    %182 = vector.broadcast %cst_157 : f32 to vector<1x16xf32>
    %183 = arith.divf %181, %182 : vector<1x16xf32>
    %184 = arith.mulf %180, %180 : vector<1x16xf32>
    %185 = arith.subf %183, %184 : vector<1x16xf32>
    %cst_158 = arith.constant 0.000000e+00 : f32
    %186 = vector.broadcast %cst_158 : f32 to vector<1x16xf32>
    %187 = arith.maximumf %185, %186 : vector<1x16xf32>
    %cst_159 = arith.constant 9.99999974E-6 : f32
    %188 = vector.broadcast %cst_159 : f32 to vector<1x16xf32>
    %189 = arith.addf %187, %188 : vector<1x16xf32>
    %190 = math.rsqrt %189 : vector<1x16xf32>
    %191 = tpu.concatenate %190, %190, %190, %190, %190, %190, %190, %190 in 1 : vector<1x16xf32>, vector<1x16xf32>, vector<1x16xf32>, vector<1x16xf32>, vector<1x16xf32>, vector<1x16xf32>, vector<1x16xf32>, vector<1x16xf32> -> vector<1x128xf32>
    %cst_160 = arith.constant 0.000000e+00 : f32
    %192 = vector.broadcast %cst_160 : f32 to vector<1x16xf32>
    %193 = arith.subf %192, %180 : vector<1x16xf32>
    %194 = arith.mulf %193, %190 : vector<1x16xf32>
    %195 = tpu.concatenate %194, %194, %194, %194, %194, %194, %194, %194 in 1 : vector<1x16xf32>, vector<1x16xf32>, vector<1x16xf32>, vector<1x16xf32>, vector<1x16xf32>, vector<1x16xf32>, vector<1x16xf32>, vector<1x16xf32> -> vector<1x128xf32>
    %c0_161 = arith.constant 0 : index
    %c11_162 = arith.constant 11 : index
    %c0_163 = arith.constant 0 : index
    %196 = vector.load %arg1[%c0_161, %c11_162, %c0_163] : memref<1x110x64xbf16, #tpu.memory_space<vmem>>, vector<1x80x64xbf16>
    %197 = vector.shape_cast %196 : vector<1x80x64xbf16> to vector<80x64xbf16>
    %c0_164 = arith.constant 0 : index
    %c0_165 = arith.constant 0 : index
    %198 = vector.load %arg4[%c0_164, %c0_165] : memref<64x128xbf16, #tpu.memory_space<vmem>>, vector<64x128xbf16>
    %cst_166 = arith.constant dense<0.000000e+00> : vector<80x128xf32>
    %199 = tpu.matmul %197, %198, %cst_166 {dimension_numbers = #tpu.dot_dimension_numbers<[1], [0], [0], [1], [0, 0, 1, 1], [], []>} : vector<80x64xbf16>, vector<64x128xbf16>, vector<80x128xf32> -> vector<80x128xf32>
    %c0_167 = arith.constant 0 : index
    %c0_168 = arith.constant 0 : index
    %200 = vector.load %arg5[%c0_167, %c0_168] : memref<1x128xf32, #tpu.memory_space<vmem>>, vector<1x128xf32>
    %201 = vector.broadcast %200 : vector<1x128xf32> to vector<80x128xf32>
    %202 = arith.addf %199, %201 : vector<80x128xf32>
    %203 = vector.broadcast %191 : vector<1x128xf32> to vector<80x128xf32>
    %204 = arith.mulf %165, %203 : vector<80x128xf32>
    %205 = vector.broadcast %195 : vector<1x128xf32> to vector<80x128xf32>
    %206 = arith.addf %204, %205 : vector<80x128xf32>
    %207 = arith.addf %206, %202 : vector<80x128xf32>
    %cst_169 = arith.constant 0.000000e+00 : f32
    %208 = vector.broadcast %cst_169 : f32 to vector<80x128xf32>
    %209 = arith.maximumf %207, %208 : vector<80x128xf32>
    %c0_170 = arith.constant 0 : index
    %c0_171 = arith.constant 0 : index
    %c0_172 = arith.constant 0 : index
    %210 = vector.load %arg7[%c0_170, %c0_171, %c0_172] : memref<1x80x128xf32, #tpu.memory_space<vmem>>, vector<1x80x128xf32>
    %211 = vector.shape_cast %210 : vector<1x80x128xf32> to vector<80x128xf32>
    %212 = vector.shape_cast %209 : vector<80x128xf32> to vector<1x80x128xf32>
    tpu.vector_store %arg7[%c0_170, %c0_171, %c0_172], %212 {strides = array<i32>} : memref<1x80x128xf32, #tpu.memory_space<vmem>>, vector<1x80x128xf32>,
    return
  }
  func.func @transform_0(%arg0: i32) -> (i32, i32, i32) {
    %c0_i32 = arith.constant 0 : i32
    %c0_i32_0 = arith.constant 0 : i32
    %c0_i32_1 = arith.constant 0 : i32
    return %arg0, %c0_i32, %c0_i32_0 : i32, i32, i32
  }
  func.func @transform_1(%arg0: i32) -> (i32, i32, i32, i32) {
    %c0_i32 = arith.constant 0 : i32
    %c0_i32_0 = arith.constant 0 : i32
    %c0_i32_1 = arith.constant 0 : i32
    %c0_i32_2 = arith.constant 0 : i32
    %c0_i32_3 = arith.constant 0 : i32
    return %c0_i32, %c0_i32_0, %c0_i32_1, %c0_i32_2 : i32, i32, i32, i32
  }
  func.func @transform_2(%arg0: i32) -> (i32, i32, i32, i32) {
    %c0_i32 = arith.constant 0 : i32
    %c0_i32_0 = arith.constant 0 : i32
    %c0_i32_1 = arith.constant 0 : i32
    %c0_i32_2 = arith.constant 0 : i32
    %c0_i32_3 = arith.constant 0 : i32
    return %c0_i32, %c0_i32_0, %c0_i32_1, %c0_i32_2 : i32, i32, i32, i32
  }
  func.func @transform_3(%arg0: i32) -> (i32, i32) {
    %c0_i32 = arith.constant 0 : i32
    %c0_i32_0 = arith.constant 0 : i32
    %c0_i32_1 = arith.constant 0 : i32
    return %c0_i32, %c0_i32_0 : i32, i32
  }
  func.func @transform_4(%arg0: i32) -> (i32, i32) {
    %c0_i32 = arith.constant 0 : i32
    %c0_i32_0 = arith.constant 0 : i32
    %c0_i32_1 = arith.constant 0 : i32
    return %c0_i32, %c0_i32_0 : i32, i32
  }
  func.func @transform_5(%arg0: i32) -> (i32, i32) {
    %c0_i32 = arith.constant 0 : i32
    %c0_i32_0 = arith.constant 0 : i32
    %c0_i32_1 = arith.constant 0 : i32
    return %c0_i32, %c0_i32_0 : i32, i32
  }
  func.func @transform_6(%arg0: i32) -> (i32, i32, i32) {
    %c0_i32 = arith.constant 0 : i32
    %c0_i32_0 = arith.constant 0 : i32
    %c0_i32_1 = arith.constant 0 : i32
    return %arg0, %c0_i32, %c0_i32_0 : i32, i32, i32
  }
}

</mosaic_0001>

<bundles_post_ra>
// kernel: tpu_custom_call.1
= control target key start
LH: loop header
LB: loop body
LE: loop exit
PB: predicated region body
PF: predicated region fallthrough
CT: control target
= control target key end

     0   :  { %11 = vsyncpa [#allocation4], 0  ;;  %s8216_s0 = inlined_call_operand.vmem [shape: bf16[2,110,64], index: 0, kind: input, shape index: {}]   ;;  %s8217_s1 = inlined_call_operand.vmem [shape: bf16[3,3,64,128], index: 1, kind: input, shape index: {}]   ;;  %s8218_s2 = inlined_call_operand.hbm [shape: bf16[3,3,128,128], index: 2, kind: input, shape index: {}]   ;;  %s8219_s3 = inlined_call_operand.vmem [shape: bf16[64,128], index: 3, kind: input, shape index: {}]   ;;  %s8220_s4 = inlined_call_operand.vmem [shape: f32[1,128], index: 4, kind: input, shape index: {}]   ;;  %s8221_s5 = inlined_call_operand.vmem [shape: f32[128,16], index: 5, kind: input, shape index: {}]   ;;  %s8222_s6 = inlined_call_operand.hbm [shape: f32[2,80,128], index: 6, kind: output, shape index: {}]  }
   0x1   :  { %12 = vsyncpa [#allocation5], 0 }
   0x2   :  { %14 = vsyncpa [#allocation5 + $0x1], 0  ;;  %s6672_s21 = smov 0   ;;  %s6674_s22 = smov 0  }
   0x3   :  { %s6676_s23 = smov 0   ;;  %s6678_s24 = smov 0  }
   0x4 LB: > { %s6693_s25 = sadd.s32 4294967295, %s6618_s24   ;;  %s4676_s26 = sadd.s32 4294967294, %s6618_s24   ;;  %s6618_s24 = sphi %s6678_s24, %s8382_s24   ;;  %s6614_s23 = sphi %s6676_s23, %s8381_s23   ;;  %s6610_s22 = sphi %s6674_s22, %s8380_s22   ;;  %s6606_s21 = sphi %s6672_s21, %s8379_s21  }
   0x5   : > { %s6697_s27 = sadd.s32 1, %s6618_s24   ;;  %s158_s28 = sadd.s32 1, %s6614_s23 }
   0x6   : > { %s155_s29 = ssub.s32 %s6618_s24, %s6697_s27  ;;  %p168_p0 = scmp.ne.s32.totalorder %s6614_s23, %s6610_s22 }
   0x7   : > { %p156_p1 = scmp.eq.s32.totalorder %s155_s29, 0  ;;  %p169_p2 = scmp.eq.s32.totalorder %s6693_s25, 1 }
   0x8   : > { %p174_p3 = scmp.ne.s32.totalorder %s6610_s22, %s6606_s21  ;;  %p175_p4 = scmp.eq.s32.totalorder %s4676_s26, 1 }
   0x9   : > { %s6708_s30 = scalar_select %p156_p1, %s6614_s23, %s158_s28  }
   0xa   : > { %p6710_p5 = por %p169_p2, %p168_p0  ;;  %p6714_p6 = por %p175_p4, %p174_p3 }
   0xb   : > { %p4677_p7 = scmp.ge.s32.totalorder %s6618_s24, 1  ;;  %p182_p8 = scmp.lt.s32.totalorder %s6618_s24, 3 }
   0xc   : > { %s8253_s7 = scalar_select %p6710_p5, 1, 0 }
   0xd   : > { %s8254_s8 = scalar_select %p6714_p6, 1, 0 }
   0xe   : > { %p8223_p9 = scmp.eq.s32.totalorder %s6693_s25, 0  ;;  %p6721_p10 = pnand %p4677_p7, %p182_p8 }
   0xf   : > { %s6620_s10 = smov [#allocation3]   ;;  %s6524_s15 = scalar_lea.hbm %s8218_s2, 9216 }
  0x10   : > { %s8255_s9 = scalar_select %p6721_p10, 1, 0 }
  0x11   : > { %s197_s11 = sshll.u32 %s6620_s10, 4  ;;  %p6297_p11 = pneg %p6721_p10  ;;  %s198_s11 = int_to_ptr.vmem [resolvable:$true] %s197_s11 }
  0x12   : > { %p6525_p13 = scmp.ne.s32.totalorder %s8218_s2, %s6524_s15  ;;  %p6531_p3 = scmp.lt.u32.totalorder %s6524_s15, %s8218_s2 }
  0x13   : > { %p6729_p12 = pnand %p8223_p9, %p6297_p11 }
  0x15   : > { %p6526_p0 = pneg %p6729_p12 }
  0x17   : > { %p6527_p1 = pnand %p6526_p0, %p6525_p13 }
  0x19   : > { %p6528_p2 = pneg %p6527_p1 }
  0x1b   : > { %p6533_p4 = pnand %p6531_p3, %p6528_p2 }
  0x1d   : > { %6536 = shalt.err (!%p6533_p4)
}
  0x1e   : > { %s6537_s20 = scalar_lea.vmem %s198_s11, 9216  ;;  %p6545_p9 = scmp.lt.s32.totalorder %s198_s11, %s198_s11 }
  0x1f   : > { %p6538_p7 = scmp.ne.s32.totalorder %s198_s11, %s6537_s20  ;;  %p6546_p6 = scmp.lt.s32.totalorder %s6537_s20, %s6537_s20 }
  0x21   : > { %p6540_p8 = pnand %p6538_p7, %p6526_p0  ;;  %p6547_p5 = por %p6546_p6, %p6545_p9 }
  0x23   : > { %p6541_p11 = pneg %p6540_p8 }
  0x25   : > { %p6548_p10 = pnand %p6547_p5, %p6541_p11 }
  0x27   : > { %6551 = shalt.err (!%p6548_p10)
}
  0x28   : > { %s6621_s26 = smov 64   ;;  %s6622_s28 = smov 4  }
  0x29   : > { %6300 = dma.hbm_to_vmem [thread:$0]  (!%p6729_p12), %s8218_s2, 9216, %s198_s11, [#allocation4], %s6621_s26, %s6621_s26, %s6622_s28  }
  0x2a   : > { %p8257_p13 = scmp.ne.s32.totalorder %s8255_s9, 0 }
  0x2b   : > { %p8258_p1 = scmp.eq.s32.totalorder (!%p8257_p13), %s6693_s25, 0 }
  0x2c   : > { %230 = sbr.rel (%p8257_p13) target bundleno = 2053 (0x805), region = 44 }
  0x33   : > { %6597 = dma.done.wait (%p8258_p1), [#allocation4], 9216   ;;  %p8259_p0 = pmov %p8258_p1 }
  0x34   : > { %p260_p5 = scmp.lt.s32.totalorder %s6693_s25, 1  ;;  %v6623_v0 = vmov 0.0   ;;  %vm8233_vm0 = vmmov 0   ;;  %v6356_v1 = vld [vmem:[%s8217_s1 + $0x20] sm:$0xff]   ;;  %v6357_v2 = vld [vmem:[%s8217_s1 + $0x28] sm:$0xff]   ;;  %v6358_v7 = vld [vmem:[%s8217_s1 + $0x30] sm:$0xff]  }
  0x35   : > { %6599 = vsyncadd (%p8259_p0), [#allocation4], 4294958080  ;;  %5226 = vmatprep.subr.bf16.mxu0 %v6623_v0  ;;  %5234 = vmatprep.mubr.msk.bf16.mxu0 %vm8233_vm0, %v6623_v0  ;;  %v6359_v11 = vld [vmem:[%s8217_s1 + $0x38] sm:$0xff]   ;;  %vm8230_vm1 = vsmask.f32 7424  ;;  %vm8236_vm2 = vcmask 523264  }
  0x36   : > { %s261_s11 = scalar_select %p260_p5, %s6693_s25, 1  ;;  %5510 = vmatprep.mubr.msk.f32.mxu1 %vm8233_vm0, %v6623_v0  ;;  %5227 = vmatpush3.bf16.msra.mxu0 %v6356_v1  ;;  %v6362_v17 = vld [vmem:[%s8217_s1] sm:$0xff]   ;;  %v6364_v20 = vld [vmem:[%s8217_s1 + $0x8] sm:$0xff]   ;;  %vm8231_vm3 = vcmask 1046528   ;;  %v6366_v32 = vld [vmem:[%s8217_s1 + $0x10] sm:$0xff]   ;;  %vm8229_vm4 = vcmask 1045504  }
  0x37   : > { %5228 = vmatprep.subr.bf16.mxu0 %v6623_v0  ;;  %v6368_v38 = vld [vmem:[%s8217_s1 + $0x18] sm:$0xff]   ;;  %v6370_v51 = vld [vmem:[%s8217_s1 + $0x40] sm:$0xff]   ;;  %v6371_v52 = vld [vmem:[%s8217_s1 + $0x48] sm:$0xff]   ;;  %vm8227_vm5 = vsmask.f32 6400  ;;  %vm8228_vm7 = vcmask 1044480  }
  0x38   : > { %s6269_s9 = smul.u32 56, %s261_s11  ;;  %v6372_v53 = vld [vmem:[%s8217_s1 + $0x50] sm:$0xff]   ;;  %v6373_v54 = vld [vmem:[%s8217_s1 + $0x58] sm:$0xff]   ;;  %v6375_v1 = vld [vmem:[%s8217_s1 + $0x60] sm:$0xff]   ;;  %vm8226_vm6 = vsmask.f32 5376 }
  0x39   : > { %s6626_s26 = smov 48   ;;  %s6627_s28 = smov 16  }
  0x3a   : > { %s6768_s16 = scalar_lea.vmem %s8216_s0, %s6269_s9  ;;  %5229 = vmatpush3.bf16.msra.mxu0 %v6357_v2  ;;  %s6628_s29 = smov 32  }
  0x3b   : > { %v462_v3 = vld [vmem:[%s6768_s16] sm:$0xf]  ;;  %v463_v4 = vld [vmem:[%s6768_s16 + $0x4] sm:$0xf]  ;;  %v6779_v6 = vld [vmem:[%s6768_s16 + $0x8] sm:$0xff]   ;;  %5230 = vmatprep.subr.bf16.mxu0 %v6623_v0  ;;  %s6629_s10 = smov 64  }
  0x3c   : > { %v6776_v5 = vcombine.low %v462_v3, %v463_v4  ;;  %v527_v10 = vshll.u32 %v6779_v6, 16  ;;  %v6792_v14 = vld [vmem:[%s6768_s16 + $0x10] sm:$0xff]   ;;  %v531_v18 = vshrl.u32 %v6779_v6, 16  ;;  %v6809_v23 = vld [vmem:[%s6768_s16 + $0x18] sm:$0xff]   ;;  %v783_v24 = vld [vmem:[%s6768_s16] sm:$0xe] }
  0x3d   : > { %v535_v19 = vshll.u32 %v6792_v14, 16  ;;  %v4723_v25 = vcombine.low %v783_v24, %v463_v4  ;;  %v798_v26 = vrot.slane %v6779_v6, 1  ;;  %v800_v27 = vrot.slane %v6792_v14, 1  ;;  %v6832_v35 = vld [vmem:[%s6768_s16 + $0x20] sm:$0xff]   ;;  %v6889_v55 = vld [vmem:[%s6768_s16 + $0xc] sm:$0xff]   ;;  %v6899_v61 = vld [vmem:[%s6768_s16 + $0x14] sm:$0xff]  }
  0x3e   : > { %v520_v8 = vshrl.u32 %v6776_v5, 16  ;;  %v522_v9 = vshll.u32 %v6776_v5, 16  ;;  %5231 = vmatpush3.bf16.msra.mxu0 %v6358_v7  ;;  %v529_v13 = vrot.slane %v527_v10, 1  ;;  %v539_v28 = vshrl.u32 %v6792_v14, 16  ;;  %v931_v56 = vld [vmem:[%s6768_s16 + $0x8] sm:$0xf] }
  0x3f   : > { %5232 = vmatprep.subr.bf16.mxu0 %v6623_v0  ;;  %v537_v22 = vrot.slane %v535_v19, 1  ;;  %v797_v29 = vrot.slane %v4723_v25, 1  ;;  %v543_v31 = vshll.u32 %v6809_v23, 16  ;;  %v6824_v33 = vsel %vm8231_vm3, %v798_v26, %v800_v27  ;;  %v6844_v42 = vld [vmem:[%s6768_s16 + $0x28] ss:$0 sps:$4 sm:$0x11]  }
  0x40   : > { %v524_v12 = vrot.slane %v522_v9, 1  ;;  %v533_v21 = vor.u32 %v531_v18, %v529_v13  ;;  %v547_v40 = vshrl.u32 %v6809_v23, 16  ;;  %v551_v41 = vshll.u32 %v6832_v35, 16  ;;  %v1300_v57 = vld [vmem:[%s6768_s16 + $0x4] sm:$0xc]  ;;  %v6376_v3 = vld [vmem:[%s8217_s1 + $0x68] sm:$0xff]  }
  0x41   : > { %v6828_v34 = vsel %vm8231_vm3, %v797_v29, %v798_v26  ;;  %v541_v36 = vor.u32 %v539_v28, %v537_v22  ;;  %v545_v37 = vrot.slane %v543_v31, 1  ;;  %v555_v45 = vshrl.u32 %v6832_v35, 16  ;;  %v6377_v4 = vld [vmem:[%s8217_s1 + $0x70] sm:$0xff]   ;;  %v6383_v19 = vld [vmem:[%s8217_s1 + $0x88] sm:$0xff]   ;;  %v6387_v24 = vld [vmem:[%s8217_s1 + $0x98] sm:$0xff]   ;;  %s8251_s11 = smov 80  }
  0x42   : > { %v525_v15 = vor.u32 %v524_v12, %v520_v8  ;;  %5233 = vmatpush3.bf16.msra.mxu0 %v6359_v11  ;;  %v538_v30 = vsel %vm8230_vm1, %v533_v21, %v537_v22  ;;  %v553_v44 = vrot.slane %v551_v41, 1  ;;  %v559_v46 = vshll.u32 %v6844_v42, 16  ;;  %v930_v11 = vld [vmem:[%s6768_s16 + $0x4] sm:$0xe]  ;;  %v6971_v21 = vld [vmem:[%s6768_s16 + $0x1c] sm:$0xff]   ;;  %v6385_v22 = vld [vmem:[%s8217_s1 + $0x90] sm:$0xff]  }
  0x43   : > { %5254 = vmatprep.subr.bf16.mxu0 %v6623_v0  ;;  %v546_v39 = vsel %vm8230_vm1, %v541_v36, %v545_v37  ;;  %v549_v43 = vor.u32 %v547_v40, %v545_v37  ;;  %v1315_v58 = vrot.slane %v6889_v55, 2  ;;  %v4782_v59 = vcombine.low %v1300_v57, %v931_v56  ;;  %v6987_v26 = vld [vmem:[%s6768_s16 + $0x24] sm:$0xff]   ;;  %v6388_v28 = vld [vmem:[%s6768_s16 + $0x2c] ss:$0 sps:$4 sm:$0x11]   ;;  %s8249_s9 = smov 96  }
  0x44   : > { %v530_v16 = vsel %vm8230_vm1, %v525_v15, %v529_v13  ;;  %v557_v48 = vor.u32 %v555_v45, %v553_v44  ;;  %v561_v49 = vrot.slane %v559_v46, 1  ;;  %v1317_v63 = vrot.slane %v6899_v61, 2  ;;  %v6389_v45 = vld [vmem:[%s8217_s1 + $0xa0] sm:$0xff]   ;;  %s8247_s12 = smov 112   ;;  %s8361_s15 = smov 96  }
  0x45   : > { %5235 = vmatmul.mubr.msk.bf16.vlgmr.msra.gmra.mrb[0].mxu0 %vm8236_vm2, %v530_v16  ;;  %v554_v47 = vsel %vm8230_vm1, %v549_v43, %v553_v44  ;;  %v1314_v60 = vrot.slane %v4782_v59, 2  ;;  %v804_v8 = vrot.slane %v6832_v35, 1  ;;  %v806_v10 = vrot.slane %v6844_v42, 1  ;;  %v6392_v59 = vld [vmem:[%s8217_s1 + $0xb8] sm:$0xff]   ;;  %s8362_s17 = smov 112   ;;  %s6290_s18 = smul.u32 1280, %s6693_s25 }
  0x46   : > { %5255 = vmatpush3.bf16.msra.mxu0 %v6362_v17  ;;  %5238 = vmatprep.mubr.msk.bf16.mxu0 %vm8233_vm0, %v6623_v0  ;;  %v562_v50 = vsel %vm8230_vm1, %v557_v48, %v561_v49  ;;  %v6915_v2 = vsel %vm8229_vm4, %v1315_v58, %v1317_v63  ;;  %v4741_v13 = vcombine.low %v930_v11, %v931_v56  ;;  %v979_v15 = vrot.slane %v6889_v55, 1  ;;  %v6381_v17 = vld [vmem:[%s8217_s1 + $0x80] sm:$0xff]   ;;  %v6390_v49 = vld [vmem:[%s8217_s1 + $0xa8] sm:$0xff]   ;;  %p8377_p9 = scmp.ne.s32.totalorder %s8253_s7, 0 }
  0x47   : > { %5256 = vmatprep.subr.bf16.mxu0 %v6623_v0  ;;  %v6902_v62 = vsel %vm8229_vm4, %v1314_v60, %v1315_v58  ;;  %v807_v12 = vsel %vm8231_vm3, %v804_v8, %v806_v10  ;;  %v981_v18 = vrot.slane %v6899_v61, 1  ;;  %v1143_v42 = vshrl.u32 %v6899_v61, 16  ;;  %s8169_s13 = scalar_lea.hbm %s8222_s6, %s6290_s18 }
  0x48   : > { %v1126_v31 = vshrl.u32 %v4741_v13, 16  ;;  %v1146_v43 = vshll.u32 %v6899_v61, 16  ;;  %v1161_v57 = vshrl.u32 %v6987_v26, 16  ;;  %v1164_v58 = vshll.u32 %v6987_v26, 16 }
  0x49   : > { %v1145_v46 = vrot.slane %v1143_v42, 1 }
  0x4a   : > { %5257 = vmatpush3.bf16.msra.mxu0 %v6364_v20  ;;  %v982_v20 = vsel %vm8231_vm3, %v979_v15, %v981_v18  ;;  %v1128_v36 = vrot.slane %v1126_v31, 1  ;;  %v7114_v31 = vld [vmem:[%s6768_s16 + $0x20] sm:$0xff]  }
  0x4b   : > { %5258 = vmatprep.subr.bf16.mxu0 %v6623_v0 }
  0x4d   : > { %5239 = vmatmul.mubr.msk.bf16.gmra.mrb[4].mxu0 %vm8236_vm2, %v538_v30  ;;  %v987_v30 = vrot.slane %v6388_v28, 1 }
  0x4e   : > { %5242 = vmatprep.mubr.msk.bf16.mxu0 %vm8233_vm0, %v6623_v0  ;;  %5259 = vmatpush3.bf16.msra.mxu0 %v6366_v32  ;;  %v1129_v32 = vshll.u32 %v4741_v13, 16 }
  0x4f   : > { %5260 = vmatprep.subr.bf16.mxu0 %v6623_v0 }
  0x50   : > { %v1131_v37 = vrot.slane %v1129_v32, 2  ;;  %v6405_v32 = vld [vmem:[%s8217_s1 + $0xf0] sm:$0xff]  }
  0x52   : > { %5261 = vmatpush3.bf16.msra.mxu0 %v6368_v38  ;;  %v1132_v40 = vor.u32 %v1131_v37, %v1128_v36  ;;  %v7130_v36 = vld [vmem:[%s6768_s16 + $0x28] sm:$0xff]  }
  0x53   : > { %5282 = vmatprep.subr.bf16.mxu0 %v6623_v0  ;;  %v1502_v37 = vrot.slane %v7130_v36, 2 }
  0x55   : > { %5243 = vmatmul.mubr.msk.bf16.gmra.mrb[8].mxu0 %vm8236_vm2, %v546_v39 }
  0x56   : > { %5246 = vmatprep.mubr.msk.bf16.mxu0 %vm8233_vm0, %v6623_v0 }
  0x5d   : > { %5247 = vmatmul.mubr.msk.bf16.gmra.mrb[12].mxu0 %vm8236_vm2, %v554_v47  ;;  %v1148_v47 = vrot.slane %v1146_v43, 2 }
  0x5e   : > { %5250 = vmatprep.mubr.msk.bf16.mxu0 %vm8233_vm0, %v6623_v0 }
  0x5f   : > { %v1149_v48 = vor.u32 %v1148_v47, %v1145_v46 }
  0x65   : > { %5251 = vmatmul.mubr.msk.bf16.gmra.mrb[16].mxu0 %vm8236_vm2, %v562_v50  ;;  %v1152_v50 = vshrl.u32 %v6971_v21, 16 }
  0x66   : > { %5262 = vmatprep.mubr.msk.bf16.mxu0 %vm8233_vm0, %v6623_v0 }
  0x6d   : > { %5263 = vmatmul.mubr.msk.bf16.vlgmr.msra.gmra.mrb[0].mxu0 %vm8236_vm2, %v6776_v5  ;;  %v802_v5 = vrot.slane %v6809_v23, 1 }
  0x6e   : > { %5283 = vmatpush3.bf16.msra.mxu0 %v6370_v51  ;;  %5266 = vmatprep.mubr.msk.bf16.mxu0 %vm8233_vm0, %v6623_v0  ;;  %v1155_v51 = vshll.u32 %v6971_v21, 16 }
  0x6f   : > { %5284 = vmatprep.subr.bf16.mxu0 %v6623_v0  ;;  %v803_v7 = vsel %vm8231_vm3, %v800_v27, %v802_v5  ;;  %v805_v9 = vsel %vm8231_vm3, %v802_v5, %v804_v8  ;;  %v985_v27 = vrot.slane %v6987_v26, 1 }
  0x72   : > { %5285 = vmatpush3.bf16.msra.mxu0 %v6371_v52 }
  0x73   : > { %5286 = vmatprep.subr.bf16.mxu0 %v6623_v0 }
  0x75   : > { %5267 = vmatmul.mubr.msk.bf16.gmra.mrb[4].mxu0 %vm8236_vm2, %v6779_v6  ;;  %v6378_v6 = vld [vmem:[%s8217_s1 + $0x78] sm:$0xff]  }
  0x76   : > { %5270 = vmatprep.mubr.msk.bf16.mxu0 %vm8233_vm0, %v6623_v0  ;;  %5287 = vmatpush3.bf16.msra.mxu0 %v6372_v53  ;;  %v1154_v53 = vrot.slane %v1152_v50, 1 }
  0x77   : > { %5288 = vmatprep.subr.bf16.mxu0 %v6623_v0 }
  0x7a   : > { %5289 = vmatpush3.bf16.msra.mxu0 %v6373_v54  ;;  %v1157_v54 = vrot.slane %v1155_v51, 2 }
  0x7b   : > { %5310 = vmatprep.subr.bf16.mxu0 %v6623_v0 }
  0x7c   : > { %v1158_v56 = vor.u32 %v1157_v54, %v1154_v53 }
  0x7d   : > { %5271 = vmatmul.mubr.msk.bf16.gmra.mrb[8].mxu0 %vm8236_vm2, %v6792_v14  ;;  %v978_v14 = vrot.slane %v4741_v13, 1  ;;  %v6395_v13 = vld [vmem:[%s8217_s1 + $0xc0] sm:$0xff]  }
  0x7e   : > { %5274 = vmatprep.mubr.msk.bf16.mxu0 %vm8233_vm0, %v6623_v0  ;;  %v1159_v60 = vsel %vm8227_vm5, %v1149_v48, %v1158_v56 }
  0x7f   : > { %v980_v16 = vsel %vm8231_vm3, %v978_v14, %v979_v15  ;;  %v6396_v14 = vld [vmem:[%s8217_s1 + $0xc8] sm:$0xff]   ;;  %v6397_v15 = vld [vmem:[%s8217_s1 + $0xd0] sm:$0xff]  }
  0x85   : > { %5275 = vmatmul.mubr.msk.bf16.gmra.mrb[12].mxu0 %vm8236_vm2, %v6809_v23  ;;  %v983_v23 = vrot.slane %v6971_v21, 1 }
  0x86   : > { %5278 = vmatprep.mubr.msk.bf16.mxu0 %vm8233_vm0, %v6623_v0 }
  0x87   : > { %v984_v25 = vsel %vm8231_vm3, %v981_v18, %v983_v23  ;;  %v986_v29 = vsel %vm8231_vm3, %v983_v23, %v985_v27 }
  0x8d   : > { %5279 = vmatmul.mubr.msk.bf16.gmra.mrb[16].mxu0 %vm8236_vm2, %v6832_v35  ;;  %v988_v35 = vsel %vm8231_vm3, %v985_v27, %v987_v30  ;;  %v7102_v27 = vld [vmem:[%s6768_s16 + $0x18] sm:$0xff]  }
  0x8e   : > { %5290 = vmatprep.mubr.msk.bf16.mxu0 %vm8233_vm0, %v6623_v0  ;;  %v1498_v28 = vrot.slane %v7102_v27, 2  ;;  %v1663_v53 = vshll.u32 %v7102_v27, 16 }
  0x95   : > { %5291 = vmatmul.mubr.msk.bf16.vlgmr.msra.gmra.mrb[0].mxu0 %vm8236_vm2, %v6828_v34  ;;  %v1137_v34 = vshll.u32 %v6889_v55, 16 }
  0x96   : > { %5311 = vmatpush3.bf16.msra.mxu0 %v6375_v1  ;;  %5294 = vmatprep.mubr.msk.bf16.mxu0 %vm8233_vm0, %v6623_v0  ;;  %v1163_v1 = vrot.slane %v1161_v57, 1  ;;  %v1665_v57 = vrot.slane %v1663_v53, 3 }
  0x97   : > { %5312 = vmatprep.subr.bf16.mxu0 %v6623_v0  ;;  %v1139_v39 = vrot.slane %v1137_v34, 2  ;;  %v6407_v34 = vld [vmem:[%s8217_s1 + $0xf8] sm:$0xff]  }
  0x9a   : > { %5313 = vmatpush3.bf16.msra.mxu0 %v6376_v3  ;;  %v1166_v3 = vrot.slane %v1164_v58, 2 }
  0x9b   : > { %5314 = vmatprep.subr.bf16.mxu0 %v6623_v0 }
  0x9c   : > { %v1167_v5 = vor.u32 %v1166_v3, %v1163_v1  ;;  %v1672_v1 = vshll.u32 %v7114_v31, 16 }
  0x9d   : > { %5295 = vmatmul.mubr.msk.bf16.gmra.mrb[4].mxu0 %vm8236_vm2, %v6824_v33  ;;  %v1134_v33 = vshrl.u32 %v6889_v55, 16  ;;  %v6391_v55 = vld [vmem:[%s8217_s1 + $0xb0] sm:$0xff]  }
  0x9e   : > { %5298 = vmatprep.mubr.msk.bf16.mxu0 %vm8233_vm0, %v6623_v0  ;;  %5315 = vmatpush3.bf16.msra.mxu0 %v6377_v4  ;;  %v6393_v4 = vld [vmem:[%s6768_s16 + $0x2c] ss:$0 sps:$4 sm:$0x33]   ;;  %v1168_v8 = vsel %vm8227_vm5, %v1158_v56, %v1167_v5 }
  0x9f   : > { %5316 = vmatprep.subr.bf16.mxu0 %v6623_v0  ;;  %v1136_v38 = vrot.slane %v1134_v33, 1  ;;  %v1323_v61 = vrot.slane %v6393_v4, 2  ;;  %v1500_v33 = vrot.slane %v7114_v31, 2 }
  0xa1   : > { %v1140_v41 = vor.u32 %v1139_v39, %v1136_v38  ;;  %v6408_v38 = vld [vmem:[%s6768_s16 + $0x30] ss:$0 sps:$4 sm:$0x33]   ;;  %v1503_v39 = vsel %vm8229_vm4, %v1500_v33, %v1502_v37 }
  0xa2   : > { %5317 = vmatpush3.bf16.msra.mxu0 %v6378_v6  ;;  %v1170_v6 = vshrl.u32 %v6393_v4, 16 }
  0xa3   : > { %5338 = vmatprep.subr.bf16.mxu0 %v6623_v0  ;;  %v1141_v44 = vsel %vm8227_vm5, %v1132_v40, %v1140_v41  ;;  %v1150_v52 = vsel %vm8227_vm5, %v1140_v41, %v1149_v48  ;;  %v1504_v40 = vrot.slane %v6408_v38, 2 }
  0xa5   : > { %5299 = vmatmul.mubr.msk.bf16.gmra.mrb[8].mxu0 %vm8236_vm2, %v803_v7  ;;  %v1173_v7 = vshll.u32 %v6393_v4, 16 }
  0xa6   : > { %5302 = vmatprep.mubr.msk.bf16.mxu0 %vm8233_vm0, %v6623_v0 }
  0xa7   : > { %v1175_v10 = vrot.slane %v1173_v7, 2 }
  0xad   : > { %5303 = vmatmul.mubr.msk.bf16.gmra.mrb[12].mxu0 %vm8236_vm2, %v805_v9  ;;  %v1172_v9 = vrot.slane %v1170_v6, 1  ;;  %v6411_v6 = vld [vmem:[%s8217_s1 + $0x110] sm:$0xff]  }
  0xae   : > { %5306 = vmatprep.mubr.msk.bf16.mxu0 %vm8233_vm0, %v6623_v0 }
  0xaf   : > { %v1176_v11 = vor.u32 %v1175_v10, %v1172_v9  ;;  %v1681_v9 = vshll.u32 %v7130_v36, 16  ;;  %v6412_v10 = vld [vmem:[%s8217_s1 + $0x118] sm:$0xff]  }
  0xb5   : > { %5307 = vmatmul.mubr.msk.bf16.gmra.mrb[16].mxu0 %vm8236_vm2, %v807_v12  ;;  %v1177_v12 = vsel %vm8227_vm5, %v1167_v5, %v1176_v11  ;;  %v1674_v5 = vrot.slane %v1672_v1, 3 }
  0xb6   : > { %5318 = vmatprep.mubr.msk.bf16.mxu0 %vm8233_vm0, %v6623_v0 }
  0xbd   : > { %5319 = vmatmul.mubr.msk.bf16.vlgmr.msra.gmra.mrb[0].mxu0 %vm8236_vm2, %v980_v16  ;;  %v6398_v16 = vld [vmem:[%s8217_s1 + $0xd8] sm:$0xff]  }
  0xbe   : > { %5339 = vmatpush3.bf16.msra.mxu0 %v6381_v17  ;;  %5322 = vmatprep.mubr.msk.bf16.mxu0 %vm8233_vm0, %v6623_v0 }
  0xbf   : > { %5340 = vmatprep.subr.bf16.mxu0 %v6623_v0 }
  0xc2   : > { %5341 = vmatpush3.bf16.msra.mxu0 %v6383_v19  ;;  %v7086_v19 = vld [vmem:[%s6768_s16 + $0xc] sm:$0xf] }
  0xc3   : > { %5342 = vmatprep.subr.bf16.mxu0 %v6623_v0 }
  0xc5   : > { %5323 = vmatmul.mubr.msk.bf16.gmra.mrb[4].mxu0 %vm8236_vm2, %v982_v20 }
  0xc6   : > { %5326 = vmatprep.mubr.msk.bf16.mxu0 %vm8233_vm0, %v6623_v0  ;;  %5343 = vmatpush3.bf16.msra.mxu0 %v6385_v22  ;;  %v7091_v22 = vld [vmem:[%s6768_s16 + $0x10] sm:$0xff]  }
  0xc7   : > { %5344 = vmatprep.subr.bf16.mxu0 %v6623_v0  ;;  %v1651_v43 = vshrl.u32 %v7091_v22, 16 }
  0xc9   : > { %v1653_v48 = vrot.slane %v1651_v43, 2  ;;  %v2043_v43 = vld [vmem:[%s8221_s5 + $0x38] sm:$0xff] }
  0xca   : > { %5345 = vmatpush3.bf16.msra.mxu0 %v6387_v24  ;;  %v1496_v24 = vrot.slane %v7091_v22, 2 }
  0xcb   : > { %5366 = vmatprep.subr.bf16.mxu0 %v6623_v0 }
  0xcc   : > { %v1499_v30 = vsel %vm8229_vm4, %v1496_v24, %v1498_v28 }
  0xcd   : > { %5327 = vmatmul.mubr.msk.bf16.gmra.mrb[8].mxu0 %vm8236_vm2, %v984_v25 }
  0xce   : > { %5330 = vmatprep.mubr.msk.bf16.mxu0 %vm8233_vm0, %v6623_v0 }
  0xd5   : > { %5331 = vmatmul.mubr.msk.bf16.gmra.mrb[12].mxu0 %vm8236_vm2, %v986_v29  ;;  %v6403_v29 = vld [vmem:[%s8217_s1 + $0xe8] sm:$0xff]  }
  0xd6   : > { %5334 = vmatprep.mubr.msk.bf16.mxu0 %vm8233_vm0, %v6623_v0 }
  0xdd   : > { %5335 = vmatmul.mubr.msk.bf16.gmra.mrb[16].mxu0 %vm8236_vm2, %v988_v35  ;;  %v1501_v35 = vsel %vm8229_vm4, %v1498_v28, %v1500_v33  ;;  %v1836_v28 = vrot.slane %v7114_v31, 3  ;;  %v2037_v33 = vld [vmem:[%s8221_s5 + $0x8] sm:$0xff] }
  0xde   : > { %5346 = vmatprep.mubr.msk.bf16.mxu0 %vm8233_vm0, %v6623_v0 }
  0xe5   : > { %5347 = vmatmul.mubr.msk.bf16.vlgmr.msra.gmra.mrb[0].mxu0 %vm8236_vm2, %v1141_v44  ;;  %v1654_v44 = vshll.u32 %v7091_v22, 16 }
  0xe6   : > { %5367 = vmatpush3.bf16.msra.mxu0 %v6389_v45  ;;  %5350 = vmatprep.mubr.msk.bf16.mxu0 %vm8233_vm0, %v6623_v0  ;;  %v1505_v45 = vsel %vm8229_vm4, %v1502_v37, %v1504_v40  ;;  %v2039_v37 = vld [vmem:[%s8221_s5 + $0x18] sm:$0xff]  ;;  %v2041_v40 = vld [vmem:[%s8221_s5 + $0x28] sm:$0xff] }
  0xe7   : > { %5368 = vmatprep.subr.bf16.mxu0 %v6623_v0 }
  0xea   : > { %5369 = vmatpush3.bf16.msra.mxu0 %v6390_v49  ;;  %v1656_v49 = vrot.slane %v1654_v44, 3 }
  0xeb   : > { %5370 = vmatprep.subr.bf16.mxu0 %v6623_v0 }
  0xec   : > { %v1657_v51 = vor.u32 %v1656_v49, %v1653_v48  ;;  %v2046_v48 = vld [vmem:[%s8221_s5 + $0x50] sm:$0xff]  ;;  %v2047_v49 = vld [vmem:[%s8221_s5 + $0x58] sm:$0xff] }
  0xed   : > { %5351 = vmatmul.mubr.msk.bf16.gmra.mrb[4].mxu0 %vm8236_vm2, %v1150_v52  ;;  %v1660_v52 = vshrl.u32 %v7102_v27, 16 }
  0xee   : > { %5354 = vmatprep.mubr.msk.bf16.mxu0 %vm8233_vm0, %v6623_v0  ;;  %5371 = vmatpush3.bf16.msra.mxu0 %v6391_v55  ;;  %v6409_v55 = vld [vmem:[%s8217_s1 + $0x100] sm:$0xff]  }
  0xef   : > { %5372 = vmatprep.subr.bf16.mxu0 %v6623_v0  ;;  %v1662_v56 = vrot.slane %v1660_v52, 2  ;;  %v2049_v52 = vld [vmem:[%s8221_s5 + $0x68] sm:$0xff] }
  0xf1   : > { %v1666_v58 = vor.u32 %v1665_v57, %v1662_v56  ;;  %v266_v57 = vlaneseq }
  0xf2   : > { %5373 = vmatpush3.bf16.msra.mxu0 %v6392_v59  ;;  %v6410_v59 = vld [vmem:[%s8217_s1 + $0x108] sm:$0xff]  }
  0xf3   : > { %5394 = vmatprep.subr.bf16.mxu0 %v6623_v0  ;;  %v1667_v3 = vsel %vm8226_vm6, %v1657_v51, %v1666_v58 }
  0xf5   : > { %5355 = vmatmul.mubr.msk.bf16.gmra.mrb[8].mxu0 %vm8236_vm2, %v1159_v60  ;;  %v1669_v60 = vshrl.u32 %v7114_v31, 16  ;;  %v2036_v31 = vld [vmem:[%s8221_s5] sm:$0xff] }
  0xf6   : > { %5358 = vmatprep.mubr.msk.bf16.mxu0 %vm8233_vm0, %v6623_v0 }
  0xf7   : > { %v1671_v4 = vrot.slane %v1669_v60, 2 }
  0xf9   : > { %v1675_v7 = vor.u32 %v1674_v5, %v1671_v4 }
  0xfb   : > { %v1676_v11 = vsel %vm8226_vm6, %v1666_v58, %v1675_v7  ;;  %v7274_v58 = vshrl.u32 %v266_v57, 7 }
  0xfd   : > { %5359 = vmatmul.mubr.msk.bf16.gmra.mrb[12].mxu0 %vm8236_vm2, %v1168_v8  ;;  %v1678_v8 = vshrl.u32 %v7130_v36, 16  ;;  %v7278_v60 = vmul.u32.u64.low 3435973837, %v7274_v58  ;;  %v7279_v1 = vmul.u32.u64.high 3435973837, %v7274_v58, %v7278_v60  ;;  %v269_v5 = vadd.s32 16, %v7274_v58 }
  0xfe   : > { %5362 = vmatprep.mubr.msk.bf16.mxu0 %vm8233_vm0, %v6623_v0 }
 0x105   : > { %5363 = vmatmul.mubr.msk.bf16.gmra.mrb[16].mxu0 %vm8236_vm2, %v1177_v12  ;;  %v1680_v12 = vrot.slane %v1678_v8, 2 }
 0x106   : > { %5374 = vmatprep.mubr.msk.bf16.mxu0 %vm8233_vm0, %v6623_v0 }
 0x10d   : > { %5375 = vmatmul.mubr.msk.bf16.vlgmr.msra.gmra.mrb[0].mxu0 %vm8236_vm2, %v6902_v62  ;;  %v1319_v62 = vrot.slane %v6971_v21, 2 }
 0x10e   : > { %5395 = vmatpush3.bf16.msra.mxu0 %v6395_v13  ;;  %5378 = vmatprep.mubr.msk.bf16.mxu0 %vm8233_vm0, %v6623_v0  ;;  %v1683_v13 = vrot.slane %v1681_v9, 3  ;;  %v283_v9 = vshrl.u32 %v7279_v1, 3 }
 0x10f   : > { %5396 = vmatprep.subr.bf16.mxu0 %v6623_v0  ;;  %v1320_v17 = vsel %vm8229_vm4, %v1317_v63, %v1319_v62  ;;  %v1447_v63 = vld [vmem:[%s6768_s16 + $0x8] sm:$0xc] }
 0x110   : > { %v4800_v21 = vcombine.low %v1447_v63, %v7086_v19  ;;  %v1817_v63 = vld [vmem:[%s6768_s16 + $0x8] sm:$0x8] }
 0x112   : > { %5397 = vmatpush3.bf16.msra.mxu0 %v6396_v14  ;;  %v1495_v23 = vrot.slane %v4800_v21, 2  ;;  %v1643_v41 = vshrl.u32 %v4800_v21, 16  ;;  %v1646_v42 = vshll.u32 %v4800_v21, 16  ;;  %v6413_v14 = vld [vmem:[%s6768_s16 + $0x30] ss:$0 sps:$4 sm:$0x77]   ;;  %v4841_v21 = vcombine.low %v1817_v63, %v7086_v19 }
 0x113   : > { %5398 = vmatprep.subr.bf16.mxu0 %v6623_v0 }
 0x114   : > { %v1497_v25 = vsel %vm8229_vm4, %v1495_v23, %v1496_v24  ;;  %v1645_v46 = vrot.slane %v1643_v41, 2  ;;  %v1648_v47 = vrot.slane %v1646_v42, 3  ;;  %v1831_v23 = vrot.slane %v4841_v21, 3  ;;  %v2042_v42 = vld [vmem:[%s8221_s5 + $0x30] sm:$0xff] }
 0x115   : > { %5379 = vmatmul.mubr.msk.bf16.gmra.mrb[4].mxu0 %vm8236_vm2, %v6915_v2  ;;  %v1321_v2 = vrot.slane %v6987_v26, 2  ;;  %v6401_v26 = vld [vmem:[%s8217_s1 + $0xe0] sm:$0xff]   ;;  %v1832_v24 = vrot.slane %v7091_v22, 3  ;;  %v5910_v44 = vpack.c.bf16 %v2043_v43, %v2042_v42 }
 0x116   : > { %5382 = vmatprep.mubr.msk.bf16.mxu0 %vm8233_vm0, %v6623_v0  ;;  %5399 = vmatpush3.bf16.msra.mxu0 %v6397_v15  ;;  %v1649_v50 = vor.u32 %v1648_v47, %v1645_v46  ;;  %v1684_v15 = vor.u32 %v1683_v13, %v1680_v12  ;;  %v2045_v46 = vld [vmem:[%s8221_s5 + $0x48] sm:$0xff]  ;;  %v271_v13 = vadd.s32 32, %v7274_v58 }
 0x117   : > { %5400 = vmatprep.subr.bf16.mxu0 %v6623_v0  ;;  %v1322_v18 = vsel %vm8229_vm4, %v1319_v62, %v1321_v2  ;;  %v1324_v20 = vsel %vm8229_vm4, %v1321_v2, %v1323_v61  ;;  %v1687_v62 = vshrl.u32 %v6413_v14, 16 }
 0x118   : > { %v1658_v54 = vsel %vm8226_vm6, %v1649_v50, %v1657_v51  ;;  %v5916_v50 = vpack.c.bf16 %v2047_v49, %v2046_v48  ;;  %v2048_v51 = vld [vmem:[%s8221_s5 + $0x60] sm:$0xff] }
 0x119   : > { %v1689_v2 = vrot.slane %v1687_v62, 2  ;;  %v5919_v53 = vpack.c.bf16 %v2049_v52, %v2048_v51 }
 0x11a   : > { %5401 = vmatpush3.bf16.msra.mxu0 %v6398_v16  ;;  %v1690_v16 = vshll.u32 %v6413_v14, 16 }
 0x11b   : > { %5422 = vmatprep.subr.bf16.mxu0 %v6623_v0 }
 0x11d   : > { %5383 = vmatmul.mubr.msk.bf16.gmra.mrb[8].mxu0 %vm8236_vm2, %v1320_v17  ;;  %v1685_v17 = vsel %vm8226_vm6, %v1675_v7, %v1684_v15  ;;  %v7286_v7 = vmul.u32.u64.low 3435973837, %v269_v5  ;;  %v7287_v8 = vmul.u32.u64.high 3435973837, %v269_v5, %v7286_v7 }
 0x11e   : > { %5386 = vmatprep.mubr.msk.bf16.mxu0 %vm8233_vm0, %v6623_v0 }
 0x125   : > { %5387 = vmatmul.mubr.msk.bf16.gmra.mrb[12].mxu0 %vm8236_vm2, %v1322_v18  ;;  %v1692_v18 = vrot.slane %v1690_v16, 3  ;;  %v305_v16 = vshrl.u32 %v7287_v8, 3 }
 0x126   : > { %5390 = vmatprep.mubr.msk.bf16.mxu0 %vm8233_vm0, %v6623_v0 }
 0x127   : > { %v1693_v61 = vor.u32 %v1692_v18, %v1689_v2 }
 0x12d   : > { %5391 = vmatmul.mubr.msk.bf16.gmra.mrb[16].mxu0 %vm8236_vm2, %v1324_v20  ;;  %v1694_v20 = vsel %vm8226_vm6, %v1684_v15, %v1693_v61  ;;  %v272_v15 = vadd.s32 40, %v7274_v58 }
 0x12e   : > { %5402 = vmatprep.mubr.msk.bf16.mxu0 %vm8233_vm0, %v6623_v0 }
 0x12f   : > { %v7301_v61 = vmul.u32.u64.low 3435973837, %v272_v15  ;;  %v7302_v63 = vmul.u32.u64.high 3435973837, %v272_v15, %v7301_v61 }
 0x135   : > { %5403 = vmatmul.mubr.msk.bf16.vlgmr.msra.gmra.mrb[0].mxu0 %vm8236_vm2, %v1497_v25  ;;  %v1833_v25 = vsel %vm8228_vm7, %v1831_v23, %v1832_v24  ;;  %v306_v23 = vmul.u32 10, %v305_v16 }
 0x136   : > { %5423 = vmatpush3.bf16.msra.mxu0 %v6401_v26  ;;  %5406 = vmatprep.mubr.msk.bf16.mxu0 %vm8233_vm0, %v6623_v0  ;;  %v1834_v26 = vrot.slane %v7102_v27, 3 }
 0x137   : > { %5424 = vmatprep.subr.bf16.mxu0 %v6623_v0 }
 0x138   : > { %v1835_v19 = vsel %vm8228_vm7, %v1832_v24, %v1834_v26  ;;  %v1837_v22 = vsel %vm8228_vm7, %v1834_v26, %v1836_v28  ;;  %v7306_v24 = vadd.s32 48, %v7274_v58 }
 0x13a   : > { %5425 = vmatpush3.bf16.msra.mxu0 %v6403_v29  ;;  %v1838_v29 = vrot.slane %v7130_v36, 3  ;;  %v2038_v36 = vld [vmem:[%s8221_s5 + $0x10] sm:$0xff] }
 0x13b   : > { %5426 = vmatprep.subr.bf16.mxu0 %v6623_v0  ;;  %v5904_v38 = vpack.c.bf16 %v2039_v37, %v2038_v36 }
 0x13c   : > { %v1839_v27 = vsel %vm8228_vm7, %v1836_v28, %v1838_v29 }
 0x13d   : > { %5407 = vmatmul.mubr.msk.bf16.gmra.mrb[4].mxu0 %vm8236_vm2, %v1499_v30  ;;  %v1840_v30 = vrot.slane %v6413_v14, 3  ;;  %v284_v14 = vmul.u32 10, %v283_v9 }
 0x13e   : > { %5410 = vmatprep.mubr.msk.bf16.mxu0 %vm8233_vm0, %v6623_v0  ;;  %5427 = vmatpush3.bf16.msra.mxu0 %v6405_v32 }
 0x13f   : > { %5428 = vmatprep.subr.bf16.mxu0 %v6623_v0  ;;  %v1841_v32 = vsel %vm8228_vm7, %v1838_v29, %v1840_v30  ;;  %v285_v18 = vsub.s32 %v7274_v58, %v284_v14 }
 0x141   : > { %vm387_vm8 = vcmp.ne.s32.totalorder %v285_v18, 0  ;;  %vm397_vm9 = vcmp.lt.s32.totalorder %v285_v18, 0 }
 0x142   : > { %5429 = vmatpush3.bf16.msra.mxu0 %v6407_v34  ;;  %v5901_v34 = vpack.c.bf16 %v2037_v33, %v2036_v31  ;;  %vm7311_vm12 = vmand %vm397_vm9, %vm387_vm8  ;;  %v338_v33 = vshrl.u32 %v7302_v63, 3 }
 0x143   : > { %5450 = vmatprep.subr.bf16.mxu0 %v6623_v0 }
 0x145   : > { %5411 = vmatmul.mubr.msk.bf16.gmra.mrb[8].mxu0 %vm8236_vm2, %v1501_v35  ;;  %v6625_v35 = vmov 0.0|0.0  }
 0x146   : > { %5414 = vmatprep.mubr.msk.bf16.mxu0 %vm8233_vm0, %v6623_v0  ;;  %5900 = vmatprep.subr.bf16.mxu1 %v6625_v35 }
 0x147   : > { %5902 = vmatpush3.bf16.msra.mxu1 %v5901_v34 }
 0x148   : > { %5903 = vmatprep.subr.bf16.mxu1 %v6625_v35 }
 0x14b   : > { %5905 = vmatpush3.bf16.msra.mxu1 %v5904_v38 }
 0x14c   : > { %5906 = vmatprep.subr.bf16.mxu1 %v6625_v35 }
 0x14d   : > { %5415 = vmatmul.mubr.msk.bf16.gmra.mrb[12].mxu0 %vm8236_vm2, %v1503_v39  ;;  %v2040_v39 = vld [vmem:[%s8221_s5 + $0x20] sm:$0xff] }
 0x14e   : > { %5418 = vmatprep.mubr.msk.bf16.mxu0 %vm8233_vm0, %v6623_v0  ;;  %v5907_v41 = vpack.c.bf16 %v2041_v40, %v2040_v39 }
 0x150   : > { %5908 = vmatpush3.bf16.msra.mxu1 %v5907_v41  ;;  %v7334_v41 = vadd.s32 64, %v7274_v58 }
 0x151   : > { %5909 = vmatprep.subr.bf16.mxu1 %v6625_v35 }
 0x154   : > { %5911 = vmatpush3.bf16.msra.mxu1 %v5910_v44  ;;  %v339_v44 = vmul.u32 10, %v338_v33 }
 0x155   : > { %5419 = vmatmul.mubr.msk.bf16.gmra.mrb[16].mxu0 %vm8236_vm2, %v1505_v45  ;;  %v2044_v45 = vld [vmem:[%s8221_s5 + $0x40] sm:$0xff]  ;;  %5912 = vmatprep.subr.bf16.mxu1 %v6625_v35 }
 0x156   : > { %5430 = vmatprep.mubr.msk.bf16.mxu0 %vm8233_vm0, %v6623_v0  ;;  %v5913_v47 = vpack.c.bf16 %v2045_v46, %v2044_v45  ;;  %v7345_v46 = vadd.s32 72, %v7274_v58  ;;  %v340_v60 = vsub.s32 %v272_v15, %v339_v44 }
 0x158   : > { %5914 = vmatpush3.bf16.msra.mxu1 %v5913_v47  ;;  %v422_v61 = vadd.s32 10, %v340_v60 }
 0x159   : > { %5915 = vmatprep.subr.bf16.mxu1 %v6625_v35 }
 0x15c   : > { %5917 = vmatpush3.bf16.msra.mxu1 %v5916_v50 }
 0x15d   : > { %5431 = vmatmul.mubr.msk.bf16.vlgmr.msra.gmra.mrb[0].mxu0 %vm8236_vm2, %v1658_v54  ;;  %5918 = vmatprep.subr.bf16.mxu1 %v6625_v35  ;;  %v2050_v54 = vld [vmem:[%s8221_s5 + $0x70] sm:$0xff] }
 0x15e   : > { %5451 = vmatpush3.bf16.msra.mxu0 %v6409_v55  ;;  %5434 = vmatprep.mubr.msk.bf16.mxu0 %vm8233_vm0, %v6623_v0  ;;  %v2051_v55 = vld [vmem:[%s8221_s5 + $0x78] sm:$0xff] }
 0x15f   : > { %5452 = vmatprep.subr.bf16.mxu0 %v6623_v0  ;;  %v5922_v56 = vpack.c.bf16 %v2051_v55, %v2050_v54  ;;  %v7358_v54 = vmul.u32.u64.low 3435973837, %v7334_v41  ;;  %v7359_v55 = vmul.u32.u64.high 3435973837, %v7334_v41, %v7358_v54 }
 0x160   : > { %5920 = vmatpush3.bf16.msra.mxu1 %v5919_v53 }
 0x161   : > { %5921 = vmatprep.subr.bf16.mxu1 %v6625_v35 }
 0x162   : > { %5453 = vmatpush3.bf16.msra.mxu0 %v6410_v59  ;;  %v268_v59 = vadd.s32 8, %v7274_v58 }
 0x163   : > { %5454 = vmatprep.subr.bf16.mxu0 %v6623_v0 }
 0x164   : > { %5923 = vmatpush3.bf16.msra.mxu1 %v5922_v56 }
 0x165   : > { %5435 = vmatmul.mubr.msk.bf16.gmra.mrb[4].mxu0 %vm8236_vm2, %v1667_v3  ;;  %5513 = vmatprep.subr.bf16.mxu1 %v6623_v0  ;;  %v7281_v3 = vmul.u32.u64.low 3435973837, %v268_v59  ;;  %v7282_v4 = vmul.u32.u64.high 3435973837, %v268_v59, %v7281_v3 }
 0x166   : > { %5438 = vmatprep.mubr.msk.bf16.mxu0 %vm8233_vm0, %v6623_v0  ;;  %5455 = vmatpush3.bf16.msra.mxu0 %v6411_v6  ;;  %v270_v6 = vadd.s32 24, %v7274_v58 }
 0x167   : > { %5456 = vmatprep.subr.bf16.mxu0 %v6623_v0 }
 0x16a   : > { %5457 = vmatpush3.bf16.msra.mxu0 %v6412_v10  ;;  %v294_v10 = vshrl.u32 %v7282_v4, 3 }
 0x16b   : > { %5872 = vmatprep.subr.bf16.mxu0 %v6623_v0 }
 0x16c   : > { %v295_v62 = vmul.u32 10, %v294_v10 }
 0x16d   : > { %5439 = vmatmul.mubr.msk.bf16.gmra.mrb[8].mxu0 %vm8236_vm2, %v1676_v11  ;;  %v7291_v11 = vmul.u32.u64.low 3435973837, %v270_v6  ;;  %v7292_v12 = vmul.u32.u64.high 3435973837, %v270_v6, %v7291_v11 }
 0x16e   : > { %5442 = vmatprep.mubr.msk.bf16.mxu0 %vm8233_vm0, %v6623_v0 }
 0x16f   : > { %v316_v21 = vshrl.u32 %v7292_v12, 3 }
 0x171   : > { %v317_v26 = vmul.u32 10, %v316_v21 }
 0x173   : > { %v318_v36 = vsub.s32 %v270_v6, %v317_v26 }
 0x175   : > { %5443 = vmatmul.mubr.msk.bf16.gmra.mrb[12].mxu0 %vm8236_vm2, %v1685_v17  ;;  %v7297_v17 = vmul.u32.u64.low 3435973837, %v271_v13  ;;  %v7298_v2 = vmul.u32.u64.high 3435973837, %v271_v13, %v7297_v17  ;;  %v420_v49 = vadd.s32 10, %v318_v36 }
 0x176   : > { %5446 = vmatprep.mubr.msk.bf16.mxu0 %vm8233_vm0, %v6623_v0 }
 0x177   : > { %v327_v29 = vshrl.u32 %v7298_v2, 3 }
 0x179   : > { %v328_v39 = vmul.u32 10, %v327_v29 }
 0x17b   : > { %v329_v50 = vsub.s32 %v271_v13, %v328_v39 }
 0x17d   : > { %5447 = vmatmul.mubr.msk.bf16.gmra.mrb[16].mxu0 %vm8236_vm2, %v1694_v20  ;;  %v296_v20 = vsub.s32 %v268_v59, %v295_v62  ;;  %v421_v14 = vadd.s32 10, %v329_v50 }
 0x17e   : > { %5458 = vmatprep.mubr.msk.bf16.mxu0 %vm8233_vm0, %v6623_v0 }
 0x17f   : > { %vm388_vm10 = vcmp.ne.s32.totalorder %v296_v20, 0  ;;  %vm398_vm11 = vcmp.lt.s32.totalorder %v296_v20, 0 }
 0x180   : > { %vm7320_vm13 = vmand %vm398_vm11, %vm388_vm10  ;;  %vm390_vm10 = vcmp.ne.s32.totalorder %v318_v36, 0  ;;  %vm400_vm11 = vcmp.lt.s32.totalorder %v318_v36, 0 }
 0x185   : > { %5459 = vmatmul.mubr.msk.bf16.vlgmr.msra.gmra.mrb[0].mxu0 %vm8236_vm2, %v1833_v25  ;;  %v417_v25 = vadd.s32 10, %v285_v18 }
 0x186   : > { %5462 = vmatprep.mubr.msk.bf16.mxu0 %vm8233_vm0, %v6623_v0 }
 0x187   : > { %v427_v34 = vsel %vm7311_vm12, %v417_v25, %v285_v18 }
 0x188   : > { %vm7336_vm8 = vcmp.lt.s32.totalorder %v427_v34, 8 }
 0x18d   : > { %5463 = vmatmul.mubr.msk.bf16.gmra.mrb[4].mxu0 %vm8236_vm2, %v1835_v19  ;;  %v7309_v19 = vadd.s32 56, %v7274_v58 }
 0x18e   : > { %5466 = vmatprep.mubr.msk.bf16.mxu0 %vm8233_vm0, %v6623_v0 }
 0x18f   : > { %v7328_v37 = vmul.u32.u64.low 3435973837, %v7309_v19  ;;  %v7329_v38 = vmul.u32.u64.high 3435973837, %v7309_v19, %v7328_v37 }
 0x191   : > { %v360_v4 = vshrl.u32 %v7329_v38, 3 }
 0x193   : > { %v361_v15 = vmul.u32 10, %v360_v4 }
 0x195   : > { %5467 = vmatmul.mubr.msk.bf16.gmra.mrb[8].mxu0 %vm8236_vm2, %v1837_v22  ;;  %v307_v22 = vsub.s32 %v269_v5, %v306_v23  ;;  %v7374_v5 = vmul.u32.u64.low 3435973837, %v7345_v46  ;;  %v7375_v6 = vmul.u32.u64.high 3435973837, %v7345_v46, %v7374_v5 }
 0x196   : > { %5470 = vmatprep.mubr.msk.bf16.mxu0 %vm8233_vm0, %v6623_v0 }
 0x197   : > { %vm389_vm14 = vcmp.ne.s32.totalorder %v307_v22, 0  ;;  %vm399_vm15 = vcmp.lt.s32.totalorder %v307_v22, 0  ;;  %v419_v43 = vadd.s32 10, %v307_v22 }
 0x198   : > { %vm7340_vm9 = vmand %vm399_vm15, %vm389_vm14  ;;  %vm391_vm14 = vcmp.ne.s32.totalorder %v329_v50, 0  ;;  %vm401_vm15 = vcmp.lt.s32.totalorder %v329_v50, 0 }
 0x199   : > { %v429_v57 = vsel %vm7340_vm9, %v419_v43, %v307_v22  ;;  %vm7389_vm5 = vmand %vm401_vm15, %vm391_vm14 }
 0x19a   : > { %vm7379_vm9 = vcmp.lt.s32.totalorder %v429_v57, 8  ;;  %v431_v29 = vsel %vm7389_vm5, %v421_v14, %v329_v50 }
 0x19d   : > { %5471 = vmatmul.mubr.msk.bf16.gmra.mrb[12].mxu0 %vm8236_vm2, %v1839_v27  ;;  %v418_v27 = vadd.s32 10, %v296_v20 }
 0x19e   : > { %5474 = vmatprep.mubr.msk.bf16.mxu0 %vm8233_vm0, %v6623_v0 }
 0x19f   : > { %v428_v40 = vsel %vm7320_vm13, %v418_v27, %v296_v20  ;;  %vm7365_vm13 = vmand %vm400_vm11, %vm390_vm10  ;;  %vm392_vm10 = vcmp.ne.s32.totalorder %v340_v60, 0  ;;  %vm402_vm11 = vcmp.lt.s32.totalorder %v340_v60, 0  ;;  %v371_v20 = vshrl.u32 %v7359_v55, 3 }
 0x1a0   : > { %vm7349_vm12 = vcmp.lt.s32.totalorder %v428_v40, 8  ;;  %v430_v10 = vsel %vm7365_vm13, %v420_v49, %v318_v36  ;;  %vm7401_vm13 = vmand %vm402_vm11, %vm392_vm10  ;;  %v382_v27 = vshrl.u32 %v7375_v6, 3  ;;  %vm7414_vm10 = vcmp.lt.s32.totalorder %v431_v29, 8 }
 0x1a1   : > { %vm7385_vm6 = vcmp.lt.s32.totalorder %v430_v10, 8  ;;  %v432_v33 = vsel %vm7401_vm13, %v422_v61, %v340_v60  ;;  %v372_v34 = vmul.u32 10, %v371_v20  ;;  %v8296_v29 = vmov 0 }
 0x1a2   : > { %vm7420_vm7 = vcmp.lt.s32.totalorder %v432_v33, 8 }
 0x1a3   : > { %v373_v50 = vsub.s32 %v7334_v41, %v372_v34 }
 0x1a5   : > { %5475 = vmatmul.mubr.msk.bf16.gmra.mrb[16].mxu0 %vm8236_vm2, %v1841_v32  ;;  %v7317_v30 = vmul.u32.u64.low 3435973837, %v7306_v24  ;;  %v7318_v32 = vmul.u32.u64.high 3435973837, %v7306_v24, %v7317_v30  ;;  %vm8243_vm2 = vcmask 654336  }
 0x1a6   : > { %5880 = vmatprep.mubr.msk.bf16.mxu0 %vm8233_vm0, %v6623_v0 }
 0x1a7   : > { %v349_v53 = vshrl.u32 %v7318_v32, 3 }
 0x1a9   : > { %v350_v11 = vmul.u32 10, %v349_v53 }
 0x1ab   : > { %v351_v63 = vsub.s32 %v7306_v24, %v350_v11  ;;  %v362_v24 = vsub.s32 %v7309_v19, %v361_v15  ;;  %v383_v19 = vmul.u32 10, %v382_v27 }
 0x1ad   : > { %vm393_vm14 = vcmp.ne.s32.totalorder %v351_v63, 0  ;;  %vm403_vm15 = vcmp.lt.s32.totalorder %v351_v63, 0  ;;  %v423_v38 = vadd.s32 10, %v351_v63  ;;  %vm394_vm5 = vcmp.ne.s32.totalorder %v362_v24, 0 }
 0x1ae   : > { %vm404_vm11 = vcmp.lt.s32.totalorder %v362_v24, 0  ;;  %vm7424_vm4 = vmand %vm403_vm15, %vm393_vm14  ;;  %v424_v49 = vadd.s32 10, %v362_v24  ;;  %v384_v60 = vsub.s32 %v7345_v46, %v383_v19  ;;  %vm395_vm14 = vcmp.ne.s32.totalorder %v373_v50, 0 }
 0x1af   : > { %vm7434_vm13 = vmand %vm404_vm11, %vm394_vm5  ;;  %v433_v59 = vsel %vm7424_vm4, %v423_v38, %v351_v63  ;;  %vm405_vm15 = vcmp.lt.s32.totalorder %v373_v50, 0 }
 0x1b0   : > { %v434_v4 = vsel %vm7434_vm13, %v424_v49, %v362_v24  ;;  %vm7446_vm5 = vcmp.lt.s32.totalorder %v433_v59, 8  ;;  %vm396_vm11 = vcmp.ne.s32.totalorder %v384_v60, 0  ;;  %vm406_vm1 = vcmp.lt.s32.totalorder %v384_v60, 0  ;;  %vm7456_vm3 = vmand %vm405_vm15, %vm395_vm14 }
 0x1b1   : > { %vm7452_vm4 = vcmp.lt.s32.totalorder %v434_v4, 8  ;;  %vm416_vm13 = vmand %vm406_vm1, %vm396_vm11  ;;  %vm448_vm15 = vcmask 1041408   ;;  %vm8235_vm11 = vsmask.f32 1280 }
 0x258   : > { %v7347_v47 = vpop.f32.mrb[0].mxu0 }
 0x259   : > { %v1984_v51 = vsel %vm7336_vm8, %v7347_v47, 0.0  ;;  %v5460_v52 = vpop.f32.mrb[1].mxu0 }
 0x25a   : > { %v7361_v56 = vpop.f32.mrb[2].mxu0  ;;  %v2009_v7 = vmul.f32 %v1984_v51, %v1984_v51 }
 0x25b   : > { %v1985_v1 = vsel %vm7349_vm12, %v7361_v56, 0.0  ;;  %v5461_v3 = vpop.f32.mrb[3].mxu0 }
 0x25c   : > { %v1994_v8 = vadd.f32 %v1985_v1, %v1984_v51  ;;  %v2010_v9 = vmul.f32 %v1985_v1, %v1985_v1 }
 0x25e   : > { %v2019_v12 = vadd.f32 %v2010_v9, %v2009_v7  ;;  %v425_v7 = vadd.s32 10, %v373_v50 }
 0x260   : > { %v7383_v62 = vpop.f32.mrb[4].mxu0  ;;  %v435_v61 = vsel %vm7456_vm3, %v425_v7, %v373_v50  ;;  %vm8232_vm3 = vcmask 1040384  }
 0x261   : > { %v1986_v2 = vsel %vm7379_vm9, %v7383_v62, 0.0  ;;  %v5464_v18 = vpop.f32.mrb[5].mxu0  ;;  %vm7470_vm14 = vcmp.lt.s32.totalorder %v435_v61, 8  ;;  %v6415_v61 = vld [vmem:[#allocation3 + $0x40] sm:$0xff]  }
 0x262   : > { %v1995_v21 = vadd.f32 %v1994_v8, %v1986_v2  ;;  %v2011_v23 = vmul.f32 %v1986_v2, %v1986_v2  ;;  %v7398_v25 = vpop.f32.mrb[6].mxu0 }
 0x263   : > { %v1987_v28 = vsel %vm7385_vm6, %v7398_v25, 0.0  ;;  %v5465_v22 = vpop.f32.mrb[7].mxu0 }
 0x264   : > { %v2020_v30 = vadd.f32 %v2019_v12, %v2011_v23  ;;  %v1996_v32 = vadd.f32 %v1995_v21, %v1987_v28  ;;  %v2012_v31 = vmul.f32 %v1987_v28, %v1987_v28  ;;  %v426_v12 = vadd.s32 10, %v384_v60 }
 0x266   : > { %v2021_v36 = vadd.f32 %v2020_v30, %v2012_v31  ;;  %v436_v23 = vsel %vm416_vm13, %v426_v12, %v384_v60  ;;  %vm7522_vm13 = vmand %vm448_vm15, %vm8235_vm11  ;;  %vm454_vm15 = vcmask 1043457   ;;  %vm8244_vm11 = vcmask 392192  }
 0x267   : > { %vm7476_vm1 = vcmp.lt.s32.totalorder %v436_v23, 8 }
 0x268   : > { %v7418_v39 = vpop.f32.mrb[8].mxu0  ;;  %v8297_v29 = vsel %vm7476_vm1, 4294967295, %v8296_v29 }
 0x269   : > { %v1988_v44 = vsel %vm7414_vm10, %v7418_v39, 0.0  ;;  %v5468_v45 = vpop.f32.mrb[9].mxu0 }
 0x26a   : > { %v1997_v51 = vadd.f32 %v1996_v32, %v1988_v44  ;;  %v2013_v52 = vmul.f32 %v1988_v44, %v1988_v44  ;;  %v7432_v53 = vpop.f32.mrb[10].mxu0 }
 0x26b   : > { %v1989_v55 = vsel %vm7420_vm7, %v7432_v53, 0.0  ;;  %v5469_v57 = vpop.f32.mrb[11].mxu0 }
 0x26c   : > { %v2022_v1 = vadd.f32 %v2021_v36, %v2013_v52  ;;  %v1998_v41 = vadd.f32 %v1997_v51, %v1989_v55  ;;  %v2014_v3 = vmul.f32 %v1989_v55, %v1989_v55 }
 0x26e   : > { %v2023_v5 = vadd.f32 %v2022_v1, %v2014_v3 }
 0x270   : > { %v7450_v8 = vpop.f32.mrb[12].mxu0 }
 0x271   : > { %v1990_v10 = vsel %vm7446_vm5, %v7450_v8, 0.0  ;;  %v5472_v11 = vpop.f32.mrb[13].mxu0 }
 0x272   : > { %v1999_v14 = vadd.f32 %v1998_v41, %v1990_v10  ;;  %v2015_v15 = vmul.f32 %v1990_v10, %v1990_v10  ;;  %v7463_v17 = vpop.f32.mrb[14].mxu0 }
 0x273   : > { %v1991_v2 = vsel %vm7452_vm4, %v7463_v17, 0.0  ;;  %v5473_v18 = vpop.f32.mrb[15].mxu0 }
 0x274   : > { %v2024_v63 = vadd.f32 %v2023_v5, %v2015_v15  ;;  %v2000_v20 = vadd.f32 %v1999_v14, %v1991_v2  ;;  %v2016_v21 = vmul.f32 %v1991_v2, %v1991_v2 }
 0x276   : > { %v2025_v26 = vadd.f32 %v2024_v63, %v2016_v21  ;;  %v6416_v63 = vld [vmem:[#allocation3 + $0x48] sm:$0xff]  }
 0x277   : > { %v451_v21 = vld [vmem:[#allocation2 + $0x4] sm:$0x3] }
 0x278   : > { %v7474_v22 = vpop.f32.mrb[16].mxu0  ;;  %v452_v23 = vsel %vm7522_vm13, 0, %v451_v21 }
 0x279   : > { %v1992_v24 = vsel %vm7470_vm14, %v7474_v22, 0.0  ;;  %v5476_v27 = vpop.f32.mrb[17].mxu0  ;;  %453 = vst [vmem:[#allocation2 + $0x4] sm:$0x3] %v452_v23 }
 0x27a   : > { %v2001_v30 = vadd.f32 %v2000_v20, %v1992_v24  ;;  %v2017_v32 = vmul.f32 %v1992_v24, %v1992_v24  ;;  %v7483_v31 = vpop.f32.mrb[18].mxu0  ;;  %v8298_v20 = vmov 0  ;;  %v6633_v24 = vmov 0   ;;  %v6418_v27 = vld [vmem:[#allocation3 + $0x58] sm:$0xff]  }
 0x27b   : > { %v1993_v33 = vsel %vm7476_vm1, %v7483_v31, 0.0  ;;  %v5477_v34 = vpop.f32.mrb[19].mxu0  ;;  %v8299_v20 = vsel %vm7522_vm13, 4294967295, %v8298_v20  ;;  %447 = vst [vmem:[#allocation2] sm:$0xf] %v6633_v24  ;;  %vm8242_vm13 = vcmask 785408  }
 0x27c   : > { %v2026_v36 = vadd.f32 %v2025_v26, %v2017_v32  ;;  %v2002_v38 = vadd.f32 %v2001_v30, %v1993_v33  ;;  %v2018_v19 = vmul.f32 %v1993_v33, %v1993_v33  ;;  %v6417_v26 = vld [vmem:[#allocation3 + $0x50] sm:$0xff]   ;;  %460 = vst [vmem:[#allocation2 + $0x30] sm:$0xf] %v6633_v24  ;;  %v6419_v30 = vld [vmem:[#allocation3 + $0x60] sm:$0xff]   ;;  %v6420_v32 = vld [vmem:[#allocation3 + $0x68] sm:$0xff]   ;;  %v8300_v33 = vmov 0 }
 0x27d   : > { %v6421_v34 = vld [vmem:[#allocation3 + $0x70] sm:$0xff]   ;;  %vm8302_vm1 = vcmask 523264  }
 0x27e   : > { %v2003_v43 = vrot.slane %v2002_v38, 4  ;;  %v2027_v44 = vadd.f32 %v2026_v36, %v2018_v19  ;;  %v457_v36 = vld [vmem:[#allocation2 + $0x2c] sm:$0xe]  ;;  %v6422_v19 = vld [vmem:[#allocation3 + $0x78] sm:$0xff]  }
 0x280   : > { %v2004_v45 = vadd.f32 %v2003_v43, %v2002_v38  ;;  %v2028_v49 = vrot.slane %v2027_v44, 4 }
 0x282   : > { %v2005_v50 = vrot.slane %v2004_v45, 2  ;;  %v2029_v51 = vadd.f32 %v2028_v49, %v2027_v44 }
 0x284   : > { %v2006_v52 = vadd.f32 %v2005_v50, %v2004_v45  ;;  %v2030_v54 = vrot.slane %v2029_v51, 2 }
 0x286   : > { %v2007_v55 = vrot.slane %v2006_v52, 1  ;;  %v2031_v57 = vadd.f32 %v2030_v54, %v2029_v51 }
 0x288   : > { %v2032_v59 = vrot.slane %v2031_v57, 1  ;;  %v2008_v60 = vadd.f32 %v2007_v55, %v2006_v52 }
 0x28a   : > { %v2033_v1 = vadd.f32 %v2032_v59, %v2031_v57 }
 0x28c   : > { %v2035_v41 = vsel %vm8232_vm3, %v2008_v60, %v2033_v1  ;;  %vm455_vm3 = vsmask.f32 7942 }
 0x28d   : > { %5511 = vmatmul.mubr.f32.vlgmr.msra.gmra.mrb[0].mxu1 %v2035_v41 }
 0x28e   : > { %5529 = vmatprep.mubr.msk.bf16.mxu1 %vm8233_vm0, %v6623_v0  ;;  %5514 = vmatpush3.bf16.msra.mxu1 %v6415_v61  ;;  %vm7536_vm0 = vmand %vm454_vm15, %vm455_vm3  ;;  %vm8246_vm3 = vcmask 130048   ;;  %vm8245_vm15 = vcmask 261120  }
 0x28f   : > { %5515 = vmatprep.subr.bf16.mxu1 %v6623_v0  ;;  %v8301_v33 = vsel %vm7536_vm0, 4294967295, %v8300_v33  ;;  %v458_v38 = vsel %vm7536_vm0, 0, %v457_v36  ;;  %vm8241_vm0 = vcmask 916480  }
 0x290   : > { %459 = vst [vmem:[#allocation2 + $0x2c] sm:$0xe] %v458_v38 }
 0x292   : > { %5516 = vmatpush3.bf16.msra.mxu1 %v6416_v63  ;;  %v2216_v63 = vsub.s32 0, %v7274_v58 }
 0x293   : > { %5517 = vmatprep.subr.bf16.mxu1 %v6623_v0 }
 0x296   : > { %5518 = vmatpush3.bf16.msra.mxu1 %v6417_v26 }
 0x297   : > { %5519 = vmatprep.subr.bf16.mxu1 %v6623_v0 }
 0x29a   : > { %5520 = vmatpush3.bf16.msra.mxu1 %v6418_v27 }
 0x29b   : > { %5521 = vmatprep.subr.bf16.mxu1 %v6623_v0 }
 0x29e   : > { %5522 = vmatpush3.bf16.msra.mxu1 %v6419_v30 }
 0x29f   : > { %5523 = vmatprep.subr.bf16.mxu1 %v6623_v0 }
 0x2a2   : > { %5524 = vmatpush3.bf16.msra.mxu1 %v6420_v32 }
 0x2a3   : > { %5525 = vmatprep.subr.bf16.mxu1 %v6623_v0 }
 0x2a6   : > { %5526 = vmatpush3.bf16.msra.mxu1 %v6421_v34 }
 0x2a7   : > { %5527 = vmatprep.subr.bf16.mxu1 %v6623_v0 }
 0x2aa   : > { %5528 = vmatpush3.bf16.msra.mxu1 %v6422_v19 }
 0x2ab   : > { %5549 = vmatprep.subr.bf16.mxu1 %v6623_v0 }
 0x360   : > { %v2118_v3 = vpop.f32.mrb[0].mxu1 }
 0x361   : > { %v2123_v4 = vmul.f32 0.001953125, %v2118_v3  ;;  %v5512_v5 = vpop.f32.mrb[1].mxu1 }
 0x363   : > { %v2124_v7 = vmul.f32 %v2123_v4, %v2123_v4  ;;  %v2167_v15 = vsub.f32 0.0, %v2123_v4 }
 0x365   : > { %v2126_v9 = vrot.slane %v2124_v7, 7 }
 0x367   : > { %v2128_v10 = vsub.f32 %v2123_v4, %v2126_v9  ;;  %v2202_v4 = vsub.s32 1, %v7274_v58 }
 0x369   : > { %v2129_v11 = vmax.f32 %v2128_v10, 0.0 }
 0x36b   : > { %v2130_v12 = vadd.f32 1e-05, %v2129_v11 }
 0x36d   : > { %6520 = vrsqrt.f32 %v2130_v12 }
 0x377   : > { %v7491_v14 = vpop.eup %6520 }
 0x378   : > { %v2168_v2 = vrot.slane %v7491_v14, 1  ;;  %2139 = vrot.lane.b32.xlu1 %v7491_v14, %s6626_s26  ;;  %2133 = vrot.lane.b32.xlu0 %v7491_v14, %s6627_s28 }
 0x37a   : > { %v7498_v18 = vmul.f32 %v2168_v2, %v2167_v15 }
 0x37c   : > { %2136 = vrot.lane.b32.xlu0 %v7491_v14, %s6628_s29  ;;  %2172 = vrot.lane.b32.xlu1 %v7498_v18, %s6627_s28 }
 0x380   : > { %2142 = vrot.lane.b32.xlu0 %v7491_v14, %s6629_s10  ;;  %2175 = vrot.lane.b32.xlu1 %v7498_v18, %s6628_s29 }
 0x384   : > { %2145 = vrot.lane.b32.xlu0 %v7491_v14, %s8251_s11  ;;  %2178 = vrot.lane.b32.xlu1 %v7498_v18, %s6626_s26 }
 0x388   : > { %2148 = vrot.lane.b32.xlu0 %v7491_v14, %s8249_s9  ;;  %2181 = vrot.lane.b32.xlu1 %v7498_v18, %s6629_s10 }
 0x38c   : > { %2151 = vrot.lane.b32.xlu0 %v7491_v14, %s8247_s12  ;;  %2184 = vrot.lane.b32.xlu1 %v7498_v18, %s8251_s11 }
 0x390   : > { %2187 = vrot.lane.b32.xlu0 %v7498_v18, %s8249_s9  ;;  %2190 = vrot.lane.b32.xlu1 %v7498_v18, %s8247_s12  ;;  %s6634_s9 = smov [#allocation6]  }
 0x3ea   : > { %v2140_v43 = vpop.permute.xlu1 %2139  ;;  %v2134_v44 = vpop.permute.xlu0 %2133 }
 0x3eb   : > { %v2155_v55 = vsel %vm8246_vm3, %v7491_v14, %v2134_v44 }
 0x3ee   : > { %v2137_v45 = vpop.permute.xlu0 %2136  ;;  %v2173_v49 = vpop.permute.xlu1 %2172 }
 0x3ef   : > { %v2157_v57 = vsel %vm8245_vm15, %v2155_v55, %v2137_v45  ;;  %v2193_v10 = vsel %vm8246_vm3, %v7498_v18, %v2173_v49 }
 0x3f0   : > { %v2159_v1 = vsel %vm8244_vm11, %v2157_v57, %v2140_v43 }
 0x3f2   : > { %v2143_v50 = vpop.permute.xlu0 %2142  ;;  %v2176_v51 = vpop.permute.xlu1 %2175 }
 0x3f3   : > { %v2160_v41 = vsel %vm8302_vm1, %v2159_v1, %v2143_v50  ;;  %v2194_v12 = vsel %vm8245_vm15, %v2193_v10, %v2176_v51 }
 0x3f6   : > { %v2146_v52 = vpop.permute.xlu0 %2145  ;;  %v2179_v54 = vpop.permute.xlu1 %2178 }
 0x3f7   : > { %v2162_v3 = vsel %vm8243_vm2, %v2160_v41, %v2146_v52  ;;  %v2195_v14 = vsel %vm8244_vm11, %v2194_v12, %v2179_v54 }
 0x3fa   : > { %v2149_v59 = vpop.permute.xlu0 %2148  ;;  %v2182_v60 = vpop.permute.xlu1 %2181 }
 0x3fb   : > { %v2164_v5 = vsel %vm8242_vm13, %v2162_v3, %v2149_v59  ;;  %v2196_v2 = vsel %vm8302_vm1, %v2195_v14, %v2182_v60  ;;  %vm2278_vm1 = vsmask.f32 5392 }
 0x3fe   : > { %v2152_v7 = vpop.permute.xlu0 %2151  ;;  %v2185_v9 = vpop.permute.xlu1 %2184 }
 0x3ff   : > { %v2166_v11 = vsel %vm8241_vm0, %v2164_v5, %v2152_v7  ;;  %v2197_v23 = vsel %vm8243_vm2, %v2196_v2, %v2185_v9  ;;  %vm8306_vm2 = vnez %v8301_v33 }
 0x400   : > { %v2203_v15 = vrot.slane %v2166_v11, %v2202_v4 }
 0x402   : > { %v2188_v61 = vpop.permute.xlu0 %2187  ;;  %v2191_v21 = vpop.permute.xlu1 %2190  ;;  %v2204_v18 = vmul.f32 %v2203_v15, %v7347_v47  ;;  %v2205_v24 = vmul.f32 %v2203_v15, %v7361_v56  ;;  %v2206_v27 = vmul.f32 %v2203_v15, %v7383_v62  ;;  %v2207_v32 = vmul.f32 %v2203_v15, %v7398_v25 }
 0x403   : > { %v2198_v26 = vsel %vm8242_vm13, %v2197_v23, %v2188_v61  ;;  %v2208_v34 = vmul.f32 %v2203_v15, %v7418_v39  ;;  %v2209_v36 = vmul.f32 %v2203_v15, %v7432_v53  ;;  %v2210_v19 = vmul.f32 %v2203_v15, %v7450_v8 }
 0x404   : > { %v2199_v30 = vsel %vm8241_vm0, %v2198_v26, %v2191_v21  ;;  %v2211_v43 = vmul.f32 %v2203_v15, %v7463_v17  ;;  %v2212_v47 = vmul.f32 %v2203_v15, %v7474_v22  ;;  %v2213_v56 = vmul.f32 %v2203_v15, %v7483_v31 }
 0x405   : > { %v2217_v38 = vrot.slane %v2199_v30, %v2216_v63  ;;  %vm8303_vm0 = vsmask.f32 1280 }
 0x406   : > { %vm7601_vm13 = vmor %vm8303_vm0, %vm2278_vm1  ;;  %vm8307_vm0 = vnez %v8297_v29  ;;  %vm8309_vm1 = vsmask.f32 7424 }
 0x407   : > { %v2218_v62 = vadd.f32 %v2217_v38, %v2204_v18  ;;  %v2219_v44 = vadd.f32 %v2217_v38, %v2205_v24  ;;  %v2220_v45 = vadd.f32 %v2217_v38, %v2206_v27  ;;  %v2221_v49 = vadd.f32 %v2217_v38, %v2207_v32 }
 0x408   : > { %v2222_v25 = vadd.f32 %v2217_v38, %v2208_v34  ;;  %v2223_v50 = vadd.f32 %v2217_v38, %v2209_v36  ;;  %v2224_v39 = vadd.f32 %v2217_v38, %v2210_v19  ;;  %v2225_v51 = vadd.f32 %v2217_v38, %v2211_v43 }
 0x409   : > { %v2226_v53 = vadd.f32 %v2217_v38, %v2212_v47  ;;  %v7577_v52 = vadd.f32 %v2217_v38, %v2213_v56  ;;  %v2228_v54 = vmax.f32 %v2218_v62, 0.0  ;;  %v2229_v55 = vmax.f32 %v2219_v44, 0.0 }
 0x40a   : > { %v2230_v8 = vmax.f32 %v2220_v45, 0.0  ;;  %v2231_v57 = vmax.f32 %v2221_v49, 0.0  ;;  %v2232_v17 = vmax.f32 %v2222_v25, 0.0  ;;  %v2233_v59 = vmax.f32 %v2223_v50, 0.0  ;;  %v2390_v25 = vld [vmem:[#allocation2 + $0x4] sm:$0xe] }
 0x40b   : > { %v2234_v22 = vmax.f32 %v2224_v39, 0.0  ;;  %v2235_v31 = vmax.f32 %v2225_v51, 0.0  ;;  %v2236_v60 = vmax.f32 %v2226_v53, 0.0  ;;  %v2238_v1 = vsel %vm7336_vm8, %v2228_v54, 0.0 }
 0x40c   : > { %v2239_v41 = vsel %vm7349_vm12, %v2229_v55, 0.0  ;;  %v2240_v3 = vsel %vm7379_vm9, %v2230_v8, 0.0  ;;  %v2241_v5 = vsel %vm7385_vm6, %v2231_v57, 0.0  ;;  %v2242_v7 = vsel %vm7414_vm10, %v2232_v17, 0.0 }
 0x40d   : > { %v2243_v9 = vsel %vm7420_vm7, %v2233_v59, 0.0  ;;  %v2244_v10 = vsel %vm7446_vm5, %v2234_v22, 0.0  ;;  %v2245_v11 = vsel %vm7452_vm4, %v2235_v31, 0.0  ;;  %v2246_v12 = vsel %vm7470_vm14, %v2236_v60, 0.0 }
 0x40e   : > { %v4975_v14 = vpack.c.bf16 %v2238_v1, %v2238_v1  ;;  %v4976_v15 = vpack.c.bf16 %v2239_v41, %v2239_v41  ;;  %v4977_v2 = vpack.c.bf16 %v2240_v3, %v2240_v3  ;;  %v4978_v61 = vpack.c.bf16 %v2241_v5, %v2241_v5 }
 0x40f   : > { %v4979_v21 = vpack.c.bf16 %v2242_v7, %v2242_v7  ;;  %v4980_v23 = vpack.c.bf16 %v2243_v9, %v2243_v9  ;;  %v4981_v26 = vpack.c.bf16 %v2244_v10, %v2244_v10  ;;  %v4982_v18 = vpack.c.bf16 %v2245_v11, %v2245_v11 }
 0x410   : > { %v7597_v24 = vpack.c.bf16 %v2246_v12, %v2246_v12  ;;  %v2281_v27 = vshrl.u32 %v4975_v14, 16  ;;  %v2284_v30 = vshll.u32 %v4975_v14, 16  ;;  %v2290_v32 = vshrl.u32 %v4976_v15, 16 }
 0x411   : > { %v2293_v34 = vshll.u32 %v4976_v15, 16  ;;  %v2300_v36 = vshrl.u32 %v4977_v2, 16  ;;  %v2303_v38 = vshll.u32 %v4977_v2, 16  ;;  %v2310_v19 = vshrl.u32 %v4978_v61, 16 }
 0x412   : > { %v2283_v43 = vrot.slane %v2281_v27, 6  ;;  %v2286_v47 = vrot.slane %v2284_v30, 7  ;;  %v2292_v56 = vrot.slane %v2290_v32, 6  ;;  %v2313_v62 = vshll.u32 %v4978_v61, 16 }
 0x413   : > { %v2295_v44 = vrot.slane %v2293_v34, 7  ;;  %v2302_v45 = vrot.slane %v2300_v36, 6  ;;  %v2305_v49 = vrot.slane %v2303_v38, 7  ;;  %v2312_v50 = vrot.slane %v2310_v19, 6  ;;  %v2405_v38 = vld [vmem:[#allocation2] sm:$0xf] }
 0x414   : > { %v2287_v39 = vor.u32 %v2286_v47, %v2283_v43  ;;  %v2315_v51 = vrot.slane %v2313_v62, 7  ;;  %v2320_v53 = vshrl.u32 %v4979_v21, 16  ;;  %v2323_v54 = vshll.u32 %v4979_v21, 16 }
 0x415   : > { %v2296_v8 = vor.u32 %v2295_v44, %v2292_v56  ;;  %v2306_v57 = vor.u32 %v2305_v49, %v2302_v45  ;;  %v2330_v17 = vshrl.u32 %v4980_v23, 16  ;;  %v2333_v59 = vshll.u32 %v4980_v23, 16  ;;  %v2773_v45 = vld [vmem:[#allocation2] sm:$0xe] }
 0x416   : > { %v2288_v22 = vrot.slane %v2287_v39, 4  ;;  %v2391_v31 = vsel %vm8306_vm2, %v2287_v39, %v2390_v25  ;;  %v2316_v60 = vor.u32 %v2315_v51, %v2312_v50  ;;  %v2322_v1 = vrot.slane %v2320_v53, 6 }
 0x417   : > { %v2298_v41 = vrot.slane %v2296_v8, 4  ;;  %2392 = vst [vmem:[#allocation2 + $0x4] sm:$0xe] %v2391_v31  ;;  %v2308_v3 = vrot.slane %v2306_v57, 4  ;;  %v2325_v5 = vrot.slane %v2323_v54, 7  ;;  %v2332_v7 = vrot.slane %v2330_v17, 6 }
 0x418   : > { %v2297_v9 = vsel %vm7601_vm13, %v2288_v22, %v2296_v8  ;;  %v2318_v10 = vrot.slane %v2316_v60, 4  ;;  %v2335_v11 = vrot.slane %v2333_v59, 7  ;;  %v2340_v12 = vshrl.u32 %v4981_v26, 16 }
 0x419   : > { %v2307_v14 = vsel %vm7601_vm13, %v2298_v41, %v2306_v57  ;;  %2393 = vst [vmem:[#allocation2 + $0x8] sm:$0xf] %v2297_v9  ;;  %v2317_v33 = vsel %vm7601_vm13, %v2308_v3, %v2316_v60  ;;  %v2326_v15 = vor.u32 %v2325_v5, %v2322_v1  ;;  %v2343_v2 = vshll.u32 %v4981_v26, 16 }
 0x41a   : > { %2394 = vst [vmem:[#allocation2 + $0xc] sm:$0xf] %v2307_v14  ;;  %2395 = vst [vmem:[#allocation2 + $0x10] sm:$0xf] %v2317_v33  ;;  %v2336_v61 = vor.u32 %v2335_v11, %v2332_v7  ;;  %v2342_v21 = vrot.slane %v2340_v12, 6  ;;  %v2350_v23 = vshrl.u32 %v4982_v18, 16 }
 0x41b   : > { %v2353_v27 = vshll.u32 %v4982_v18, 16  ;;  %v2327_v30 = vsel %vm7601_vm13, %v2318_v10, %v2326_v15  ;;  %v2328_v32 = vrot.slane %v2326_v15, 4  ;;  %v2345_v34 = vrot.slane %v2343_v2, 7  ;;  %v6425_v2 = vld [vmem:[#allocation3] sm:$0xff]  }
 0x41c   : > { %v2360_v36 = vshrl.u32 %v7597_v24, 16  ;;  %2396 = vst [vmem:[#allocation2 + $0x14] sm:$0xf] %v2327_v30  ;;  %v2338_v19 = vrot.slane %v2336_v61, 4  ;;  %v2352_v43 = vrot.slane %v2350_v23, 6  ;;  %v2363_v26 = vshll.u32 %v7597_v24, 16 }
 0x41d   : > { %v2355_v47 = vrot.slane %v2353_v27, 7  ;;  %v2337_v56 = vsel %vm7601_vm13, %v2328_v32, %v2336_v61  ;;  %v2346_v62 = vor.u32 %v2345_v34, %v2342_v21  ;;  %v2237_v18 = vmax.f32 %v7577_v52, 0.0  ;;  %v2402_v32 = vld [vmem:[#allocation2 + $0x2c] sm:$0x3]  ;;  %v6426_v34 = vld [vmem:[#allocation3 + $0x8] sm:$0xff]  }
 0x41e   : > { %v2362_v44 = vrot.slane %v2360_v36, 6  ;;  %v2406_v49 = vld [vmem:[#allocation2 + $0x4] sm:$0xf]  ;;  %2397 = vst [vmem:[#allocation2 + $0x18] sm:$0xf] %v2337_v56  ;;  %v2365_v50 = vrot.slane %v2363_v26, 7 }
 0x41f   : > { %v2356_v25 = vor.u32 %v2355_v47, %v2352_v43  ;;  %v7620_v39 = vcombine.low %v2405_v38, %v2406_v49  ;;  %v2347_v51 = vsel %vm7601_vm13, %v2338_v19, %v2346_v62  ;;  %v2348_v53 = vrot.slane %v2346_v62, 4 }
 0x420   : > { %v2247_v24 = vsel %vm8307_vm0, %v2237_v18, 0.0  ;;  %2398 = vst [vmem:[#allocation2 + $0x1c] sm:$0xf] %v2347_v51  ;;  %v2366_v8 = vor.u32 %v2365_v50, %v2362_v44  ;;  %v4883_v17 = vcombine.low %v2773_v45, %v2406_v49  ;;  %vm8308_vm2 = vcmask 1046528   ;;  %v6428_v18 = vld [vmem:[#allocation3 + $0x10] sm:$0xff]   ;;  %v6430_v49 = vld [vmem:[#allocation3 + $0x18] sm:$0xff]  }
 0x421   : > { %v2358_v54 = vrot.slane %v2356_v25, 4  ;;  %v4984_v57 = vpack.c.bf16 %v2247_v24, %v2247_v24  ;;  %v7626_v52 = vld [vmem:[#allocation2 + $0x8] sm:$0xff]   ;;  %v2480_v59 = vshll.u32 %v7620_v39, 16  ;;  %v2357_v22 = vsel %vm7601_vm13, %v2348_v53, %v2356_v25  ;;  %vm8310_vm11 = vmmov %vm8308_vm2  ;;  %v3354_v24 = vld [vmem:[#allocation2 + $0x4] sm:$0xc] }
 0x422   : > { %v2478_v31 = vshrl.u32 %v7620_v39, 16  ;;  %2399 = vst [vmem:[#allocation2 + $0x20] sm:$0xf] %v2357_v22  ;;  %v2485_v5 = vshll.u32 %v7626_v52, 16  ;;  %v2368_v9 = vrot.slane %v2366_v8, 4  ;;  %v2794_v12 = vrot.slane %v4883_v17, 1 }
 0x423   : > { %v2367_v60 = vsel %vm7601_vm13, %v2358_v54, %v2366_v8  ;;  %v2370_v1 = vshrl.u32 %v4984_v57, 16  ;;  %v2373_v41 = vshll.u32 %v4984_v57, 16  ;;  %v2482_v3 = vrot.slane %v2480_v59, 1  ;;  %v7635_v7 = vld [vmem:[#allocation2 + $0x10] sm:$0xff]   ;;  %v7669_v50 = vld [vmem:[#allocation2 + $0x8] sm:$0xf] }
 0x424   : > { %2400 = vst [vmem:[#allocation2 + $0x24] sm:$0xf] %v2367_v60  ;;  %v2795_v14 = vrot.slane %v7626_v52, 1  ;;  %v2487_v15 = vrot.slane %v2485_v5, 1  ;;  %v2797_v23 = vrot.slane %v7635_v7, 1  ;;  %v2489_v43 = vshrl.u32 %v7626_v52, 16 }
 0x425   : > { %v2372_v10 = vrot.slane %v2370_v1, 6  ;;  %v2375_v11 = vrot.slane %v2373_v41, 7  ;;  %v2483_v33 = vor.u32 %v2482_v3, %v2478_v31  ;;  %v2493_v47 = vshll.u32 %v7635_v7, 16  ;;  %v7672_v53 = vld [vmem:[#allocation2 + $0xc] sm:$0xff]   ;;  %v7674_v54 = vld [vmem:[#allocation2 + $0x14] sm:$0xff]  }
 0x426   : > { %v7639_v21 = vsel %vm8308_vm2, %v2794_v12, %v2795_v14  ;;  %v7648_v19 = vsel %vm8310_vm11, %v2795_v14, %v2797_v23  ;;  %vm8311_vm2 = vmmov 0   ;;  %v2491_v56 = vor.u32 %v2489_v43, %v2487_v15  ;;  %v6431_v17 = vld [vmem:[#allocation3 + $0x20] sm:$0xff]  }
 0x427   : > { %v2376_v61 = vor.u32 %v2375_v11, %v2372_v10  ;;  %v2488_v27 = vsel %vm8309_vm1, %v2483_v33, %v2487_v15  ;;  %v7643_v30 = vld [vmem:[#allocation2 + $0x18] sm:$0xff]   ;;  %vm8312_vm1 = vnez %v8299_v20  ;;  %v2495_v44 = vrot.slane %v2493_v47, 1  ;;  %v6433_v10 = vld [vmem:[#allocation3 + $0x28] sm:$0xff]  }
 0x428   : > { %5530 = vmatmul.mubr.bf16.vlgmr.msra.gmra.mrb[4].mxu1 %v2488_v27  ;;  %v2799_v26 = vrot.slane %v7643_v30, 1  ;;  %v2497_v20 = vshrl.u32 %v7635_v7, 16  ;;  %v2501_v25 = vshll.u32 %v7643_v30, 16  ;;  %v4915_v8 = vcombine.low %v3354_v24, %v7669_v50  ;;  %v6434_v27 = vld [vmem:[#allocation3 + $0x30] sm:$0xff]  }
 0x429   : > { %v2377_v36 = vsel %vm7601_vm13, %v2368_v9, %v2376_v61  ;;  %v2378_v38 = vrot.slane %v2376_v61, 4  ;;  %5550 = vmatpush3.bf16.msra.mxu1 %v6425_v2  ;;  %5533 = vmatprep.mubr.msk.bf16.mxu1 %vm8311_vm2, %v6623_v0  ;;  %vm8313_vm13 = vsmask.f32 7424  ;;  %v7679_v22 = vld [vmem:[#allocation2 + $0x1c] sm:$0xff]   ;;  %v3376_v41 = vrot.slane %v7672_v53, 2 }
 0x42a   : > { %2401 = vst [vmem:[#allocation2 + $0x28] sm:$0xf] %v2377_v36  ;;  %5551 = vmatprep.subr.bf16.mxu1 %v6623_v0  ;;  %v7661_v62 = vsel %vm8310_vm11, %v2797_v23, %v2799_v26  ;;  %v2496_v45 = vsel %vm8313_vm13, %v2491_v56, %v2495_v44  ;;  %v2499_v51 = vor.u32 %v2497_v20, %v2495_v44  ;;  %v2503_v57 = vrot.slane %v2501_v25, 1  ;;  %v6436_v36 = vld [vmem:[#allocation3 + $0x38] sm:$0xff]   ;;  %v3935_v56 = vld [vmem:[#allocation2 + $0x8] sm:$0x8] }
 0x42b   : > { %v2403_v55 = vsel %vm8312_vm1, %v2378_v38, %v2402_v32  ;;  %v7677_v59 = vld [vmem:[#allocation2 + $0x20] sm:$0xff]   ;;  %vm8314_vm1 = vmmov %vm8313_vm13  ;;  %v3375_v1 = vrot.slane %v4915_v8, 2  ;;  %v3378_v3 = vrot.slane %v7674_v54, 2  ;;  %v2505_v5 = vshrl.u32 %v7643_v30, 16  ;;  %v7712_v38 = vld [vmem:[#allocation2 + $0x10] sm:$0xff]  }
 0x42c   : > { %2404 = vst [vmem:[#allocation2 + $0x2c] sm:$0x3] %v2403_v55  ;;  %v2504_v60 = vsel %vm8314_vm1, %v2499_v51, %v2503_v57  ;;  %v2509_v9 = vshll.u32 %v7677_v59, 16  ;;  %v3380_v11 = vrot.slane %v7679_v22, 2  ;;  %vm8315_vm11 = vcmask 1045504   ;;  %v7721_v44 = vld [vmem:[#allocation2 + $0x18] sm:$0xff]  }
 0x42d   : > { %5552 = vmatpush3.bf16.msra.mxu1 %v6426_v34  ;;  %v7694_v12 = vsel %vm8315_vm11, %v3375_v1, %v3376_v41  ;;  %vm8316_vm13 = vmmov %vm8315_vm11  ;;  %v2507_v15 = vor.u32 %v2505_v5, %v2503_v57  ;;  %v2513_v43 = vshrl.u32 %v7677_v59, 16  ;;  %v7718_v55 = vld [vmem:[#allocation2 + $0xc] sm:$0xf]  ;;  %v3957_v51 = vrot.slane %v7712_v38, 3 }
 0x42e   : > { %5553 = vmatprep.subr.bf16.mxu1 %v6623_v0  ;;  %v7697_v14 = vsel %vm8316_vm13, %v3376_v41, %v3378_v3  ;;  %vm8317_vm1 = vmmov %vm8315_vm11  ;;  %v2511_v23 = vrot.slane %v2509_v9, 1  ;;  %vm8319_vm11 = vsmask.f32 7424  ;;  %v4947_v20 = vcombine.low %v3935_v56, %v7718_v55  ;;  %v6437_v9 = vld [vmem:[#allocation3 + $0x80] sm:$0xff]   ;;  %v6452_v56 = vld [vmem:[#allocation3 + $0xf0] sm:$0xff]  }
 0x42f   : > { %v7701_v2 = vsel %vm8317_vm1, %v3378_v3, %v3380_v11  ;;  %vm8318_vm15 = vmmov %vm8317_vm1  ;;  %v3959_v8 = vrot.slane %v7721_v44, 3  ;;  %vm8321_vm13 = vcmask 1044480  }
 0x430   : > { %5534 = vmatmul.mubr.bf16.gmra.mrb[8].mxu1 %v2496_v45  ;;  %v2512_v34 = vsel %vm8319_vm11, %v2507_v15, %v2511_v23  ;;  %v2515_v45 = vor.u32 %v2513_v43, %v2511_v23  ;;  %v3956_v24 = vrot.slane %v4947_v20, 3  ;;  %vm8322_vm1 = vmmov %vm8321_vm13  ;;  %v6440_v15 = vld [vmem:[#allocation3 + $0x98] sm:$0xff]   ;;  %v6442_v23 = vld [vmem:[#allocation3 + $0xa8] sm:$0xff]  }
 0x431   : > { %5554 = vmatpush3.bf16.msra.mxu1 %v6428_v18  ;;  %5537 = vmatprep.mubr.msk.bf16.mxu1 %vm8311_vm2, %v6623_v0  ;;  %v7682_v31 = vld [vmem:[#allocation2 + $0x24] sm:$0xff]   ;;  %v7738_v41 = vsel %vm8322_vm1, %v3957_v51, %v3959_v8  ;;  %vm8324_vm3 = vmmov %vm8322_vm1  ;;  %v6449_v43 = vld [vmem:[#allocation3 + $0xd8] sm:$0xff]  }
 0x432   : > { %5555 = vmatprep.subr.bf16.mxu1 %v6623_v0  ;;  %v3382_v33 = vrot.slane %v7682_v31, 2  ;;  %v7708_v32 = vld [vmem:[#allocation2 + $0x28] ss:$0 sps:$4 sm:$0x11]   ;;  %v7723_v18 = vld [vmem:[#allocation2 + $0x20] sm:$0xff]   ;;  %v7735_v1 = vsel %vm8321_vm13, %v3956_v24, %v3957_v51  ;;  %v2998_v51 = vrot.slane %v7672_v53, 1 }
 0x433   : > { %v2517_v47 = vshll.u32 %v7708_v32, 16  ;;  %v3961_v57 = vrot.slane %v7723_v18, 3  ;;  %v2803_v20 = vrot.slane %v7708_v32, 1  ;;  %v6456_v24 = vld [vmem:[#allocation3 + $0x100] sm:$0xff]   ;;  %v6457_v32 = vld [vmem:[#allocation3 + $0x108] sm:$0xff]  }
 0x434   : > { %v7706_v61 = vsel %vm8318_vm15, %v3380_v11, %v3382_v33  ;;  %vm8320_vm15 = vmmov %vm8319_vm11  ;;  %v6439_v11 = vld [vmem:[#allocation3 + $0x90] sm:$0xff]  }
 0x435   : > { %5556 = vmatpush3.bf16.msra.mxu1 %v6430_v49  ;;  %v7725_v49 = vld [vmem:[#allocation2 + $0x28] sm:$0xff]   ;;  %v2519_v25 = vrot.slane %v2517_v47, 1  ;;  %vm8323_vm11 = vmmov %vm8322_vm1  ;;  %v6451_v47 = vld [vmem:[#allocation3 + $0xe8] sm:$0xff]  }
 0x436   : > { %5557 = vmatprep.subr.bf16.mxu1 %v6623_v0  ;;  %v7741_v3 = vsel %vm8323_vm11, %v3959_v8, %v3961_v57 }
 0x438   : > { %5538 = vmatmul.mubr.bf16.gmra.mrb[12].mxu1 %v2504_v60  ;;  %v3963_v60 = vrot.slane %v7725_v49, 3 }
 0x439   : > { %5558 = vmatpush3.bf16.msra.mxu1 %v6431_v17  ;;  %5541 = vmatprep.mubr.msk.bf16.mxu1 %vm8311_vm2, %v6623_v0  ;;  %v2520_v17 = vsel %vm8320_vm15, %v2515_v45, %v2519_v25 }
 0x43a   : > { %5559 = vmatprep.subr.bf16.mxu1 %v6623_v0  ;;  %v7748_v5 = vsel %vm8324_vm3, %v3961_v57, %v3963_v60  ;;  %vm8325_vm3 = vcmask 1046528   ;;  %v6459_v57 = vld [vmem:[#allocation3 + $0x110] sm:$0xff]  }
 0x43b   : > { %vm8326_vm15 = vmmov %vm8325_vm3 }
 0x43c   : > { %vm8327_vm13 = vmmov %vm8325_vm3 }
 0x43d   : > { %5560 = vmatpush3.bf16.msra.mxu1 %v6433_v10  ;;  %v6438_v10 = vld [vmem:[#allocation3 + $0x88] sm:$0xff]   ;;  %vm8328_vm1 = vmmov %vm8325_vm3 }
 0x43e   : > { %5561 = vmatprep.subr.bf16.mxu1 %v6623_v0  ;;  %vm8329_vm11 = vmmov %vm8328_vm1 }
 0x440   : > { %5542 = vmatmul.mubr.bf16.gmra.mrb[16].mxu1 %v2512_v34  ;;  %v6447_v34 = vld [vmem:[#allocation3 + $0xc8] sm:$0xff]  }
 0x441   : > { %5545 = vmatprep.mubr.msk.bf16.mxu1 %vm8311_vm2, %v6623_v0  ;;  %5562 = vmatpush3.bf16.msra.mxu1 %v6434_v27  ;;  %v6444_v27 = vld [vmem:[#allocation3 + $0xb8] sm:$0xff]  }
 0x442   : > { %5563 = vmatprep.subr.bf16.mxu1 %v6623_v0 }
 0x445   : > { %5564 = vmatpush3.bf16.msra.mxu1 %v6436_v36  ;;  %v6448_v36 = vld [vmem:[#allocation3 + $0xd0] sm:$0xff]  }
 0x446   : > { %5585 = vmatprep.subr.bf16.mxu1 %v6623_v0 }
 0x448   : > { %5546 = vmatmul.mubr.bf16.gmra.mrb[20].mxu1 %v2520_v17 }
 0x449   : > { %5565 = vmatprep.mubr.msk.bf16.mxu1 %vm8311_vm2, %v6623_v0 }
 0x450   : > { %5566 = vmatmul.mubr.bf16.vlgmr.msra.gmra.mrb[4].mxu1 %v7620_v39  ;;  %v6441_v39 = vld [vmem:[#allocation3 + $0xa0] sm:$0xff]  }
 0x451   : > { %5586 = vmatpush3.bf16.msra.mxu1 %v6437_v9  ;;  %5569 = vmatprep.mubr.msk.bf16.mxu1 %vm8311_vm2, %v6623_v0  ;;  %v6461_v9 = vld [vmem:[#allocation3 + $0x118] sm:$0xff]  }
 0x452   : > { %5587 = vmatprep.subr.bf16.mxu1 %v6623_v0 }
 0x455   : > { %5588 = vmatpush3.bf16.msra.mxu1 %v6438_v10  ;;  %v3002_v10 = vrot.slane %v7679_v22, 1 }
 0x456   : > { %5589 = vmatprep.subr.bf16.mxu1 %v6623_v0 }
 0x458   : > { %5570 = vmatmul.mubr.bf16.gmra.mrb[8].mxu1 %v7626_v52  ;;  %v6443_v52 = vld [vmem:[#allocation3 + $0xb0] sm:$0xff]  }
 0x459   : > { %5590 = vmatpush3.bf16.msra.mxu1 %v6439_v11  ;;  %5573 = vmatprep.mubr.msk.bf16.mxu1 %vm8311_vm2, %v6623_v0  ;;  %v6462_v11 = vld [vmem:[#allocation3 + $0x120] sm:$0xff]  }
 0x45a   : > { %5591 = vmatprep.subr.bf16.mxu1 %v6623_v0 }
 0x45d   : > { %5592 = vmatpush3.bf16.msra.mxu1 %v6440_v15 }
 0x45e   : > { %5593 = vmatprep.subr.bf16.mxu1 %v6623_v0 }
 0x460   : > { %5574 = vmatmul.mubr.bf16.gmra.mrb[12].mxu1 %v7635_v7  ;;  %v6446_v7 = vld [vmem:[#allocation3 + $0xc0] sm:$0xff]  }
 0x461   : > { %5594 = vmatpush3.bf16.msra.mxu1 %v6441_v39  ;;  %5577 = vmatprep.mubr.msk.bf16.mxu1 %vm8311_vm2, %v6623_v0  ;;  %v6464_v39 = vld [vmem:[#allocation3 + $0x128] sm:$0xff]  }
 0x462   : > { %5595 = vmatprep.subr.bf16.mxu1 %v6623_v0 }
 0x465   : > { %5596 = vmatpush3.bf16.msra.mxu1 %v6442_v23  ;;  %v3004_v23 = vrot.slane %v7682_v31, 1 }
 0x466   : > { %5597 = vmatprep.subr.bf16.mxu1 %v6623_v0 }
 0x468   : > { %5578 = vmatmul.mubr.bf16.gmra.mrb[16].mxu1 %v7643_v30 }
 0x469   : > { %5581 = vmatprep.mubr.msk.bf16.mxu1 %vm8311_vm2, %v6623_v0  ;;  %5598 = vmatpush3.bf16.msra.mxu1 %v6443_v52  ;;  %v6465_v52 = vld [vmem:[#allocation3 + $0x130] sm:$0xff]  }
 0x46a   : > { %5599 = vmatprep.subr.bf16.mxu1 %v6623_v0 }
 0x46d   : > { %5600 = vmatpush3.bf16.msra.mxu1 %v6444_v27 }
 0x46e   : > { %5621 = vmatprep.subr.bf16.mxu1 %v6623_v0 }
 0x470   : > { %5582 = vmatmul.mubr.bf16.gmra.mrb[20].mxu1 %v7677_v59 }
 0x471   : > { %5601 = vmatprep.mubr.msk.bf16.mxu1 %vm8311_vm2, %v6623_v0 }
 0x478   : > { %5602 = vmatmul.mubr.bf16.vlgmr.msra.gmra.mrb[4].mxu1 %v7639_v21  ;;  %v6450_v21 = vld [vmem:[#allocation3 + $0xe0] sm:$0xff]  }
 0x479   : > { %5622 = vmatpush3.bf16.msra.mxu1 %v6446_v7  ;;  %5605 = vmatprep.mubr.msk.bf16.mxu1 %vm8311_vm2, %v6623_v0  ;;  %v6466_v7 = vld [vmem:[#allocation2 + $0x2c] ss:$0 sps:$4 sm:$0x11]  }
 0x47a   : > { %5623 = vmatprep.subr.bf16.mxu1 %v6623_v0 }
 0x47d   : > { %5624 = vmatpush3.bf16.msra.mxu1 %v6447_v34  ;;  %v6467_v34 = vld [vmem:[#allocation3 + $0x138] sm:$0xff]  }
 0x47e   : > { %5625 = vmatprep.subr.bf16.mxu1 %v6623_v0 }
 0x480   : > { %5606 = vmatmul.mubr.bf16.gmra.mrb[8].mxu1 %v7648_v19  ;;  %v2801_v19 = vrot.slane %v7677_v59, 1  ;;  %v2941_v59 = vld [vmem:[#allocation2 + $0x4] sm:$0xe] }
 0x481   : > { %5626 = vmatpush3.bf16.msra.mxu1 %v6448_v36  ;;  %5609 = vmatprep.mubr.msk.bf16.mxu1 %vm8311_vm2, %v6623_v0  ;;  %v4892_v30 = vcombine.low %v2941_v59, %v7669_v50  ;;  %v3000_v50 = vrot.slane %v7674_v54, 1 }
 0x482   : > { %5627 = vmatprep.subr.bf16.mxu1 %v6623_v0  ;;  %v2802_v45 = vsel %vm8325_vm3, %v2799_v26, %v2801_v19  ;;  %v2804_v25 = vsel %vm8326_vm15, %v2801_v19, %v2803_v20  ;;  %vm8330_vm3 = vmmov %vm8328_vm1  ;;  %v3177_v19 = vshll.u32 %v7672_v53, 16 }
 0x483   : > { %v2997_v26 = vrot.slane %v4892_v30, 1  ;;  %v3001_v17 = vsel %vm8328_vm1, %v2998_v51, %v3000_v50  ;;  %v3003_v15 = vsel %vm8329_vm11, %v3000_v50, %v3002_v10  ;;  %v3005_v27 = vsel %vm8330_vm3, %v3002_v10, %v3004_v23  ;;  %vm8331_vm15 = vmmov %vm8328_vm1  ;;  %v6469_v50 = vld [vmem:[#allocation3 + $0x148] sm:$0xff]  }
 0x484   : > { %v3166_v36 = vshrl.u32 %v4892_v30, 16  ;;  %v3179_v59 = vrot.slane %v3177_v19, 2 }
 0x485   : > { %5628 = vmatpush3.bf16.msra.mxu1 %v6449_v43  ;;  %v2999_v8 = vsel %vm8327_vm13, %v2997_v26, %v2998_v51  ;;  %v3006_v43 = vrot.slane %v6466_v7, 1  ;;  %v3186_v51 = vshll.u32 %v7674_v54, 16  ;;  %vm8332_vm13 = vsmask.f32 6400 }
 0x486   : > { %5629 = vmatprep.subr.bf16.mxu1 %v6623_v0  ;;  %vm8333_vm1 = vmmov %vm8332_vm13 }
 0x487   : > { %vm8334_vm11 = vmmov %vm8333_vm1 }
 0x488   : > { %5610 = vmatmul.mubr.bf16.gmra.mrb[12].mxu1 %v7661_v62  ;;  %v6453_v62 = vld [vmem:[#allocation3 + $0xf8] sm:$0xff]   ;;  %vm8335_vm3 = vmmov %vm8333_vm1 }
 0x489   : > { %5630 = vmatpush3.bf16.msra.mxu1 %v6450_v21  ;;  %5613 = vmatprep.mubr.msk.bf16.mxu1 %vm8311_vm2, %v6623_v0  ;;  %v3169_v21 = vshll.u32 %v4892_v30, 16  ;;  %v3183_v30 = vshrl.u32 %v7674_v54, 16  ;;  %v6470_v54 = vld [vmem:[#allocation3 + $0x150] sm:$0xff]  }
 0x48a   : > { %5631 = vmatprep.subr.bf16.mxu1 %v6623_v0 }
 0x48d   : > { %5632 = vmatpush3.bf16.msra.mxu1 %v6451_v47  ;;  %v3174_v47 = vshrl.u32 %v7672_v53, 16  ;;  %v6468_v53 = vld [vmem:[#allocation3 + $0x140] sm:$0xff]  }
 0x48e   : > { %5633 = vmatprep.subr.bf16.mxu1 %v6623_v0 }
 0x48f   : > { %v3176_v20 = vrot.slane %v3174_v47, 1 }
 0x490   : > { %5614 = vmatmul.mubr.bf16.gmra.mrb[16].mxu1 %v2802_v45  ;;  %v3007_v45 = vsel %vm8331_vm15, %v3004_v23, %v3006_v43  ;;  %v6475_v43 = vld [vmem:[#allocation2 + $0x2c] ss:$0 sps:$4 sm:$0x33]   ;;  %vm8336_vm15 = vmmov %vm8333_vm1 }
 0x491   : > { %5617 = vmatprep.mubr.msk.bf16.mxu1 %vm8311_vm2, %v6623_v0  ;;  %5634 = vmatpush3.bf16.msra.mxu1 %v6452_v56  ;;  %v3168_v56 = vrot.slane %v3166_v36, 1  ;;  %v3180_v26 = vor.u32 %v3179_v59, %v3176_v20  ;;  %v3210_v19 = vshrl.u32 %v6475_v43, 16 }
 0x492   : > { %5635 = vmatprep.subr.bf16.mxu1 %v6623_v0 }
 0x493   : > { %v3212_v20 = vrot.slane %v3210_v19, 1 }
 0x495   : > { %5636 = vmatpush3.bf16.msra.mxu1 %v6453_v62  ;;  %v3171_v62 = vrot.slane %v3169_v21, 2  ;;  %v6473_v21 = vld [vmem:[#allocation3 + $0x168] sm:$0xff]  }
 0x496   : > { %5657 = vmatprep.subr.bf16.mxu1 %v6623_v0 }
 0x498   : > { %5618 = vmatmul.mubr.bf16.gmra.mrb[20].mxu1 %v2804_v25  ;;  %v3172_v25 = vor.u32 %v3171_v62, %v3168_v56  ;;  %v3213_v56 = vshll.u32 %v6475_v43, 16 }
 0x499   : > { %5637 = vmatprep.mubr.msk.bf16.mxu1 %vm8311_vm2, %v6623_v0 }
 0x49a   : > { %v3215_v59 = vrot.slane %v3213_v56, 2 }
 0x4a0   : > { %5638 = vmatmul.mubr.bf16.vlgmr.msra.gmra.mrb[4].mxu1 %v2999_v8  ;;  %v3185_v8 = vrot.slane %v3183_v30, 1 }
 0x4a1   : > { %5658 = vmatpush3.bf16.msra.mxu1 %v6456_v24  ;;  %5641 = vmatprep.mubr.msk.bf16.mxu1 %vm8311_vm2, %v6623_v0  ;;  %v3181_v24 = vsel %vm8332_vm13, %v3172_v25, %v3180_v26  ;;  %v6476_v25 = vld [vmem:[#allocation3 + $0x178] sm:$0xff]   ;;  %vm8337_vm13 = vcmask 1045504  }
 0x4a2   : > { %5659 = vmatprep.subr.bf16.mxu1 %v6623_v0 }
 0x4a5   : > { %5660 = vmatpush3.bf16.msra.mxu1 %v6457_v32  ;;  %v3188_v32 = vrot.slane %v3186_v51, 2  ;;  %v6478_v51 = vld [vmem:[#allocation3 + $0x180] sm:$0xff]  }
 0x4a6   : > { %5661 = vmatprep.subr.bf16.mxu1 %v6623_v0 }
 0x4a8   : > { %5642 = vmatmul.mubr.bf16.gmra.mrb[8].mxu1 %v3001_v17  ;;  %v3192_v17 = vshrl.u32 %v7679_v22, 16 }
 0x4a9   : > { %5662 = vmatpush3.bf16.msra.mxu1 %v6459_v57  ;;  %5645 = vmatprep.mubr.msk.bf16.mxu1 %vm8311_vm2, %v6623_v0  ;;  %v3189_v57 = vor.u32 %v3188_v32, %v3185_v8  ;;  %v6481_v8 = vld [vmem:[#allocation3 + $0x198] sm:$0xff]   ;;  %v6483_v32 = vld [vmem:[#allocation3 + $0x1a8] sm:$0xff]  }
 0x4aa   : > { %5663 = vmatprep.subr.bf16.mxu1 %v6623_v0 }
 0x4ab   : > { %v3190_v10 = vsel %vm8333_vm1, %v3180_v26, %v3189_v57  ;;  %v3216_v26 = vor.u32 %v3215_v59, %v3212_v20  ;;  %vm8338_vm1 = vmmov %vm8337_vm13 }
 0x4ad   : > { %5664 = vmatpush3.bf16.msra.mxu1 %v6461_v9  ;;  %v3195_v9 = vshll.u32 %v7679_v22, 16  ;;  %v3204_v22 = vshll.u32 %v7682_v31, 16 }
 0x4ae   : > { %5665 = vmatprep.subr.bf16.mxu1 %v6623_v0 }
 0x4af   : > { %v3206_v36 = vrot.slane %v3204_v22, 2 }
 0x4b0   : > { %5646 = vmatmul.mubr.bf16.gmra.mrb[12].mxu1 %v3003_v15  ;;  %v3197_v15 = vrot.slane %v3195_v9, 2 }
 0x4b1   : > { %5666 = vmatpush3.bf16.msra.mxu1 %v6462_v11  ;;  %5649 = vmatprep.mubr.msk.bf16.mxu1 %vm8311_vm2, %v6623_v0  ;;  %v3194_v11 = vrot.slane %v3192_v17, 1 }
 0x4b2   : > { %5667 = vmatprep.subr.bf16.mxu1 %v6623_v0 }
 0x4b3   : > { %v3198_v23 = vor.u32 %v3197_v15, %v3194_v11  ;;  %v6489_v15 = vld [vmem:[#allocation3 + $0x1c8] sm:$0xff]  }
 0x4b5   : > { %5668 = vmatpush3.bf16.msra.mxu1 %v6464_v39  ;;  %v6471_v39 = vld [vmem:[#allocation3 + $0x158] sm:$0xff]   ;;  %v3199_v7 = vsel %vm8334_vm11, %v3189_v57, %v3198_v23  ;;  %v3522_v57 = vld [vmem:[#allocation2 + $0x8] sm:$0xc]  ;;  %vm8339_vm11 = vmmov %vm8338_vm1 }
 0x4b6   : > { %5669 = vmatprep.subr.bf16.mxu1 %v6623_v0  ;;  %v4924_v9 = vcombine.low %v3522_v57, %v7718_v55  ;;  %v3773_v57 = vshrl.u32 %v7723_v18, 16 }
 0x4b8   : > { %5650 = vmatmul.mubr.bf16.gmra.mrb[16].mxu1 %v3005_v27  ;;  %v6472_v27 = vld [vmem:[#allocation3 + $0x160] sm:$0xff]   ;;  %v3747_v19 = vshrl.u32 %v4924_v9, 16  ;;  %v3750_v56 = vshll.u32 %v4924_v9, 16 }
 0x4b9   : > { %5653 = vmatprep.mubr.msk.bf16.mxu1 %vm8311_vm2, %v6623_v0  ;;  %5670 = vmatpush3.bf16.msra.mxu1 %v6465_v52  ;;  %v3201_v52 = vshrl.u32 %v7682_v31, 16  ;;  %v3581_v31 = vrot.slane %v7721_v44, 2 }
 0x4ba   : > { %5671 = vmatprep.subr.bf16.mxu1 %v6623_v0  ;;  %v3749_v59 = vrot.slane %v3747_v19, 2 }
 0x4bd   : > { %5672 = vmatpush3.bf16.msra.mxu1 %v6467_v34  ;;  %v3203_v34 = vrot.slane %v3201_v52, 1  ;;  %v6494_v52 = vld [vmem:[#allocation3 + $0x1e0] sm:$0xff]  }
 0x4be   : > { %5693 = vmatprep.subr.bf16.mxu1 %v6623_v0 }
 0x4bf   : > { %v3207_v47 = vor.u32 %v3206_v36, %v3203_v34  ;;  %v6497_v34 = vld [vmem:[#allocation3 + $0x1f0] sm:$0xff]   ;;  %v6498_v36 = vld [vmem:[#allocation2 + $0x30] ss:$0 sps:$4 sm:$0x33]  }
 0x4c0   : > { %5654 = vmatmul.mubr.bf16.gmra.mrb[20].mxu1 %v3007_v45  ;;  %v6474_v45 = vld [vmem:[#allocation3 + $0x170] sm:$0xff]  }
 0x4c1   : > { %5673 = vmatprep.mubr.msk.bf16.mxu1 %vm8311_vm2, %v6623_v0  ;;  %v3208_v62 = vsel %vm8335_vm3, %v3198_v23, %v3207_v47  ;;  %v3217_v30 = vsel %vm8336_vm15, %v3207_v47, %v3216_v26  ;;  %v3583_v23 = vrot.slane %v7723_v18, 2  ;;  %vm8340_vm3 = vmmov %vm8338_vm1  ;;  %v3587_v47 = vrot.slane %v6498_v36, 2 }
 0x4c2   : > { %vm8341_vm15 = vmmov %vm8338_vm1 }
 0x4c3   : > { %v3584_v22 = vsel %vm8340_vm3, %v3581_v31, %v3583_v23 }
 0x4c8   : > { %5674 = vmatmul.mubr.bf16.vlgmr.msra.gmra.mrb[4].mxu1 %v3181_v24  ;;  %v6480_v24 = vld [vmem:[#allocation3 + $0x190] sm:$0xff]  }
 0x4c9   : > { %5694 = vmatpush3.bf16.msra.mxu1 %v6468_v53  ;;  %5677 = vmatprep.mubr.msk.bf16.mxu1 %vm8311_vm2, %v6623_v0  ;;  %v6479_v53 = vld [vmem:[#allocation3 + $0x188] sm:$0xff]  }
 0x4ca   : > { %5695 = vmatprep.subr.bf16.mxu1 %v6623_v0 }
 0x4cd   : > { %5696 = vmatpush3.bf16.msra.mxu1 %v6469_v50  ;;  %v6485_v50 = vld [vmem:[#allocation3 + $0x1b8] sm:$0xff]  }
 0x4ce   : > { %5697 = vmatprep.subr.bf16.mxu1 %v6623_v0 }
 0x4d0   : > { %5678 = vmatmul.mubr.bf16.gmra.mrb[8].mxu1 %v3190_v10  ;;  %v6488_v10 = vld [vmem:[#allocation3 + $0x1c0] sm:$0xff]  }
 0x4d1   : > { %5698 = vmatpush3.bf16.msra.mxu1 %v6470_v54  ;;  %5681 = vmatprep.mubr.msk.bf16.mxu1 %vm8311_vm2, %v6623_v0  ;;  %v3579_v54 = vrot.slane %v7712_v38, 2 }
 0x4d2   : > { %5699 = vmatprep.subr.bf16.mxu1 %v6623_v0 }
 0x4d3   : > { %v3582_v55 = vsel %vm8339_vm11, %v3579_v54, %v3581_v31  ;;  %v6504_v31 = vld [vmem:[#allocation3 + $0x220] sm:$0xff]  }
 0x4d5   : > { %5700 = vmatpush3.bf16.msra.mxu1 %v6471_v39  ;;  %v6493_v39 = vld [vmem:[#allocation3 + $0x1d8] sm:$0xff]  }
 0x4d6   : > { %5701 = vmatprep.subr.bf16.mxu1 %v6623_v0 }
 0x4d8   : > { %5682 = vmatmul.mubr.bf16.gmra.mrb[12].mxu1 %v3199_v7  ;;  %v3585_v7 = vrot.slane %v7725_v49, 2 }
 0x4d9   : > { %5702 = vmatpush3.bf16.msra.mxu1 %v6472_v27  ;;  %5685 = vmatprep.mubr.msk.bf16.mxu1 %vm8311_vm2, %v6623_v0  ;;  %v6496_v27 = vld [vmem:[#allocation3 + $0x1e8] sm:$0xff]  }
 0x4da   : > { %5703 = vmatprep.subr.bf16.mxu1 %v6623_v0 }
 0x4dd   : > { %5704 = vmatpush3.bf16.msra.mxu1 %v6473_v21  ;;  %v6499_v21 = vld [vmem:[#allocation3 + $0x1f8] sm:$0xff]  }
 0x4de   : > { %5705 = vmatprep.subr.bf16.mxu1 %v6623_v0 }
 0x4e0   : > { %5686 = vmatmul.mubr.bf16.gmra.mrb[16].mxu1 %v3208_v62  ;;  %v3758_v62 = vshll.u32 %v7712_v38, 16 }
 0x4e1   : > { %5689 = vmatprep.mubr.msk.bf16.mxu1 %vm8311_vm2, %v6623_v0  ;;  %5706 = vmatpush3.bf16.msra.mxu1 %v6474_v45  ;;  %v3755_v45 = vshrl.u32 %v7712_v38, 16  ;;  %v6500_v38 = vld [vmem:[#allocation3 + $0x200] sm:$0xff]  }
 0x4e2   : > { %5707 = vmatprep.subr.bf16.mxu1 %v6623_v0 }
 0x4e3   : > { %v3757_v26 = vrot.slane %v3755_v45, 2 }
 0x4e5   : > { %5708 = vmatpush3.bf16.msra.mxu1 %v6476_v25  ;;  %v3752_v25 = vrot.slane %v3750_v56, 3 }
 0x4e6   : > { %5729 = vmatprep.subr.bf16.mxu1 %v6623_v0 }
 0x4e8   : > { %5690 = vmatmul.mubr.bf16.gmra.mrb[20].mxu1 %v3217_v30  ;;  %v3760_v30 = vrot.slane %v3758_v62, 3 }
 0x4e9   : > { %5709 = vmatprep.mubr.msk.bf16.mxu1 %vm8311_vm2, %v6623_v0 }
 0x4f0   : > { %5710 = vmatmul.mubr.bf16.vlgmr.msra.gmra.mrb[4].mxu1 %v7694_v12  ;;  %v6482_v12 = vld [vmem:[#allocation3 + $0x1a0] sm:$0xff]  }
 0x4f1   : > { %5730 = vmatpush3.bf16.msra.mxu1 %v6478_v51  ;;  %5713 = vmatprep.mubr.msk.bf16.mxu1 %vm8311_vm2, %v6623_v0  ;;  %v3753_v51 = vor.u32 %v3752_v25, %v3749_v59  ;;  %v4159_v59 = vld [vmem:[%s8221_s5 + $0x28] sm:$0xff] }
 0x4f2   : > { %5731 = vmatprep.subr.bf16.mxu1 %v6623_v0 }
 0x4f5   : > { %5732 = vmatpush3.bf16.msra.mxu1 %v6479_v53  ;;  %v3761_v53 = vor.u32 %v3760_v30, %v3757_v26  ;;  %v4160_v26 = vld [vmem:[%s8221_s5 + $0x30] sm:$0xff]  ;;  %v4161_v30 = vld [vmem:[%s8221_s5 + $0x38] sm:$0xff] }
 0x4f6   : > { %5733 = vmatprep.subr.bf16.mxu1 %v6623_v0 }
 0x4f8   : > { %5714 = vmatmul.mubr.bf16.gmra.mrb[8].mxu1 %v7697_v14  ;;  %v6484_v14 = vld [vmem:[#allocation3 + $0x1b0] sm:$0xff]  }
 0x4f9   : > { %5734 = vmatpush3.bf16.msra.mxu1 %v6480_v24  ;;  %5717 = vmatprep.mubr.msk.bf16.mxu1 %vm8311_vm2, %v6623_v0  ;;  %v3764_v24 = vshrl.u32 %v7721_v44, 16 }
 0x4fa   : > { %5735 = vmatprep.subr.bf16.mxu1 %v6623_v0 }
 0x4fd   : > { %5736 = vmatpush3.bf16.msra.mxu1 %v6481_v8  ;;  %v3767_v8 = vshll.u32 %v7721_v44, 16  ;;  %v6502_v44 = vld [vmem:[#allocation3 + $0x210] sm:$0xff]  }
 0x4fe   : > { %5737 = vmatprep.subr.bf16.mxu1 %v6623_v0 }
 0x500   : > { %5718 = vmatmul.mubr.bf16.gmra.mrb[12].mxu1 %v7701_v2  ;;  %v3384_v2 = vrot.slane %v6475_v43, 2  ;;  %v3586_v43 = vsel %vm8341_vm15, %v3583_v23, %v3585_v7  ;;  %v6507_v23 = vld [vmem:[#allocation2 + $0x30] ss:$0 sps:$4 sm:$0x77]  }
 0x501   : > { %5738 = vmatpush3.bf16.msra.mxu1 %v6482_v12  ;;  %5721 = vmatprep.mubr.msk.bf16.mxu1 %vm8311_vm2, %v6623_v0  ;;  %v3965_v45 = vrot.slane %v6507_v23, 3 }
 0x502   : > { %5739 = vmatprep.subr.bf16.mxu1 %v6623_v0  ;;  %v3385_v17 = vsel %vm8337_vm13, %v3382_v33, %v3384_v2  ;;  %v6491_v33 = vld [vmem:[#allocation3 + $0x1d0] sm:$0xff]   ;;  %vm8342_vm13 = vmmov %vm8338_vm1 }
 0x503   : > { %v3588_v20 = vsel %vm8342_vm13, %v3585_v7, %v3587_v47  ;;  %v3794_v7 = vshll.u32 %v6507_v23, 16  ;;  %v6508_v47 = vld [vmem:[#allocation3 + $0x238] sm:$0xff]  }
 0x505   : > { %5740 = vmatpush3.bf16.msra.mxu1 %v6483_v32  ;;  %v3766_v32 = vrot.slane %v3764_v24, 2  ;;  %v4163_v24 = vld [vmem:[%s8221_s5 + $0x48] sm:$0xff] }
 0x506   : > { %5741 = vmatprep.subr.bf16.mxu1 %v6623_v0 }
 0x508   : > { %5722 = vmatmul.mubr.bf16.gmra.mrb[16].mxu1 %v7706_v61  ;;  %v3578_v61 = vrot.slane %v4924_v9, 2 }
 0x509   : > { %5725 = vmatprep.mubr.msk.bf16.mxu1 %vm8311_vm2, %v6623_v0  ;;  %5742 = vmatpush3.bf16.msra.mxu1 %v6484_v14  ;;  %v3769_v14 = vrot.slane %v3767_v8, 3  ;;  %v4164_v8 = vld [vmem:[%s8221_s5 + $0x50] sm:$0xff] }
 0x50a   : > { %5743 = vmatprep.subr.bf16.mxu1 %v6623_v0  ;;  %v3580_v11 = vsel %vm8338_vm1, %v3578_v61, %v3579_v54  ;;  %vm8343_vm1 = vsmask.f32 5376  ;;  %v3775_v61 = vrot.slane %v3773_v57, 2  ;;  %v6514_v57 = vld [vmem:[%s6768_s16 + $0x4] sm:$0xfe]  }
 0x50b   : > { %v3762_v12 = vsel %vm8343_vm1, %v3753_v51, %v3761_v53  ;;  %v3770_v2 = vor.u32 %v3769_v14, %v3766_v32  ;;  %vm8344_vm11 = vmmov %vm8343_vm1  ;;  %v5934_v51 = vpack.c.bf16 %v4161_v30, %v4160_v26  ;;  %v4166_v14 = vld [vmem:[%s8221_s5 + $0x60] sm:$0xff]  ;;  %v6519_v30 = vld [vmem:[%s6768_s16 + $0x2c] ss:$0 sps:$4 sm:$0x33]  }
 0x50c   : > { %vm8345_vm3 = vmmov %vm8343_vm1 }
 0x50d   : > { %5744 = vmatpush3.bf16.msra.mxu1 %v6485_v50  ;;  %v6501_v50 = vld [vmem:[#allocation3 + $0x208] sm:$0xff]   ;;  %v3771_v9 = vsel %vm8344_vm11, %v3761_v53, %v3770_v2  ;;  %vm8346_vm15 = vmmov %vm8343_vm1  ;;  %v4162_v53 = vld [vmem:[%s8221_s5 + $0x40] sm:$0xff]  ;;  %vm8349_vm11 = vsmask.f32 6400 }
 0x50e   : > { %5765 = vmatprep.subr.bf16.mxu1 %v6623_v0  ;;  %vm8347_vm13 = vmmov %vm8343_vm1  ;;  %vm8348_vm1 = vcmask 1044480  }
 0x510   : > { %5726 = vmatmul.mubr.bf16.gmra.mrb[20].mxu1 %v3385_v17  ;;  %v3776_v17 = vshll.u32 %v7723_v18, 16  ;;  %v3785_v18 = vshll.u32 %v7725_v49, 16 }
 0x511   : > { %5745 = vmatprep.mubr.msk.bf16.mxu1 %vm8311_vm2, %v6623_v0 }
 0x512   : > { %v3778_v54 = vrot.slane %v3776_v17, 3  ;;  %v6515_v17 = vld [vmem:[%s6768_s16 + $0xc] sm:$0xff]  }
 0x518   : > { %5746 = vmatmul.mubr.bf16.vlgmr.msra.gmra.mrb[4].mxu1 %v3580_v11  ;;  %v3779_v11 = vor.u32 %v3778_v54, %v3775_v61  ;;  %v4169_v61 = vld [vmem:[%s8221_s5 + $0x78] sm:$0xff]  ;;  %v6511_v54 = vld [vmem:[%s8219_s3 + $0x8] sm:$0xff]  }
 0x519   : > { %5766 = vmatpush3.bf16.msra.mxu1 %v6488_v10  ;;  %5749 = vmatprep.mubr.msk.bf16.mxu1 %vm8311_vm2, %v6623_v0  ;;  %v6503_v10 = vld [vmem:[#allocation3 + $0x218] sm:$0xff]  }
 0x51a   : > { %5767 = vmatprep.subr.bf16.mxu1 %v6623_v0 }
 0x51d   : > { %5768 = vmatpush3.bf16.msra.mxu1 %v6489_v15  ;;  %v3782_v15 = vshrl.u32 %v7725_v49, 16  ;;  %v4156_v49 = vld [vmem:[%s8221_s5 + $0x10] sm:$0xff] }
 0x51e   : > { %5769 = vmatprep.subr.bf16.mxu1 %v6623_v0 }
 0x520   : > { %5750 = vmatmul.mubr.bf16.gmra.mrb[8].mxu1 %v3582_v55  ;;  %v3784_v55 = vrot.slane %v3782_v15, 2  ;;  %v4374_v15 = vshrl.u32 %v6515_v17, 16 }
 0x521   : > { %5770 = vmatpush3.bf16.msra.mxu1 %v6491_v33  ;;  %5753 = vmatprep.mubr.msk.bf16.mxu1 %vm8311_vm2, %v6623_v0  ;;  %v3780_v33 = vsel %vm8345_vm3, %v3770_v2, %v3779_v11  ;;  %v6510_v2 = vld [vmem:[%s8219_s3] sm:$0xff]   ;;  %vm8350_vm3 = vcmask 523264  }
 0x522   : > { %5771 = vmatprep.subr.bf16.mxu1 %v6623_v0  ;;  %5873 = vmatpush3.bf16.msra.mxu0 %v6510_v2 }
 0x523   : > { %5874 = vmatprep.subr.bf16.mxu0 %v6623_v0 }
 0x525   : > { %5772 = vmatpush3.bf16.msra.mxu1 %v6493_v39  ;;  %v3787_v39 = vrot.slane %v3785_v18, 3  ;;  %v4377_v18 = vshll.u32 %v6515_v17, 16 }
 0x526   : > { %5773 = vmatprep.subr.bf16.mxu1 %v6623_v0  ;;  %5875 = vmatpush3.bf16.msra.mxu0 %v6511_v54 }
 0x527   : > { %5876 = vmatprep.subr.bf16.mxu0 %v6623_v0 }
 0x528   : > { %5754 = vmatmul.mubr.bf16.gmra.mrb[12].mxu1 %v3584_v22  ;;  %v3788_v22 = vor.u32 %v3787_v39, %v3784_v55 }
 0x529   : > { %5774 = vmatpush3.bf16.msra.mxu1 %v6494_v52  ;;  %5757 = vmatprep.mubr.msk.bf16.mxu1 %vm8311_vm2, %v6623_v0  ;;  %v6505_v52 = vld [vmem:[#allocation3 + $0x228] sm:$0xff]  }
 0x52a   : > { %5775 = vmatprep.subr.bf16.mxu1 %v6623_v0  ;;  %v3789_v36 = vsel %vm8346_vm15, %v3779_v11, %v3788_v22  ;;  %v4369_v11 = vshll.u32 %v6514_v57, 16  ;;  %vm8351_vm15 = vmmov %vm8349_vm11 }
 0x52c   : > { %v4371_v39 = vrot.slane %v4369_v11, 2 }
 0x52d   : > { %5776 = vmatpush3.bf16.msra.mxu1 %v6496_v27  ;;  %v3791_v27 = vshrl.u32 %v6507_v23, 16  ;;  %v4376_v23 = vrot.slane %v4374_v15, 1 }
 0x52e   : > { %5777 = vmatprep.subr.bf16.mxu1 %v6623_v0 }
 0x530   : > { %5758 = vmatmul.mubr.bf16.gmra.mrb[16].mxu1 %v3586_v43  ;;  %v3793_v43 = vrot.slane %v3791_v27, 2  ;;  %v6513_v27 = vld [vmem:[%s8219_s3 + $0x18] sm:$0xff]  }
 0x531   : > { %5761 = vmatprep.mubr.msk.bf16.mxu1 %vm8311_vm2, %v6623_v0  ;;  %5778 = vmatpush3.bf16.msra.mxu1 %v6497_v34  ;;  %v6506_v34 = vld [vmem:[#allocation3 + $0x230] sm:$0xff]  }
 0x532   : > { %5779 = vmatprep.subr.bf16.mxu1 %v6623_v0 }
 0x535   : > { %5780 = vmatpush3.bf16.msra.mxu1 %v6499_v21  ;;  %v3796_v21 = vrot.slane %v3794_v7, 3 }
 0x536   : > { %5801 = vmatprep.subr.bf16.mxu1 %v6623_v0 }
 0x537   : > { %v3797_v19 = vor.u32 %v3796_v21, %v3793_v43 }
 0x538   : > { %5762 = vmatmul.mubr.bf16.gmra.mrb[20].mxu1 %v3588_v20  ;;  %v4158_v20 = vld [vmem:[%s8221_s5 + $0x20] sm:$0xff] }
 0x539   : > { %5781 = vmatprep.mubr.msk.bf16.mxu1 %vm8311_vm2, %v6623_v0  ;;  %v3798_v56 = vsel %vm8347_vm13, %v3788_v22, %v3797_v19  ;;  %v5931_v25 = vpack.c.bf16 %v4159_v59, %v4158_v20  ;;  %v6516_v22 = vld [vmem:[%s6768_s16 + $0x14] sm:$0xff]   ;;  %v6517_v19 = vld [vmem:[%s6768_s16 + $0x1c] sm:$0xff]   ;;  %vm8352_vm13 = vmmov %vm8350_vm3 }
 0x53a   : > { %v4386_v43 = vshll.u32 %v6516_v22, 16 }
 0x540   : > { %5782 = vmatmul.mubr.bf16.vlgmr.msra.gmra.mrb[4].mxu1 %v3762_v12  ;;  %v4165_v12 = vld [vmem:[%s8221_s5 + $0x58] sm:$0xff] }
 0x541   : > { %5802 = vmatpush3.bf16.msra.mxu1 %v6500_v38  ;;  %5785 = vmatprep.mubr.msk.bf16.mxu1 %vm8311_vm2, %v6623_v0  ;;  %v5937_v38 = vpack.c.bf16 %v4163_v24, %v4162_v53  ;;  %v5940_v32 = vpack.c.bf16 %v4165_v12, %v4164_v8  ;;  %v4410_v53 = vshrl.u32 %v6519_v30, 16  ;;  %v4413_v24 = vshll.u32 %v6519_v30, 16 }
 0x542   : > { %5803 = vmatprep.subr.bf16.mxu1 %v6623_v0 }
 0x543   : > { %v4415_v12 = vrot.slane %v4413_v24, 2 }
 0x545   : > { %5804 = vmatpush3.bf16.msra.mxu1 %v6501_v50  ;;  %v4167_v50 = vld [vmem:[%s8221_s5 + $0x68] sm:$0xff] }
 0x546   : > { %5805 = vmatprep.subr.bf16.mxu1 %v6623_v0 }
 0x548   : > { %5786 = vmatmul.mubr.bf16.gmra.mrb[8].mxu1 %v3771_v9  ;;  %v4168_v9 = vld [vmem:[%s8221_s5 + $0x70] sm:$0xff] }
 0x549   : > { %5806 = vmatpush3.bf16.msra.mxu1 %v6502_v44  ;;  %5789 = vmatprep.mubr.msk.bf16.mxu1 %vm8311_vm2, %v6623_v0  ;;  %v5943_v44 = vpack.c.bf16 %v4167_v50, %v4166_v14 }
 0x54a   : > { %5807 = vmatprep.subr.bf16.mxu1 %v6623_v0 }
 0x54d   : > { %5808 = vmatpush3.bf16.msra.mxu1 %v6503_v10  ;;  %v4366_v10 = vshrl.u32 %v6514_v57, 16 }
 0x54e   : > { %5809 = vmatprep.subr.bf16.mxu1 %v6623_v0 }
 0x54f   : > { %v4368_v55 = vrot.slane %v4366_v10, 1 }
 0x550   : > { %5790 = vmatmul.mubr.bf16.gmra.mrb[12].mxu1 %v3780_v33  ;;  %v6512_v33 = vld [vmem:[%s8219_s3 + $0x10] sm:$0xff]  }
 0x551   : > { %5810 = vmatpush3.bf16.msra.mxu1 %v6504_v31  ;;  %5793 = vmatprep.mubr.msk.bf16.mxu1 %vm8311_vm2, %v6623_v0  ;;  %v5946_v31 = vpack.c.bf16 %v4169_v61, %v4168_v9  ;;  %v4372_v7 = vor.u32 %v4371_v39, %v4368_v55 }
 0x552   : > { %5811 = vmatprep.subr.bf16.mxu1 %v6623_v0  ;;  %5877 = vmatpush3.bf16.msra.mxu0 %v6512_v33 }
 0x553   : > { %5878 = vmatprep.subr.bf16.mxu0 %v6623_v0 }
 0x555   : > { %5812 = vmatpush3.bf16.msra.mxu1 %v6505_v52  ;;  %v4379_v52 = vrot.slane %v4377_v18, 2 }
 0x556   : > { %5813 = vmatprep.subr.bf16.mxu1 %v6623_v0  ;;  %5879 = vmatpush3.bf16.msra.mxu0 %v6513_v27 }
 0x558   : > { %5794 = vmatmul.mubr.bf16.gmra.mrb[16].mxu1 %v3789_v36  ;;  %v4383_v36 = vshrl.u32 %v6516_v22, 16 }
 0x559   : > { %5797 = vmatprep.mubr.msk.bf16.mxu1 %vm8311_vm2, %v6623_v0  ;;  %5814 = vmatpush3.bf16.msra.mxu1 %v6506_v34  ;;  %v4380_v34 = vor.u32 %v4379_v52, %v4376_v23 }
 0x55a   : > { %5815 = vmatprep.subr.bf16.mxu1 %v6623_v0 }
 0x55b   : > { %v4381_v21 = vsel %vm8349_vm11, %v4372_v7, %v4380_v34 }
 0x55c   : > { %5881 = vmatmul.mubr.msk.bf16.vlgmr.msra.gmra.mrb[20].mxu0 %vm8350_vm3, %v4381_v21 }
 0x55d   : > { %5816 = vmatpush3.bf16.msra.mxu1 %v6508_v47  ;;  %v4385_v47 = vrot.slane %v4383_v36, 1  ;;  %5884 = vmatprep.mubr.msk.bf16.mxu0 %vm8311_vm2, %v6623_v0 }
 0x55e   : > { %5924 = vmatprep.subr.bf16.mxu1 %v6625_v35 }
 0x560   : > { %5798 = vmatmul.mubr.bf16.gmra.mrb[20].mxu1 %v3798_v56 }
 0x561   : > { %5817 = vmatprep.mubr.msk.bf16.mxu1 %vm8311_vm2, %v6623_v0 }
 0x568   : > { %5818 = vmatmul.mubr.bf16.vlgmr.msra.gmra.mrb[4].mxu1 %v7735_v1  ;;  %v3966_v1 = vsel %vm8348_vm1, %v3963_v60, %v3965_v45  ;;  %v4157_v60 = vld [vmem:[%s8221_s5 + $0x18] sm:$0xff]  ;;  %v4392_v45 = vshrl.u32 %v6517_v19, 16  ;;  %vm8353_vm1 = vmmov %vm8349_vm11 }
 0x569   : > { %5821 = vmatprep.mubr.msk.bf16.mxu1 %vm8311_vm2, %v6623_v0  ;;  %v5928_v62 = vpack.c.bf16 %v4157_v60, %v4156_v49  ;;  %v6518_v49 = vld [vmem:[%s6768_s16 + $0x24] sm:$0xff]   ;;  %vm8354_vm11 = vmmov %vm8350_vm3  ;;  %s8360_s16 = smov 80  }
 0x56a   : > { %v4404_v20 = vshll.u32 %v6518_v49, 16  ;;  %vm8355_vm3 = vmmov %vm8353_vm1 }
 0x56c   : > { %v4406_v26 = vrot.slane %v4404_v20, 2 }
 0x570   : > { %5822 = vmatmul.mubr.bf16.gmra.mrb[8].mxu1 %v7738_v41  ;;  %v4154_v41 = vld [vmem:[%s8221_s5] sm:$0xff] }
 0x571   : > { %5825 = vmatprep.mubr.msk.bf16.mxu1 %vm8311_vm2, %v6623_v0 }
 0x578   : > { %5826 = vmatmul.mubr.bf16.gmra.mrb[12].mxu1 %v7741_v3  ;;  %v4155_v3 = vld [vmem:[%s8221_s5 + $0x8] sm:$0xff] }
 0x579   : > { %5829 = vmatprep.mubr.msk.bf16.mxu1 %vm8311_vm2, %v6623_v0 }
 0x580   : > { %5830 = vmatmul.mubr.bf16.gmra.mrb[16].mxu1 %v7748_v5  ;;  %v5925_v5 = vpack.c.bf16 %v4155_v3, %v4154_v41  ;;  %v4394_v3 = vrot.slane %v4392_v45, 1 }
 0x581   : > { %5833 = vmatprep.mubr.msk.bf16.mxu1 %vm8311_vm2, %v6623_v0 }
 0x582   : > { %5926 = vmatpush3.bf16.msra.mxu1 %v5925_v5 }
 0x583   : > { %5927 = vmatprep.subr.bf16.mxu1 %v6625_v35 }
 0x586   : > { %5929 = vmatpush3.bf16.msra.mxu1 %v5928_v62  ;;  %v4401_v62 = vshrl.u32 %v6518_v49, 16 }
 0x587   : > { %5930 = vmatprep.subr.bf16.mxu1 %v6625_v35 }
 0x588   : > { %5834 = vmatmul.mubr.bf16.gmra.mrb[20].mxu1 %v3966_v1  ;;  %v4395_v1 = vshll.u32 %v6517_v19, 16 }
 0x589   : > { %5869 = vmatprep.mubr.msk.f32.mxu1 %vm8311_vm2, %v6623_v0 }
 0x58a   : > { %5932 = vmatpush3.bf16.msra.mxu1 %v5931_v25  ;;  %v4397_v5 = vrot.slane %v4395_v1, 2  ;;  %v4403_v25 = vrot.slane %v4401_v62, 1 }
 0x58b   : > { %5933 = vmatprep.subr.bf16.mxu1 %v6625_v35 }
 0x58c   : > { %v4398_v60 = vor.u32 %v4397_v5, %v4394_v3 }
 0x58e   : > { %5935 = vmatpush3.bf16.msra.mxu1 %v5934_v51  ;;  %v4407_v51 = vor.u32 %v4406_v26, %v4403_v25 }
 0x58f   : > { %5936 = vmatprep.subr.bf16.mxu1 %v6625_v35 }
 0x590   : > { %v4408_v8 = vsel %vm8355_vm3, %v4398_v60, %v4407_v51 }
 0x592   : > { %5938 = vmatpush3.bf16.msra.mxu1 %v5937_v38  ;;  %v4412_v38 = vrot.slane %v4410_v53, 1 }
 0x593   : > { %5939 = vmatprep.subr.bf16.mxu1 %v6625_v35 }
 0x596   : > { %5941 = vmatpush3.bf16.msra.mxu1 %v5940_v32  ;;  %v4416_v32 = vor.u32 %v4415_v12, %v4412_v38 }
 0x597   : > { %5942 = vmatprep.subr.bf16.mxu1 %v6625_v35 }
 0x59a   : > { %5944 = vmatpush3.bf16.msra.mxu1 %v5943_v44 }
 0x59b   : > { %5945 = vmatprep.subr.bf16.mxu1 %v6625_v35  ;;  %v4388_v35 = vrot.slane %v4386_v43, 2 }
 0x59d   : > { %v4389_v56 = vor.u32 %v4388_v35, %v4385_v47 }
 0x59e   : > { %5947 = vmatpush3.bf16.msra.mxu1 %v5946_v31 }
 0x59f   : > { %v4390_v41 = vsel %vm8351_vm15, %v4380_v34, %v4389_v56  ;;  %v4399_v59 = vsel %vm8353_vm1, %v4389_v56, %v4398_v60  ;;  %vm8356_vm15 = vmmov %vm8354_vm11 }
 0x5a0   : > { %5885 = vmatmul.mubr.msk.bf16.gmra.mrb[24].mxu0 %vm8352_vm13, %v4390_v41  ;;  %vm8357_vm13 = vmmov %vm8353_vm1 }
 0x5a1   : > { %5888 = vmatprep.mubr.msk.bf16.mxu0 %vm8311_vm2, %v6623_v0  ;;  %v4417_v14 = vsel %vm8357_vm13, %v4407_v51, %v4416_v32  ;;  %vm8358_vm1 = vmmov %vm8354_vm11 }
 0x5a8   : > { %5889 = vmatmul.mubr.msk.bf16.gmra.mrb[28].mxu0 %vm8354_vm11, %v4399_v59  ;;  %vm8373_vm11 = vmmov %vm8358_vm1 }
 0x5a9   : > { %5892 = vmatprep.mubr.msk.bf16.mxu0 %vm8311_vm2, %v6623_v0 }
 0x5b0   : > { %5893 = vmatmul.mubr.msk.bf16.gmra.mrb[32].mxu0 %vm8356_vm15, %v4408_v8 }
 0x5b1   : > { %5896 = vmatprep.mubr.msk.bf16.mxu0 %vm8311_vm2, %v6623_v0 }
 0x5b8   : > { %5897 = vmatmul.mubr.msk.bf16.gmra.mrb[36].mxu0 %vm8358_vm1, %v4417_v14 }
 0x63b   : > { %v8054_v50 = vpop.f32.mrb[4].mxu1 }
 0x63c   : > { %v4103_v2 = vsel %vm7336_vm8, %v8054_v50, 0.0  ;;  %v5819_v57 = vpop.f32.mrb[5].mxu1  ;;  %vm8364_vm8 = vcmask 261120  }
 0x63d   : > { %v8059_v17 = vpop.f32.mrb[6].mxu1  ;;  %v4128_v0 = vmul.f32 %v4103_v2, %v4103_v2 }
 0x63e   : > { %v4104_v44 = vsel %vm7349_vm12, %v8059_v17, 0.0  ;;  %v5820_v9 = vpop.f32.mrb[7].mxu1  ;;  %vm8365_vm12 = vcmask 392192  }
 0x63f   : > { %v4113_v61 = vadd.f32 %v4104_v44, %v4103_v2  ;;  %v4129_v54 = vmul.f32 %v4104_v44, %v4104_v44  ;;  %vm8372_vm2 = vmmov %vm8365_vm12 }
 0x641   : > { %v4138_v10 = vadd.f32 %v4129_v54, %v4128_v0 }
 0x643   : > { %v8064_v11 = vpop.f32.mrb[8].mxu1 }
 0x644   : > { %v4105_v15 = vsel %vm7379_vm9, %v8064_v11, 0.0  ;;  %v5823_v42 = vpop.f32.mrb[9].mxu1  ;;  %vm8366_vm9 = vmmov %vm8358_vm1 }
 0x645   : > { %v4114_v18 = vadd.f32 %v4113_v61, %v4105_v15  ;;  %v4130_v31 = vmul.f32 %v4105_v15, %v4105_v15  ;;  %v8069_v33 = vpop.f32.mrb[10].mxu1 }
 0x646   : > { %v4106_v48 = vsel %vm7385_vm6, %v8069_v33, 0.0  ;;  %v5824_v55 = vpop.f32.mrb[11].mxu1  ;;  %vm8359_vm6 = vcmask 1040384  }
 0x647   : > { %v4139_v39 = vadd.f32 %v4138_v10, %v4130_v31  ;;  %v4115_v23 = vadd.f32 %v4114_v18, %v4106_v48  ;;  %v4131_v52 = vmul.f32 %v4106_v48, %v4106_v48  ;;  %v8105_v18 = vpop.f32.mrb[20].mxu0 }
 0x648   : > { %v5882_v31 = vpop.f32.mrb[21].mxu0 }
 0x649   : > { %v4140_v22 = vadd.f32 %v4139_v39, %v4131_v52  ;;  %v8107_v48 = vpop.f32.mrb[22].mxu0 }
 0x64a   : > { %v5883_v55 = vpop.f32.mrb[23].mxu0 }
 0x64b   : > { %v8074_v27 = vpop.f32.mrb[12].mxu1 }
 0x64c   : > { %v4107_v13 = vsel %vm7414_vm10, %v8074_v27, 0.0  ;;  %v5827_v7 = vpop.f32.mrb[13].mxu1  ;;  %vm8367_vm10 = vcmask 654336  }
 0x64d   : > { %v4116_v34 = vadd.f32 %v4115_v23, %v4107_v13  ;;  %v4132_v36 = vmul.f32 %v4107_v13, %v4107_v13  ;;  %v8079_v43 = vpop.f32.mrb[14].mxu1  ;;  %vm8374_vm3 = vmmov %vm8367_vm10 }
 0x64e   : > { %v4108_v16 = vsel %vm7420_vm7, %v8079_v43, 0.0  ;;  %v5828_v21 = vpop.f32.mrb[15].mxu1  ;;  %vm8363_vm7 = vcmask 130048  }
 0x64f   : > { %v4141_v47 = vadd.f32 %v4140_v22, %v4132_v36  ;;  %v4117_v35 = vadd.f32 %v4116_v34, %v4108_v16  ;;  %v4133_v19 = vmul.f32 %v4108_v16, %v4108_v16 }
 0x651   : > { %v4142_v56 = vadd.f32 %v4141_v47, %v4133_v19 }
 0x653   : > { %v8084_v45 = vpop.f32.mrb[16].mxu1 }
 0x654   : > { %v4109_v37 = vsel %vm7446_vm5, %v8084_v45, 0.0  ;;  %v5831_v1 = vpop.f32.mrb[17].mxu1  ;;  %vm8368_vm5 = vcmask 785408  }
 0x655   : > { %v4118_v41 = vadd.f32 %v4117_v35, %v4109_v37  ;;  %v4134_v3 = vmul.f32 %v4109_v37, %v4109_v37  ;;  %v8089_v5 = vpop.f32.mrb[18].mxu1  ;;  %vm8375_vm15 = vmmov %vm8368_vm5 }
 0x656   : > { %v4110_v40 = vsel %vm7452_vm4, %v8089_v5, 0.0  ;;  %v5832_v49 = vpop.f32.mrb[19].mxu1  ;;  %vm8369_vm4 = vmmov %vm8363_vm7 }
 0x657   : > { %v4143_v60 = vadd.f32 %v4142_v56, %v4134_v3  ;;  %v4119_v62 = vadd.f32 %v4118_v41, %v4110_v40  ;;  %v4135_v20 = vmul.f32 %v4110_v40, %v4110_v40 }
 0x659   : > { %v4144_v59 = vadd.f32 %v4143_v60, %v4135_v20 }
 0x65b   : > { %v8094_v25 = vpop.f32.mrb[20].mxu1 }
 0x65c   : > { %v4111_v6 = vsel %vm7470_vm14, %v8094_v25, 0.0  ;;  %v5835_v26 = vpop.f32.mrb[21].mxu1  ;;  %vm8370_vm14 = vcmask 916480  }
 0x65d   : > { %v4120_v30 = vadd.f32 %v4119_v62, %v4111_v6  ;;  %v4136_v51 = vmul.f32 %v4111_v6, %v4111_v6  ;;  %v8099_v53 = vpop.f32.mrb[22].mxu1  ;;  %vm8376_vm13 = vmmov %vm8370_vm14 }
 0x65e   : > { %v4112_v46 = vsel %vm8307_vm0, %v8099_v53, 0.0  ;;  %v5836_v24 = vpop.f32.mrb[23].mxu1  ;;  %vm8371_vm0 = vmmov %vm8364_vm8 }
 0x65f   : > { %v4145_v8 = vadd.f32 %v4144_v59, %v4136_v51  ;;  %v4121_v38 = vadd.f32 %v4120_v30, %v4112_v46  ;;  %v4137_v12 = vmul.f32 %v4112_v46, %v4112_v46 }
 0x661   : > { %v4122_v32 = vrot.slane %v4121_v38, 4  ;;  %v4146_v14 = vadd.f32 %v4145_v8, %v4137_v12 }
 0x663   : > { %v4123_v2 = vadd.f32 %v4122_v32, %v4121_v38  ;;  %v4147_v57 = vrot.slane %v4146_v14, 4 }
 0x665   : > { %v4124_v44 = vrot.slane %v4123_v2, 2  ;;  %v4148_v28 = vadd.f32 %v4147_v57, %v4146_v14 }
 0x667   : > { %v4125_v9 = vadd.f32 %v4124_v44, %v4123_v2  ;;  %v4149_v0 = vrot.slane %v4148_v28, 2 }
 0x669   : > { %v4126_v61 = vrot.slane %v4125_v9, 1  ;;  %v4150_v54 = vadd.f32 %v4149_v0, %v4148_v28 }
 0x66b   : > { %v4151_v10 = vrot.slane %v4150_v54, 1  ;;  %v4127_v15 = vadd.f32 %v4126_v61, %v4125_v9 }
 0x66d   : > { %v4152_v42 = vadd.f32 %v4151_v10, %v4150_v54  ;;  %v4956_v10 = vld [vmem:[%s8220_s4] ss:$0 sm:$0xff] }
 0x66f   : > { %v4153_v29 = vsel %vm8359_vm6, %v4127_v15, %v4152_v42 }
 0x670   : > { %5870 = vmatmul.mubr.f32.vlgmr.msra.gmra.mrb[2].mxu1 %v4153_v29 }
 0x673   : > { %v8109_v39 = vpop.f32.mrb[24].mxu0 }
 0x674   : > { %v5886_v23 = vpop.f32.mrb[25].mxu0 }
 0x675   : > { %v4502_v47 = vpop.f32.mrb[26].mxu0 }
 0x676   : > { %v5887_v35 = vpop.f32.mrb[27].mxu0 }
 0x67b   : > { %v4507_v19 = vpop.f32.mrb[28].mxu0 }
 0x67c   : > { %v5890_v56 = vpop.f32.mrb[29].mxu0 }
 0x67d   : > { %v4510_v37 = vpop.f32.mrb[30].mxu0  ;;  %v4508_v56 = vadd.f32 %v4956_v10, %v4507_v19 }
 0x67e   : > { %v5891_v1 = vpop.f32.mrb[31].mxu0 }
 0x67f   : > { %v4511_v1 = vadd.f32 %v4956_v10, %v4510_v37 }
 0x683   : > { %v4515_v3 = vpop.f32.mrb[32].mxu0 }
 0x684   : > { %v5894_v60 = vpop.f32.mrb[33].mxu0 }
 0x685   : > { %v4518_v20 = vpop.f32.mrb[34].mxu0 }
 0x686   : > { %v5895_v59 = vpop.f32.mrb[35].mxu0 }
 0x68b   : > { %v4523_v6 = vpop.f32.mrb[36].mxu0 }
 0x68c   : > { %v5898_v26 = vpop.f32.mrb[37].mxu0 }
 0x68d   : > { %v4526_v30 = vpop.f32.mrb[38].mxu0 }
 0x68e   : > { %v5899_v51 = vpop.f32.mrb[39].mxu0 }
 0x743   : > { %v4236_v52 = vpop.f32.mrb[2].mxu1 }
 0x744   : > { %v4240_v22 = vmul.f32 0.001953125, %v4236_v52  ;;  %v5871_v13 = vpop.f32.mrb[3].mxu1  ;;  %v4492_v52 = vadd.f32 %v4956_v10, %v8105_v18 }
 0x746   : > { %v4241_v7 = vmul.f32 %v4240_v22, %v4240_v22  ;;  %v4278_v40 = vsub.f32 0.0, %v4240_v22 }
 0x748   : > { %v4243_v34 = vrot.slane %v4241_v7, 7  ;;  %v4495_v7 = vadd.f32 %v4956_v10, %v8107_v48 }
 0x74a   : > { %v4245_v36 = vsub.f32 %v4240_v22, %v4243_v34  ;;  %v4500_v34 = vadd.f32 %v4956_v10, %v8109_v39 }
 0x74c   : > { %v4246_v16 = vmax.f32 %v4245_v36, 0.0  ;;  %v4503_v36 = vadd.f32 %v4956_v10, %v4502_v47 }
 0x74e   : > { %v4247_v21 = vadd.f32 1e-05, %v4246_v16 }
 0x750   : > { %6522 = vrsqrt.f32 %v4247_v21 }
 0x75a   : > { %v6523_v41 = vpop.eup %6522 }
 0x75b   : > { %v4279_v49 = vrot.slane %v6523_v41, 1  ;;  %4253 = vrot.lane.b32.xlu1 %v6523_v41, %s6628_s29  ;;  %4250 = vrot.lane.b32.xlu0 %v6523_v41, %s6627_s28 }
 0x75d   : > { %v4281_v62 = vmul.f32 %v4279_v49, %v4278_v40  ;;  %v4519_v40 = vadd.f32 %v4956_v10, %v4518_v20  ;;  %v4524_v49 = vadd.f32 %v4956_v10, %v4523_v6 }
 0x75f   : > { %4256 = vrot.lane.b32.xlu0 %v6523_v41, %s6626_s26  ;;  %4283 = vrot.lane.b32.xlu1 %v4281_v62, %s6627_s28 }
 0x763   : > { %4259 = vrot.lane.b32.xlu0 %v6523_v41, %s6629_s10  ;;  %4286 = vrot.lane.b32.xlu1 %v4281_v62, %s6628_s29  ;;  %s257_s29 = sand.u32 1, %s6610_s22  }
 0x764   : > { %s8175_s11 = scalar_lea.sflag [#allocation5], %s257_s29 }
 0x767   : > { %4262 = vrot.lane.b32.xlu0 %v6523_v41, %s8360_s16  ;;  %4289 = vrot.lane.b32.xlu1 %v4281_v62, %s6626_s26 }
 0x76b   : > { %4265 = vrot.lane.b32.xlu0 %v6523_v41, %s8361_s15  ;;  %4292 = vrot.lane.b32.xlu1 %v4281_v62, %s6629_s10  ;;  %s8161_s10 = smul.u32 80, %s257_s29 }
 0x76d   : > { %s259_s19 = scalar_lea.vmem [#allocation6], %s8161_s10 }
 0x76e   : > { %s4602_s12 = sshll.u32 %s259_s19, 4  ;;  %s8171_s12 = int_to_ptr.vmem [resolvable:$true] %s4602_s12 }
 0x76f   : > { %4268 = vrot.lane.b32.xlu0 %v6523_v41, %s8362_s17  ;;  %4295 = vrot.lane.b32.xlu1 %v4281_v62, %s8360_s16  ;;  %s6552_s14 = scalar_lea.vmem %s8171_s12, 1280  ;;  %s6556_s16 = sshll.u32 %s6634_s9, 4  ;;  %s6557_s16 = int_to_ptr.vmem [resolvable:$false] %s6556_s16 }
 0x770   : > { %p6553_p6 = scmp.ne.s32.totalorder %s8171_s12, %s6552_s14  ;;  %p6559_p2 = scmp.lt.s32.totalorder %s8171_s12, %s6557_s16 }
 0x772   : > { %p6554_p10 = pnand %p6553_p6, %p8377_p9 }
 0x773   : > { %4298 = vrot.lane.b32.xlu0 %v4281_v62, %s8361_s15  ;;  %4301 = vrot.lane.b32.xlu1 %v4281_v62, %s8362_s17  ;;  %s6558_s15 = scalar_lea.vmem %s6557_s16, 2560 }
 0x774   : > { %p6555_p12 = pneg %p6554_p10  ;;  %p6560_p3 = scmp.lt.s32.totalorder %s6558_s15, %s6552_s14 }
 0x776   : > { %p6561_p4 = por %p6560_p3, %p6559_p2 }
 0x778   : > { %p6562_p7 = pnand %p6561_p4, %p6555_p12 }
 0x7cd   : > { %v4254_v46 = vpop.permute.xlu1 %4253  ;;  %v4251_v24 = vpop.permute.xlu0 %4250 }
 0x7ce   : > { %v4271_v57 = vsel %vm8363_vm7, %v6523_v41, %v4251_v24  ;;  %v4516_v41 = vadd.f32 %v4956_v10, %v4515_v3 }
 0x7cf   : > { %v4272_v44 = vsel %vm8364_vm8, %v4271_v57, %v4254_v46 }
 0x7d1   : > { %v4257_v8 = vpop.permute.xlu0 %4256  ;;  %v4284_v38 = vpop.permute.xlu1 %4283 }
 0x7d2   : > { %v4273_v0 = vsel %vm8365_vm12, %v4272_v44, %v4257_v8  ;;  %v4304_v31 = vsel %vm8369_vm4, %v4281_v62, %v4284_v38 }
 0x7d5   : > { %v4260_v12 = vpop.permute.xlu0 %4259  ;;  %v4287_v32 = vpop.permute.xlu1 %4286 }
 0x7d6   : > { %v4274_v61 = vsel %vm8366_vm9, %v4273_v0, %v4260_v12  ;;  %v4305_v23 = vsel %vm8371_vm0, %v4304_v31, %v4287_v32 }
 0x7d9   : > { %v4263_v14 = vpop.permute.xlu0 %4262  ;;  %v4290_v2 = vpop.permute.xlu1 %4289 }
 0x7da   : > { %v4275_v54 = vsel %vm8367_vm10, %v4274_v61, %v4263_v14  ;;  %v4306_v22 = vsel %vm8372_vm2, %v4305_v23, %v4290_v2 }
 0x7dd   : > { %v4266_v28 = vpop.permute.xlu0 %4265  ;;  %v4293_v9 = vpop.permute.xlu1 %4292 }
 0x7de   : > { %v4276_v15 = vsel %vm8368_vm5, %v4275_v54, %v4266_v28  ;;  %v4307_v16 = vsel %vm8373_vm11, %v4306_v22, %v4293_v9 }
 0x7e1   : > { %v4269_v42 = vpop.permute.xlu0 %4268  ;;  %v4296_v29 = vpop.permute.xlu1 %4295 }
 0x7e2   : > { %v4277_v55 = vsel %vm8370_vm14, %v4276_v15, %v4269_v42  ;;  %v4308_v18 = vsel %vm8374_vm3, %v4307_v16, %v4296_v29 }
 0x7e3   : > { %v4533_v13 = vrot.slane %v4277_v55, %v2202_v4  ;;  %v4527_v4 = vadd.f32 %v4956_v10, %v4526_v30 }
 0x7e5   : > { %v4299_v21 = vpop.permute.xlu0 %4298  ;;  %v4302_v35 = vpop.permute.xlu1 %4301  ;;  %v4534_v48 = vmul.f32 %v4533_v13, %v8054_v50  ;;  %v4535_v39 = vmul.f32 %v4533_v13, %v8059_v17  ;;  %v4536_v47 = vmul.f32 %v4533_v13, %v8064_v11  ;;  %v4537_v19 = vmul.f32 %v4533_v13, %v8069_v33 }
 0x7e6   : > { %v4309_v60 = vsel %vm8375_vm15, %v4308_v18, %v4299_v21  ;;  %v4538_v37 = vmul.f32 %v4533_v13, %v8074_v27  ;;  %v4539_v3 = vmul.f32 %v4533_v13, %v8079_v43  ;;  %v4540_v59 = vmul.f32 %v4533_v13, %v8084_v45 }
 0x7e7   : > { %v4310_v62 = vsel %vm8376_vm13, %v4309_v60, %v4302_v35  ;;  %v4541_v6 = vmul.f32 %v4533_v13, %v8089_v5  ;;  %v4542_v50 = vmul.f32 %v4533_v13, %v8094_v25  ;;  %v4543_v17 = vmul.f32 %v4533_v13, %v8099_v53 }
 0x7e8   : > { %v4547_v20 = vrot.slane %v4310_v62, %v2216_v63 }
 0x7ea   : > { %v4548_v11 = vadd.f32 %v4547_v20, %v4534_v48  ;;  %v4549_v33 = vadd.f32 %v4547_v20, %v4535_v39  ;;  %v4550_v26 = vadd.f32 %v4547_v20, %v4536_v47  ;;  %v4551_v27 = vadd.f32 %v4547_v20, %v4537_v19 }
 0x7eb   : > { %v4552_v30 = vadd.f32 %v4547_v20, %v4538_v37  ;;  %v4553_v43 = vadd.f32 %v4547_v20, %v4539_v3  ;;  %v4554_v51 = vadd.f32 %v4547_v20, %v4540_v59  ;;  %v4555_v58 = vadd.f32 %v4547_v20, %v4541_v6 }
 0x7ec   : > { %v4556_v63 = vadd.f32 %v4547_v20, %v4542_v50  ;;  %v4558_v45 = vadd.f32 %v4548_v11, %v4492_v52  ;;  %v4559_v46 = vadd.f32 %v4549_v33, %v4495_v7  ;;  %v4560_v5 = vadd.f32 %v4550_v26, %v4500_v34 }
 0x7ed   : > { %v4561_v24 = vadd.f32 %v4551_v27, %v4503_v36  ;;  %v4562_v25 = vadd.f32 %v4552_v30, %v4508_v56  ;;  %v4563_v8 = vadd.f32 %v4553_v43, %v4511_v1  ;;  %v4564_v38 = vadd.f32 %v4554_v51, %v4516_v41 }
 0x7ee   : > { %v4565_v12 = vadd.f32 %v4555_v58, %v4519_v40  ;;  %v4566_v53 = vadd.f32 %v4556_v63, %v4524_v49  ;;  %v4568_v32 = vmax.f32 %v4558_v45, 0.0  ;;  %v4569_v14 = vmax.f32 %v4559_v46, 0.0 }
 0x7ef   : > { %v4570_v2 = vmax.f32 %v4560_v5, 0.0  ;;  %v4571_v57 = vmax.f32 %v4561_v24, 0.0  ;;  %v4572_v44 = vmax.f32 %v4562_v25, 0.0  ;;  %v4573_v28 = vmax.f32 %v4563_v8, 0.0 }
 0x7f0   : > { %v4574_v9 = vmax.f32 %v4564_v38, 0.0  ;;  %v4575_v0 = vmax.f32 %v4565_v12, 0.0  ;;  %v4576_v61 = vmax.f32 %v4566_v53, 0.0  ;;  %v4557_v54 = vadd.f32 %v4547_v20, %v4543_v17  ;;  %4578 = vst [vmem:[%s259_s19] sm:$0xff] %v4568_v32  ;;  %4579 = vst [vmem:[%s259_s19 + $0x8] sm:$0xff] %v4569_v14 }
 0x7f1   : > { %4580 = vst [vmem:[%s259_s19 + $0x10] sm:$0xff] %v4570_v2  ;;  %4581 = vst [vmem:[%s259_s19 + $0x18] sm:$0xff] %v4571_v57 }
 0x7f2   : > { %4582 = vst [vmem:[%s259_s19 + $0x20] sm:$0xff] %v4572_v44  ;;  %4583 = vst [vmem:[%s259_s19 + $0x28] sm:$0xff] %v4573_v28  ;;  %v4567_v10 = vadd.f32 %v4557_v54, %v4527_v4 }
 0x7f3   : > { %4584 = vst [vmem:[%s259_s19 + $0x30] sm:$0xff] %v4574_v9  ;;  %4585 = vst [vmem:[%s259_s19 + $0x38] sm:$0xff] %v4575_v0 }
 0x7f4   : > { %4586 = vst [vmem:[%s259_s19 + $0x40] sm:$0xff] %v4576_v61  ;;  %v4577_v15 = vmax.f32 %v4567_v10, 0.0 }
 0x7f6   : > { %4587 = vst [vmem:[%s259_s19 + $0x48] sm:$0xff] %v4577_v15 }
 0x7f7   : > { %6565 = shalt.err (!%p6562_p7)
}
 0x7f8   : > { %s6566_s17 = scalar_lea.hbm %s8169_s13, 1280  ;;  %s6570_s29 = scalar_lea.hbm %s8222_s6, 2560 }
 0x7f9   : > { %p6567_p8 = scmp.ne.s32.totalorder %s8169_s13, %s6566_s17  ;;  %p6571_p1 = scmp.lt.u32.totalorder %s8169_s13, %s8222_s6 }
 0x7fa   : > { %p6572_p0 = scmp.lt.u32.totalorder %s6570_s29, %s6566_s17  ;;  %p6574_p6 = scmp.lt.u32.totalorder %s6566_s17, %s8169_s13 }
 0x7fb   : > { %p6568_p11 = pnand %p6567_p8, %p8377_p9 }
 0x7fc   : > { %p6573_p5 = por %p6572_p0, %p6571_p1 }
 0x7fd   : > { %p6569_p13 = pneg %p6568_p11 }
 0x7fe   : > { %p6575_p10 = por %p6574_p6, %p6573_p5 }
 0x800   : > { %p6576_p12 = pnand %p6575_p10, %p6569_p13 }
 0x802   : > { %6579 = shalt.err (!%p6576_p12)
}
 0x803   : > { %s6635_s19 = smov 128   ;;  %s6636_s20 = smov 8  }
 0x804   : > { %6295 = dma.vmem_to_hbm [thread:$0]  (%p8377_p9), %s8171_s12, 1280, %s8169_s13, %s8175_s11, %s6635_s19, %s6635_s19, %s6636_s20  }
 0x805 PF: > { %p6307_p2 = scmp.ge.s32.totalorder %s6618_s24, 2  ;;  %s4617_s25 = sand.u32 1, %s6606_s21  }
 0x806   : > { %p8378_p3 = scmp.ne.s32.totalorder %s8254_s8, 0  ;;  %s4618_s14 = scalar_lea.sflag [#allocation5], %s4617_s25 }
 0x808   : > { %p6302_p4 = pnand %p6307_p2, %p8378_p3 }
 0x80a   : > { %6601 = dma.done.wait (!%p6302_p4), %s4618_s14, 1280  }
 0x80b   : > { %6603 = vsyncadd (!%p6302_p4), %s4618_s14, 4294966016  ;;  %p17_p7 = scmp.ge.s32.totalorder %s6697_s27, 4   ;;  %s8379_s21 = smov %s6610_s22 }
 0x80c   : > { %s8380_s22 = smov %s6614_s23  ;;  %s8381_s23 = smov %s6708_s30 }
 0x80d   : > { %s8382_s24 = smov %s6697_s27  ;;  %19 = sbr.rel (!%p17_p7) target bundleno = 4 (0x4), region = 100 }
 0x814   :  { %4623 = vsyncpa [#allocation4], 1 }
 0x815   :  { %4625 = vsyncpa [#allocation4 + $0x1], 1 }
 0x816   :  { %4626 = vsyncpa [#allocation5], 1 }
 0x817   :  { %4628 = vsyncpa [#allocation5 + $0x1], 1 }

</bundles_post_ra>
